<compile_context>
chip_gen: v6e
topology: v6e:2x2x1
jax: 0.10.0
libtpu: 0.0.40
codegen_flags: <defaults>
</compile_context>

<pallas_src>
import functools
import math

import jax
import jax.numpy as jnp
from jax import lax
from jax.experimental import pallas as pl
from jax.experimental.pallas import tpu as pltpu


# ----------------------------------------------------------------------------
# Fused decoder-layer kernel (one batch block per grid step)
# ----------------------------------------------------------------------------
def _decoder_layer_kernel(x_ref, enc_ref,
                          w_qkv_s_ref, w_o_s_ref,
                          w_q_c_ref, w_kv_c_ref, w_o_c_ref,
                          w1_ref, w2_ref, b_wide_ref, vec_ref,
                          out_ref, *, n_heads, eps):
    H = n_heads
    D = x_ref.shape[-1]
    dk = D // H
    dff = w1_ref.shape[-1]
    scale = 1.0 / math.sqrt(dk)

    # Packed small-operand slabs, loaded once.
    b_wide = b_wide_ref[...]          # (3, wide): [b_qkv_self | b_kv_cross | b_ffn1]
    vec = vec_ref[...]                # (10, D):  biases + LayerNorm params

    b_qkv_s = b_wide[0:1, :3 * D]     # (1, 3D)
    b_kv_c = b_wide[1:2, :2 * D]      # (1, 2D)
    b_ff1 = b_wide[2:3, :dff]         # (1, dff)
    b_o_s = vec[0:1]
    b_q_c = vec[1:2]
    b_o_c = vec[2:3]
    b_ff2 = vec[3:4]
    g1, be1 = vec[4:5], vec[5:6]
    g2, be2 = vec[6:7], vec[7:8]
    g3, be3 = vec[8:9], vec[9:10]

    w_o_s = w_o_s_ref[...]
    w_o_c = w_o_c_ref[...]

    def mha(q, k, v, wo, bo):
        """Multi-head attention on (Lq,D) / (Lk,D) full-width Q/K/V."""
        q = q * scale                              # one scale of Q, not of scores
        outs = []
        for h in range(H):                         # static; per-head score/PV only
            sl = slice(h * dk, (h + 1) * dk)
            # scores = q_h @ k_h^T without materializing the transpose
            s = lax.dot_general(q[:, sl], k[:, sl],
                                dimension_numbers=(((1,), (1,)), ((), ())),
                                preferred_element_type=jnp.float32)   # (Lq, Lk)
            s = s - jnp.max(s, axis=-1, keepdims=True)
            e = jnp.exp(s)
            p = e / jnp.sum(e, axis=-1, keepdims=True)                # exact softmax
            outs.append(jnp.dot(p, v[:, sl],
                                preferred_element_type=jnp.float32))  # (Lq, dk)
        o = jnp.concatenate(outs, axis=-1)          # (Lq, D) == concat(heads)
        # single full-width output projection with the un-split W_o
        return jnp.dot(o, wo, preferred_element_type=jnp.float32) + bo

    def layer_norm(z, g, b):
        mu = jnp.mean(z, axis=-1, keepdims=True)
        zc = z - mu
        var = jnp.mean(zc * zc, axis=-1, keepdims=True)
        return zc * lax.rsqrt(var + eps) * g + b

    bb = x_ref.shape[0]
    for i in range(bb):                             # static unroll over batch block
        x = x_ref[i].astype(jnp.float32)            # (Lq, D)
        enc = enc_ref[i].astype(jnp.float32)        # (Lk, D)

        # --- self attention: ONE (Lq,D)x(D,3D) projection -> Q|K|V ---
        qkv = jnp.dot(x, w_qkv_s_ref[...],
                      preferred_element_type=jnp.float32) + b_qkv_s
        attn = mha(qkv[:, 0:D], qkv[:, D:2 * D], qkv[:, 2 * D:3 * D], w_o_s, b_o_s)
        x = layer_norm(x + attn, g1, be1)

        # --- cross attention: one Q matmul + one packed KV matmul ---
        q = jnp.dot(x, w_q_c_ref[...],
                    preferred_element_type=jnp.float32) + b_q_c
        kv = jnp.dot(enc, w_kv_c_ref[...],
                     preferred_element_type=jnp.float32) + b_kv_c
        attn = mha(q, kv[:, 0:D], kv[:, D:2 * D], w_o_c, b_o_c)
        x = layer_norm(x + attn, g2, be2)

        # --- position-wise FFN (conv1d k=1 == matmul over features) + norm3 ---
        h1 = jnp.maximum(
            jnp.dot(x, w1_ref[...], preferred_element_type=jnp.float32) + b_ff1, 0.0)
        y = jnp.dot(h1, w2_ref[...], preferred_element_type=jnp.float32) + b_ff2
        x = layer_norm(x + y, g3, be3)

        out_ref[i] = x.astype(out_ref.dtype)


# ----------------------------------------------------------------------------
# Wrapper
# ----------------------------------------------------------------------------
def _pack_params(params):
    """Pack the 28 per-tensor operands into 9 slabs (done once, outside the kernel)."""
    p = params
    swq, sbq, swk, sbk, swv, sbv, swo, sbo = p["self_attn"]
    cwq, cbq, cwk, cbk, cwv, cbv, cwo, cbo = p["cross_attn"]
    D = swq.shape[0]
    dff = p["w1"].shape[1]
    wide = max(3 * D, 2 * D, dff)

    def pad_row(v):                                  # (1, n) -> (1, wide)
        return jnp.pad(v, ((0, 0), (0, wide - v.shape[1])))

    w_qkv_s = jnp.concatenate([swq, swk, swv], axis=1)   # (D, 3D)
    w_kv_c = jnp.concatenate([cwk, cwv], axis=1)         # (D, 2D)
    b_wide = jnp.concatenate([
        pad_row(jnp.concatenate([sbq, sbk, sbv], axis=1)),   # self QKV bias (1, 3D)
        pad_row(jnp.concatenate([cbk, cbv], axis=1)),        # cross KV bias (1, 2D)
        pad_row(p["b1"]),                                    # FFN-1 bias    (1, dff)
    ], axis=0)                                               # (3, wide)
    vecs = jnp.concatenate([
        sbo, cbq, cbo, p["b2"],
        p["norm1_g"], p["norm1_b"],
        p["norm2_g"], p["norm2_b"],
        p["norm3_g"], p["norm3_b"],
    ], axis=0)                                               # (10, D)
    return (w_qkv_s, swo, cwq, w_kv_c, cwo, p["w1"], p["w2"], b_wide, vecs)


def decoder_layer_forward(x, enc_output, params, n_heads=8, eps=1e-5,
                          batch_blocks=1):
    """Pallas implementation of DecoderLayer.forward (eval mode), fully fused.

    batch_blocks=1 (default): whole batch in one grid step (best on single-TC
    v5e/v6e).  On v7x (2 TensorCores) pass batch_blocks=2 so each core runs
    exactly one step of the "parallel" grid axis.
    """
    B, Lq, D = x.shape
    _, Lk, _ = enc_output.shape
    if D % n_heads != 0:
        raise ValueError(f"d_model={D} must be divisible by n_heads={n_heads}")
    if B % batch_blocks != 0:
        raise ValueError(f"batch={B} must be divisible by batch_blocks={batch_blocks}")
    bb = B // batch_blocks
    dk = D // n_heads
    dff = params["w1"].shape[1]

    weights = _pack_params(params)

    def full_spec(a):
        nd = a.ndim
        # whole array, constant block index -> fetched once, reused every step
        return pl.BlockSpec(a.shape, lambda g: (0,) * nd)

    # Advisory cost estimate (tiny, overhead-bound call): helps XLA scheduling.
    flops = 2 * B * (Lq * D * 3 * D                 # self QKV projection
                     + 2 * n_heads * Lq * Lq * dk   # self scores + PV
                     + Lq * D * D                   # self out projection
                     + Lq * D * D                   # cross Q projection
                     + Lk * D * 2 * D               # cross KV projection
                     + 2 * n_heads * Lq * Lk * dk   # cross scores + PV
                     + Lq * D * D                   # cross out projection
                     + 2 * Lq * D * dff)            # FFN
    transcendentals = B * (n_heads * (Lq * Lq + Lq * Lk) + 3 * Lq)
    bytes_accessed = 4 * (x.size + enc_output.size + B * Lq * D
                          + sum(int(w.size) for w in weights))

    kernel = functools.partial(_decoder_layer_kernel, n_heads=n_heads, eps=eps)
    return pl.pallas_call(
        kernel,
        out_shape=jax.ShapeDtypeStruct((B, Lq, D), x.dtype),
        grid=(batch_blocks,),
        in_specs=[pl.BlockSpec((bb, Lq, D), lambda g: (g, 0, 0)),
                  pl.BlockSpec((bb, Lk, D), lambda g: (g, 0, 0))]
                 + [full_spec(w) for w in weights],
        out_specs=pl.BlockSpec((bb, Lq, D), lambda g: (g, 0, 0)),
        compiler_params=pltpu.CompilerParams(
            dimension_semantics=("parallel",)),     # v7x: cores split the batch axis
        cost_estimate=pl.CostEstimate(flops=int(flops),
                                      transcendentals=int(transcendentals),
                                      bytes_accessed=int(bytes_accessed)),
    )(x, enc_output, *weights)


# ----------------------------------------------------------------------------
# Pure-JAX reference (for numerical sanity check)
# ----------------------------------------------------------------------------
def _ref_attention(q_in, kv, params, n_heads):
    wq, bq, wk, bk, wv, bv, wo, bo = params
    B, Lq, D = q_in.shape
    Lk = kv.shape[1]
    dk = D // n_heads
    Q = (q_in @ wq + bq).reshape(B, Lq, n_heads, dk)
    K = (kv @ wk + bk).reshape(B, Lk, n_heads, dk)
    V = (kv @ wv + bv).reshape(B, Lk, n_heads, dk)
    s = jnp.einsum("bqhd,bkhd->bhqk", Q, K) / math.sqrt(dk)
    p = jax.nn.softmax(s, axis=-1)
    o = jnp.einsum("bhqk,bkhd->bqhd", p, V).reshape(B, Lq, D)
    return o @ wo + bo


def _ref_layernorm(x, g, b, eps=1e-5):
    mu = jnp.mean(x, axis=-1, keepdims=True)
    var = jnp.mean((x - mu) ** 2, axis=-1, keepdims=True)
    return (x - mu) * lax.rsqrt(var + eps) * g + b


def _ref_forward(x, enc, params, n_heads=8):
    p = params
    x = _ref_layernorm(x + _ref_attention(x, x, p["self_attn"], n_heads),
                       p["norm1_g"], p["norm1_b"])
    x = _ref_layernorm(x + _ref_attention(x, enc, p["cross_attn"], n_heads),
                       p["norm2_g"], p["norm2_b"])
    y = jnp.maximum(x @ p["w1"] + p["b1"], 0.0) @ p["w2"] + p["b2"]
    return _ref_layernorm(x + y, p["norm3_g"], p["norm3_b"])


# ----------------------------------------------------------------------------
# Main
# ----------------------------------------------------------------------------
if __name__ == "__main__":
    B, L_dec, L_enc = 2, 8, 16
    d_model, n_heads = 32, 8
    d_ff = 4 * d_model  # 128

    key = jax.random.PRNGKey(0)
    ks = jax.random.split(key, 16)

    def w(k, shape, scale=0.05):
        return (scale * jax.random.normal(k, shape)).astype(jnp.float32)

    def make_attn_params(k):
        kk = jax.random.split(k, 8)
        return (
            w(kk[0], (d_model, d_model)), w(kk[1], (1, d_model)),   # Wq, bq
            w(kk[2], (d_model, d_model)), w(kk[3], (1, d_model)),   # Wk, bk
            w(kk[4], (d_model, d_model)), w(kk[5], (1, d_model)),   # Wv, bv
            w(kk[6], (d_model, d_model)), w(kk[7], (1, d_model)),   # Wo, bo
        )

    params = {
        "self_attn": make_attn_params(ks[0]),
        "cross_attn": make_attn_params(ks[1]),
        # conv1: Conv1d(d_model, d_ff, 1)  -> (d_model, d_ff) matmul weight
        "w1": w(ks[2], (d_model, d_ff)), "b1": w(ks[3], (1, d_ff)),
        # conv2: Conv1d(d_ff, d_model, 1)  -> (d_ff, d_model) matmul weight
        "w2": w(ks[4], (d_ff, d_model)), "b2": w(ks[5], (1, d_model)),
        "norm1_g": jnp.ones((1, d_model), jnp.float32),
        "norm1_b": jnp.zeros((1, d_model), jnp.float32),
        "norm2_g": jnp.ones((1, d_model), jnp.float32),
        "norm2_b": jnp.zeros((1, d_model), jnp.float32),
        "norm3_g": jnp.ones((1, d_model), jnp.float32),
        "norm3_b": jnp.zeros((1, d_model), jnp.float32),
    }

    x = jax.random.normal(ks[6], (B, L_dec, d_model), jnp.float32)
    enc_output = jax.random.normal(ks[7], (B, L_enc, d_model), jnp.float32)

    out = decoder_layer_forward(x, enc_output, params, n_heads=n_heads)
    out = jax.block_until_ready(out)

    ref = jax.block_until_ready(_ref_forward(x, enc_output, params, n_heads))
    assert out.shape == (B, L_dec, d_model)
    # exact softmax now -> tight tolerance (only fp accumulation-order deltas)
    assert jnp.allclose(out, ref, rtol=1e-4, atol=1e-4), float(
        jnp.max(jnp.abs(out - ref)))

    print("KERNEL_OK")
</pallas_src>

<mosaic_0001>
module attributes {stable_mosaic.version = 11 : i64} {
  func.func @_decoder_layer_kernel(%arg0: i32, %arg1: memref<2x8x32xf32, #tpu.memory_space<vmem>>, %arg2: memref<2x16x32xf32, #tpu.memory_space<vmem>>, %arg3: memref<32x96xf32, #tpu.memory_space<vmem>>, %arg4: memref<32x32xf32, #tpu.memory_space<vmem>>, %arg5: memref<32x32xf32, #tpu.memory_space<vmem>>, %arg6: memref<32x64xf32, #tpu.memory_space<vmem>>, %arg7: memref<32x32xf32, #tpu.memory_space<vmem>>, %arg8: memref<32x128xf32, #tpu.memory_space<vmem>>, %arg9: memref<128x32xf32, #tpu.memory_space<vmem>>, %arg10: memref<3x128xf32, #tpu.memory_space<vmem>>, %arg11: memref<10x32xf32, #tpu.memory_space<vmem>>, %arg12: memref<2x8x32xf32, #tpu.memory_space<vmem>>) attributes {dimension_semantics = [#tpu.dimension_semantics<parallel>], iteration_bounds = array<i64: 1>, scalar_prefetch = 0 : i64, scratch_operands = 0 : i64, tpu.core_type = #tpu.core_type<tc>, window_params = [{transform_indices = @transform_0, window_bounds = array<i64: 2, 8, 32>}, {transform_indices = @transform_1, window_bounds = array<i64: 2, 16, 32>}, {pipeline_mode = #tpu.pipeline_mode<synchronous>, transform_indices = @transform_2, window_bounds = array<i64: 32, 96>}, {pipeline_mode = #tpu.pipeline_mode<synchronous>, transform_indices = @transform_3, window_bounds = array<i64: 32, 32>}, {pipeline_mode = #tpu.pipeline_mode<synchronous>, transform_indices = @transform_4, window_bounds = array<i64: 32, 32>}, {pipeline_mode = #tpu.pipeline_mode<synchronous>, transform_indices = @transform_5, window_bounds = array<i64: 32, 64>}, {pipeline_mode = #tpu.pipeline_mode<synchronous>, transform_indices = @transform_6, window_bounds = array<i64: 32, 32>}, {pipeline_mode = #tpu.pipeline_mode<synchronous>, transform_indices = @transform_7, window_bounds = array<i64: 32, 128>}, {pipeline_mode = #tpu.pipeline_mode<synchronous>, transform_indices = @transform_8, window_bounds = array<i64: 128, 32>}, {pipeline_mode = #tpu.pipeline_mode<synchronous>, transform_indices = @transform_9, window_bounds = array<i64: 3, 128>}, {pipeline_mode = #tpu.pipeline_mode<synchronous>, transform_indices = @transform_10, window_bounds = array<i64: 10, 32>}, {transform_indices = @transform_11, window_bounds = array<i64: 2, 8, 32>}]} {
    %c0 = arith.constant 0 : index
    %c0_0 = arith.constant 0 : index
    %0 = vector.load %arg10[%c0, %c0_0] : memref<3x128xf32, #tpu.memory_space<vmem>>, vector<3x128xf32>
    %c0_1 = arith.constant 0 : index
    %c0_2 = arith.constant 0 : index
    %1 = vector.load %arg11[%c0_1, %c0_2] : memref<10x32xf32, #tpu.memory_space<vmem>>, vector<10x32xf32>
    %2 = vector.extract_strided_slice %0 {offsets = [0, 0], sizes = [1, 96], strides = [1, 1]} : vector<3x128xf32> to vector<1x96xf32>
    %3 = vector.extract_strided_slice %0 {offsets = [1, 0], sizes = [1, 64], strides = [1, 1]} : vector<3x128xf32> to vector<1x64xf32>
    %4 = vector.extract_strided_slice %0 {offsets = [2, 0], sizes = [1, 128], strides = [1, 1]} : vector<3x128xf32> to vector<1x128xf32>
    %5 = vector.extract_strided_slice %1 {offsets = [0, 0], sizes = [1, 32], strides = [1, 1]} : vector<10x32xf32> to vector<1x32xf32>
    %6 = vector.extract_strided_slice %1 {offsets = [1, 0], sizes = [1, 32], strides = [1, 1]} : vector<10x32xf32> to vector<1x32xf32>
    %7 = vector.extract_strided_slice %1 {offsets = [2, 0], sizes = [1, 32], strides = [1, 1]} : vector<10x32xf32> to vector<1x32xf32>
    %8 = vector.extract_strided_slice %1 {offsets = [3, 0], sizes = [1, 32], strides = [1, 1]} : vector<10x32xf32> to vector<1x32xf32>
    %9 = vector.extract_strided_slice %1 {offsets = [4, 0], sizes = [1, 32], strides = [1, 1]} : vector<10x32xf32> to vector<1x32xf32>
    %10 = vector.extract_strided_slice %1 {offsets = [5, 0], sizes = [1, 32], strides = [1, 1]} : vector<10x32xf32> to vector<1x32xf32>
    %11 = vector.extract_strided_slice %1 {offsets = [6, 0], sizes = [1, 32], strides = [1, 1]} : vector<10x32xf32> to vector<1x32xf32>
    %12 = vector.extract_strided_slice %1 {offsets = [7, 0], sizes = [1, 32], strides = [1, 1]} : vector<10x32xf32> to vector<1x32xf32>
    %13 = vector.extract_strided_slice %1 {offsets = [8, 0], sizes = [1, 32], strides = [1, 1]} : vector<10x32xf32> to vector<1x32xf32>
    %14 = vector.extract_strided_slice %1 {offsets = [9, 0], sizes = [1, 32], strides = [1, 1]} : vector<10x32xf32> to vector<1x32xf32>
    %c0_3 = arith.constant 0 : index
    %c0_4 = arith.constant 0 : index
    %15 = vector.load %arg4[%c0_3, %c0_4] : memref<32x32xf32, #tpu.memory_space<vmem>>, vector<32x32xf32>
    %c0_5 = arith.constant 0 : index
    %c0_6 = arith.constant 0 : index
    %16 = vector.load %arg7[%c0_5, %c0_6] : memref<32x32xf32, #tpu.memory_space<vmem>>, vector<32x32xf32>
    %c0_7 = arith.constant 0 : index
    %c0_8 = arith.constant 0 : index
    %c0_9 = arith.constant 0 : index
    %17 = vector.load %arg1[%c0_7, %c0_8, %c0_9] : memref<2x8x32xf32, #tpu.memory_space<vmem>>, vector<1x8x32xf32>
    %18 = vector.shape_cast %17 : vector<1x8x32xf32> to vector<8x32xf32>
    %c0_10 = arith.constant 0 : index
    %c0_11 = arith.constant 0 : index
    %c0_12 = arith.constant 0 : index
    %19 = vector.load %arg2[%c0_10, %c0_11, %c0_12] : memref<2x16x32xf32, #tpu.memory_space<vmem>>, vector<1x16x32xf32>
    %20 = vector.shape_cast %19 : vector<1x16x32xf32> to vector<16x32xf32>
    %c0_13 = arith.constant 0 : index
    %c0_14 = arith.constant 0 : index
    %21 = vector.load %arg3[%c0_13, %c0_14] : memref<32x96xf32, #tpu.memory_space<vmem>>, vector<32x96xf32>
    %cst = arith.constant dense<0.000000e+00> : vector<8x96xf32>
    %22 = tpu.matmul %18, %21, %cst {dimension_numbers = #tpu.dot_dimension_numbers<[1], [0], [0], [1], [0, 0, 1, 1], [], []>} : vector<8x32xf32>, vector<32x96xf32>, vector<8x96xf32> -> vector<8x96xf32>
    %23 = vector.broadcast %2 : vector<1x96xf32> to vector<8x96xf32>
    %24 = arith.addf %22, %23 : vector<8x96xf32>
    %25 = vector.extract_strided_slice %24 {offsets = [0, 0], sizes = [8, 32], strides = [1, 1]} : vector<8x96xf32> to vector<8x32xf32>
    %26 = vector.extract_strided_slice %24 {offsets = [0, 32], sizes = [8, 32], strides = [1, 1]} : vector<8x96xf32> to vector<8x32xf32>
    %27 = vector.extract_strided_slice %24 {offsets = [0, 64], sizes = [8, 32], strides = [1, 1]} : vector<8x96xf32> to vector<8x32xf32>
    %cst_15 = arith.constant 5.000000e-01 : f32
    %28 = vector.broadcast %cst_15 : f32 to vector<8x32xf32>
    %29 = arith.mulf %25, %28 : vector<8x32xf32>
    %30 = vector.extract_strided_slice %29 {offsets = [0, 0], sizes = [8, 4], strides = [1, 1]} : vector<8x32xf32> to vector<8x4xf32>
    %31 = vector.extract_strided_slice %26 {offsets = [0, 0], sizes = [8, 4], strides = [1, 1]} : vector<8x32xf32> to vector<8x4xf32>
    %cst_16 = arith.constant dense<0.000000e+00> : vector<8x8xf32>
    %32 = tpu.matmul %30, %31, %cst_16 {dimension_numbers = #tpu.dot_dimension_numbers<[1], [1], [0], [0], [0, 0, 1, 0], [], []>} : vector<8x4xf32>, vector<8x4xf32>, vector<8x8xf32> -> vector<8x8xf32>
    %cst_17 = arith.constant dense<0xFF800000> : vector<8xf32>
    %33 = vector.multi_reduction <maximumf>, %32, %cst_17 [1] : vector<8x8xf32> to vector<8xf32>
    %34 = vector.shape_cast %33 : vector<8xf32> to vector<8x1xf32>
    %35 = vector.broadcast %34 : vector<8x1xf32> to vector<8x8xf32>
    %36 = arith.subf %32, %35 : vector<8x8xf32>
    %37 = math.exp %36 : vector<8x8xf32>
    %cst_18 = arith.constant dense<0.000000e+00> : vector<8xf32>
    %38 = vector.multi_reduction <add>, %37, %cst_18 [1] : vector<8x8xf32> to vector<8xf32>
    %39 = vector.shape_cast %38 : vector<8xf32> to vector<8x1xf32>
    %40 = vector.broadcast %39 : vector<8x1xf32> to vector<8x8xf32>
    %41 = arith.divf %37, %40 : vector<8x8xf32>
    %42 = vector.extract_strided_slice %27 {offsets = [0, 0], sizes = [8, 4], strides = [1, 1]} : vector<8x32xf32> to vector<8x4xf32>
    %cst_19 = arith.constant dense<0.000000e+00> : vector<8x4xf32>
    %43 = tpu.matmul %41, %42, %cst_19 {dimension_numbers = #tpu.dot_dimension_numbers<[1], [0], [0], [1], [0, 0, 1, 1], [], []>} : vector<8x8xf32>, vector<8x4xf32>, vector<8x4xf32> -> vector<8x4xf32>
    %44 = vector.extract_strided_slice %29 {offsets = [0, 4], sizes = [8, 4], strides = [1, 1]} : vector<8x32xf32> to vector<8x4xf32>
    %45 = vector.extract_strided_slice %26 {offsets = [0, 4], sizes = [8, 4], strides = [1, 1]} : vector<8x32xf32> to vector<8x4xf32>
    %cst_20 = arith.constant dense<0.000000e+00> : vector<8x8xf32>
    %46 = tpu.matmul %44, %45, %cst_20 {dimension_numbers = #tpu.dot_dimension_numbers<[1], [1], [0], [0], [0, 0, 1, 0], [], []>} : vector<8x4xf32>, vector<8x4xf32>, vector<8x8xf32> -> vector<8x8xf32>
    %cst_21 = arith.constant dense<0xFF800000> : vector<8xf32>
    %47 = vector.multi_reduction <maximumf>, %46, %cst_21 [1] : vector<8x8xf32> to vector<8xf32>
    %48 = vector.shape_cast %47 : vector<8xf32> to vector<8x1xf32>
    %49 = vector.broadcast %48 : vector<8x1xf32> to vector<8x8xf32>
    %50 = arith.subf %46, %49 : vector<8x8xf32>
    %51 = math.exp %50 : vector<8x8xf32>
    %cst_22 = arith.constant dense<0.000000e+00> : vector<8xf32>
    %52 = vector.multi_reduction <add>, %51, %cst_22 [1] : vector<8x8xf32> to vector<8xf32>
    %53 = vector.shape_cast %52 : vector<8xf32> to vector<8x1xf32>
    %54 = vector.broadcast %53 : vector<8x1xf32> to vector<8x8xf32>
    %55 = arith.divf %51, %54 : vector<8x8xf32>
    %56 = vector.extract_strided_slice %27 {offsets = [0, 4], sizes = [8, 4], strides = [1, 1]} : vector<8x32xf32> to vector<8x4xf32>
    %cst_23 = arith.constant dense<0.000000e+00> : vector<8x4xf32>
    %57 = tpu.matmul %55, %56, %cst_23 {dimension_numbers = #tpu.dot_dimension_numbers<[1], [0], [0], [1], [0, 0, 1, 1], [], []>} : vector<8x8xf32>, vector<8x4xf32>, vector<8x4xf32> -> vector<8x4xf32>
    %58 = vector.extract_strided_slice %29 {offsets = [0, 8], sizes = [8, 4], strides = [1, 1]} : vector<8x32xf32> to vector<8x4xf32>
    %59 = vector.extract_strided_slice %26 {offsets = [0, 8], sizes = [8, 4], strides = [1, 1]} : vector<8x32xf32> to vector<8x4xf32>
    %cst_24 = arith.constant dense<0.000000e+00> : vector<8x8xf32>
    %60 = tpu.matmul %58, %59, %cst_24 {dimension_numbers = #tpu.dot_dimension_numbers<[1], [1], [0], [0], [0, 0, 1, 0], [], []>} : vector<8x4xf32>, vector<8x4xf32>, vector<8x8xf32> -> vector<8x8xf32>
    %cst_25 = arith.constant dense<0xFF800000> : vector<8xf32>
    %61 = vector.multi_reduction <maximumf>, %60, %cst_25 [1] : vector<8x8xf32> to vector<8xf32>
    %62 = vector.shape_cast %61 : vector<8xf32> to vector<8x1xf32>
    %63 = vector.broadcast %62 : vector<8x1xf32> to vector<8x8xf32>
    %64 = arith.subf %60, %63 : vector<8x8xf32>
    %65 = math.exp %64 : vector<8x8xf32>
    %cst_26 = arith.constant dense<0.000000e+00> : vector<8xf32>
    %66 = vector.multi_reduction <add>, %65, %cst_26 [1] : vector<8x8xf32> to vector<8xf32>
    %67 = vector.shape_cast %66 : vector<8xf32> to vector<8x1xf32>
    %68 = vector.broadcast %67 : vector<8x1xf32> to vector<8x8xf32>
    %69 = arith.divf %65, %68 : vector<8x8xf32>
    %70 = vector.extract_strided_slice %27 {offsets = [0, 8], sizes = [8, 4], strides = [1, 1]} : vector<8x32xf32> to vector<8x4xf32>
    %cst_27 = arith.constant dense<0.000000e+00> : vector<8x4xf32>
    %71 = tpu.matmul %69, %70, %cst_27 {dimension_numbers = #tpu.dot_dimension_numbers<[1], [0], [0], [1], [0, 0, 1, 1], [], []>} : vector<8x8xf32>, vector<8x4xf32>, vector<8x4xf32> -> vector<8x4xf32>
    %72 = vector.extract_strided_slice %29 {offsets = [0, 12], sizes = [8, 4], strides = [1, 1]} : vector<8x32xf32> to vector<8x4xf32>
    %73 = vector.extract_strided_slice %26 {offsets = [0, 12], sizes = [8, 4], strides = [1, 1]} : vector<8x32xf32> to vector<8x4xf32>
    %cst_28 = arith.constant dense<0.000000e+00> : vector<8x8xf32>
    %74 = tpu.matmul %72, %73, %cst_28 {dimension_numbers = #tpu.dot_dimension_numbers<[1], [1], [0], [0], [0, 0, 1, 0], [], []>} : vector<8x4xf32>, vector<8x4xf32>, vector<8x8xf32> -> vector<8x8xf32>
    %cst_29 = arith.constant dense<0xFF800000> : vector<8xf32>
    %75 = vector.multi_reduction <maximumf>, %74, %cst_29 [1] : vector<8x8xf32> to vector<8xf32>
    %76 = vector.shape_cast %75 : vector<8xf32> to vector<8x1xf32>
    %77 = vector.broadcast %76 : vector<8x1xf32> to vector<8x8xf32>
    %78 = arith.subf %74, %77 : vector<8x8xf32>
    %79 = math.exp %78 : vector<8x8xf32>
    %cst_30 = arith.constant dense<0.000000e+00> : vector<8xf32>
    %80 = vector.multi_reduction <add>, %79, %cst_30 [1] : vector<8x8xf32> to vector<8xf32>
    %81 = vector.shape_cast %80 : vector<8xf32> to vector<8x1xf32>
    %82 = vector.broadcast %81 : vector<8x1xf32> to vector<8x8xf32>
    %83 = arith.divf %79, %82 : vector<8x8xf32>
    %84 = vector.extract_strided_slice %27 {offsets = [0, 12], sizes = [8, 4], strides = [1, 1]} : vector<8x32xf32> to vector<8x4xf32>
    %cst_31 = arith.constant dense<0.000000e+00> : vector<8x4xf32>
    %85 = tpu.matmul %83, %84, %cst_31 {dimension_numbers = #tpu.dot_dimension_numbers<[1], [0], [0], [1], [0, 0, 1, 1], [], []>} : vector<8x8xf32>, vector<8x4xf32>, vector<8x4xf32> -> vector<8x4xf32>
    %86 = vector.extract_strided_slice %29 {offsets = [0, 16], sizes = [8, 4], strides = [1, 1]} : vector<8x32xf32> to vector<8x4xf32>
    %87 = vector.extract_strided_slice %26 {offsets = [0, 16], sizes = [8, 4], strides = [1, 1]} : vector<8x32xf32> to vector<8x4xf32>
    %cst_32 = arith.constant dense<0.000000e+00> : vector<8x8xf32>
    %88 = tpu.matmul %86, %87, %cst_32 {dimension_numbers = #tpu.dot_dimension_numbers<[1], [1], [0], [0], [0, 0, 1, 0], [], []>} : vector<8x4xf32>, vector<8x4xf32>, vector<8x8xf32> -> vector<8x8xf32>
    %cst_33 = arith.constant dense<0xFF800000> : vector<8xf32>
    %89 = vector.multi_reduction <maximumf>, %88, %cst_33 [1] : vector<8x8xf32> to vector<8xf32>
    %90 = vector.shape_cast %89 : vector<8xf32> to vector<8x1xf32>
    %91 = vector.broadcast %90 : vector<8x1xf32> to vector<8x8xf32>
    %92 = arith.subf %88, %91 : vector<8x8xf32>
    %93 = math.exp %92 : vector<8x8xf32>
    %cst_34 = arith.constant dense<0.000000e+00> : vector<8xf32>
    %94 = vector.multi_reduction <add>, %93, %cst_34 [1] : vector<8x8xf32> to vector<8xf32>
    %95 = vector.shape_cast %94 : vector<8xf32> to vector<8x1xf32>
    %96 = vector.broadcast %95 : vector<8x1xf32> to vector<8x8xf32>
    %97 = arith.divf %93, %96 : vector<8x8xf32>
    %98 = vector.extract_strided_slice %27 {offsets = [0, 16], sizes = [8, 4], strides = [1, 1]} : vector<8x32xf32> to vector<8x4xf32>
    %cst_35 = arith.constant dense<0.000000e+00> : vector<8x4xf32>
    %99 = tpu.matmul %97, %98, %cst_35 {dimension_numbers = #tpu.dot_dimension_numbers<[1], [0], [0], [1], [0, 0, 1, 1], [], []>} : vector<8x8xf32>, vector<8x4xf32>, vector<8x4xf32> -> vector<8x4xf32>
    %100 = vector.extract_strided_slice %29 {offsets = [0, 20], sizes = [8, 4], strides = [1, 1]} : vector<8x32xf32> to vector<8x4xf32>
    %101 = vector.extract_strided_slice %26 {offsets = [0, 20], sizes = [8, 4], strides = [1, 1]} : vector<8x32xf32> to vector<8x4xf32>
    %cst_36 = arith.constant dense<0.000000e+00> : vector<8x8xf32>
    %102 = tpu.matmul %100, %101, %cst_36 {dimension_numbers = #tpu.dot_dimension_numbers<[1], [1], [0], [0], [0, 0, 1, 0], [], []>} : vector<8x4xf32>, vector<8x4xf32>, vector<8x8xf32> -> vector<8x8xf32>
    %cst_37 = arith.constant dense<0xFF800000> : vector<8xf32>
    %103 = vector.multi_reduction <maximumf>, %102, %cst_37 [1] : vector<8x8xf32> to vector<8xf32>
    %104 = vector.shape_cast %103 : vector<8xf32> to vector<8x1xf32>
    %105 = vector.broadcast %104 : vector<8x1xf32> to vector<8x8xf32>
    %106 = arith.subf %102, %105 : vector<8x8xf32>
    %107 = math.exp %106 : vector<8x8xf32>
    %cst_38 = arith.constant dense<0.000000e+00> : vector<8xf32>
    %108 = vector.multi_reduction <add>, %107, %cst_38 [1] : vector<8x8xf32> to vector<8xf32>
    %109 = vector.shape_cast %108 : vector<8xf32> to vector<8x1xf32>
    %110 = vector.broadcast %109 : vector<8x1xf32> to vector<8x8xf32>
    %111 = arith.divf %107, %110 : vector<8x8xf32>
    %112 = vector.extract_strided_slice %27 {offsets = [0, 20], sizes = [8, 4], strides = [1, 1]} : vector<8x32xf32> to vector<8x4xf32>
    %cst_39 = arith.constant dense<0.000000e+00> : vector<8x4xf32>
    %113 = tpu.matmul %111, %112, %cst_39 {dimension_numbers = #tpu.dot_dimension_numbers<[1], [0], [0], [1], [0, 0, 1, 1], [], []>} : vector<8x8xf32>, vector<8x4xf32>, vector<8x4xf32> -> vector<8x4xf32>
    %114 = vector.extract_strided_slice %29 {offsets = [0, 24], sizes = [8, 4], strides = [1, 1]} : vector<8x32xf32> to vector<8x4xf32>
    %115 = vector.extract_strided_slice %26 {offsets = [0, 24], sizes = [8, 4], strides = [1, 1]} : vector<8x32xf32> to vector<8x4xf32>
    %cst_40 = arith.constant dense<0.000000e+00> : vector<8x8xf32>
    %116 = tpu.matmul %114, %115, %cst_40 {dimension_numbers = #tpu.dot_dimension_numbers<[1], [1], [0], [0], [0, 0, 1, 0], [], []>} : vector<8x4xf32>, vector<8x4xf32>, vector<8x8xf32> -> vector<8x8xf32>
    %cst_41 = arith.constant dense<0xFF800000> : vector<8xf32>
    %117 = vector.multi_reduction <maximumf>, %116, %cst_41 [1] : vector<8x8xf32> to vector<8xf32>
    %118 = vector.shape_cast %117 : vector<8xf32> to vector<8x1xf32>
    %119 = vector.broadcast %118 : vector<8x1xf32> to vector<8x8xf32>
    %120 = arith.subf %116, %119 : vector<8x8xf32>
    %121 = math.exp %120 : vector<8x8xf32>
    %cst_42 = arith.constant dense<0.000000e+00> : vector<8xf32>
    %122 = vector.multi_reduction <add>, %121, %cst_42 [1] : vector<8x8xf32> to vector<8xf32>
    %123 = vector.shape_cast %122 : vector<8xf32> to vector<8x1xf32>
    %124 = vector.broadcast %123 : vector<8x1xf32> to vector<8x8xf32>
    %125 = arith.divf %121, %124 : vector<8x8xf32>
    %126 = vector.extract_strided_slice %27 {offsets = [0, 24], sizes = [8, 4], strides = [1, 1]} : vector<8x32xf32> to vector<8x4xf32>
    %cst_43 = arith.constant dense<0.000000e+00> : vector<8x4xf32>
    %127 = tpu.matmul %125, %126, %cst_43 {dimension_numbers = #tpu.dot_dimension_numbers<[1], [0], [0], [1], [0, 0, 1, 1], [], []>} : vector<8x8xf32>, vector<8x4xf32>, vector<8x4xf32> -> vector<8x4xf32>
    %128 = vector.extract_strided_slice %29 {offsets = [0, 28], sizes = [8, 4], strides = [1, 1]} : vector<8x32xf32> to vector<8x4xf32>
    %129 = vector.extract_strided_slice %26 {offsets = [0, 28], sizes = [8, 4], strides = [1, 1]} : vector<8x32xf32> to vector<8x4xf32>
    %cst_44 = arith.constant dense<0.000000e+00> : vector<8x8xf32>
    %130 = tpu.matmul %128, %129, %cst_44 {dimension_numbers = #tpu.dot_dimension_numbers<[1], [1], [0], [0], [0, 0, 1, 0], [], []>} : vector<8x4xf32>, vector<8x4xf32>, vector<8x8xf32> -> vector<8x8xf32>
    %cst_45 = arith.constant dense<0xFF800000> : vector<8xf32>
    %131 = vector.multi_reduction <maximumf>, %130, %cst_45 [1] : vector<8x8xf32> to vector<8xf32>
    %132 = vector.shape_cast %131 : vector<8xf32> to vector<8x1xf32>
    %133 = vector.broadcast %132 : vector<8x1xf32> to vector<8x8xf32>
    %134 = arith.subf %130, %133 : vector<8x8xf32>
    %135 = math.exp %134 : vector<8x8xf32>
    %cst_46 = arith.constant dense<0.000000e+00> : vector<8xf32>
    %136 = vector.multi_reduction <add>, %135, %cst_46 [1] : vector<8x8xf32> to vector<8xf32>
    %137 = vector.shape_cast %136 : vector<8xf32> to vector<8x1xf32>
    %138 = vector.broadcast %137 : vector<8x1xf32> to vector<8x8xf32>
    %139 = arith.divf %135, %138 : vector<8x8xf32>
    %140 = vector.extract_strided_slice %27 {offsets = [0, 28], sizes = [8, 4], strides = [1, 1]} : vector<8x32xf32> to vector<8x4xf32>
    %cst_47 = arith.constant dense<0.000000e+00> : vector<8x4xf32>
    %141 = tpu.matmul %139, %140, %cst_47 {dimension_numbers = #tpu.dot_dimension_numbers<[1], [0], [0], [1], [0, 0, 1, 1], [], []>} : vector<8x8xf32>, vector<8x4xf32>, vector<8x4xf32> -> vector<8x4xf32>
    %142 = tpu.concatenate %43, %57, %71, %85, %99, %113, %127, %141 in 1 : vector<8x4xf32>, vector<8x4xf32>, vector<8x4xf32>, vector<8x4xf32>, vector<8x4xf32>, vector<8x4xf32>, vector<8x4xf32>, vector<8x4xf32> -> vector<8x32xf32>
    %cst_48 = arith.constant dense<0.000000e+00> : vector<8x32xf32>
    %143 = tpu.matmul %142, %15, %cst_48 {dimension_numbers = #tpu.dot_dimension_numbers<[1], [0], [0], [1], [0, 0, 1, 1], [], []>} : vector<8x32xf32>, vector<32x32xf32>, vector<8x32xf32> -> vector<8x32xf32>
    %144 = vector.broadcast %5 : vector<1x32xf32> to vector<8x32xf32>
    %145 = arith.addf %143, %144 : vector<8x32xf32>
    %146 = arith.addf %18, %145 : vector<8x32xf32>
    %cst_49 = arith.constant dense<0.000000e+00> : vector<8xf32>
    %147 = vector.multi_reduction <add>, %146, %cst_49 [1] : vector<8x32xf32> to vector<8xf32>
    %148 = vector.shape_cast %147 : vector<8xf32> to vector<8x1xf32>
    %cst_50 = arith.constant 3.200000e+01 : f32
    %149 = vector.broadcast %cst_50 : f32 to vector<8x1xf32>
    %150 = arith.divf %148, %149 : vector<8x1xf32>
    %151 = vector.broadcast %150 : vector<8x1xf32> to vector<8x32xf32>
    %152 = arith.subf %146, %151 : vector<8x32xf32>
    %153 = arith.mulf %152, %152 : vector<8x32xf32>
    %cst_51 = arith.constant dense<0.000000e+00> : vector<8xf32>
    %154 = vector.multi_reduction <add>, %153, %cst_51 [1] : vector<8x32xf32> to vector<8xf32>
    %155 = vector.shape_cast %154 : vector<8xf32> to vector<8x1xf32>
    %cst_52 = arith.constant 3.200000e+01 : f32
    %156 = vector.broadcast %cst_52 : f32 to vector<8x1xf32>
    %157 = arith.divf %155, %156 : vector<8x1xf32>
    %cst_53 = arith.constant 9.99999974E-6 : f32
    %158 = vector.broadcast %cst_53 : f32 to vector<8x1xf32>
    %159 = arith.addf %157, %158 : vector<8x1xf32>
    %160 = math.rsqrt %159 : vector<8x1xf32>
    %161 = vector.broadcast %160 : vector<8x1xf32> to vector<8x32xf32>
    %162 = arith.mulf %152, %161 : vector<8x32xf32>
    %163 = vector.broadcast %9 : vector<1x32xf32> to vector<8x32xf32>
    %164 = arith.mulf %162, %163 : vector<8x32xf32>
    %165 = vector.broadcast %10 : vector<1x32xf32> to vector<8x32xf32>
    %166 = arith.addf %164, %165 : vector<8x32xf32>
    %c0_54 = arith.constant 0 : index
    %c0_55 = arith.constant 0 : index
    %167 = vector.load %arg5[%c0_54, %c0_55] : memref<32x32xf32, #tpu.memory_space<vmem>>, vector<32x32xf32>
    %cst_56 = arith.constant dense<0.000000e+00> : vector<8x32xf32>
    %168 = tpu.matmul %166, %167, %cst_56 {dimension_numbers = #tpu.dot_dimension_numbers<[1], [0], [0], [1], [0, 0, 1, 1], [], []>} : vector<8x32xf32>, vector<32x32xf32>, vector<8x32xf32> -> vector<8x32xf32>
    %169 = vector.broadcast %6 : vector<1x32xf32> to vector<8x32xf32>
    %170 = arith.addf %168, %169 : vector<8x32xf32>
    %c0_57 = arith.constant 0 : index
    %c0_58 = arith.constant 0 : index
    %171 = vector.load %arg6[%c0_57, %c0_58] : memref<32x64xf32, #tpu.memory_space<vmem>>, vector<32x64xf32>
    %cst_59 = arith.constant dense<0.000000e+00> : vector<16x64xf32>
    %172 = tpu.matmul %20, %171, %cst_59 {dimension_numbers = #tpu.dot_dimension_numbers<[1], [0], [0], [1], [0, 0, 1, 1], [], []>} : vector<16x32xf32>, vector<32x64xf32>, vector<16x64xf32> -> vector<16x64xf32>
    %173 = vector.broadcast %3 : vector<1x64xf32> to vector<16x64xf32>
    %174 = arith.addf %172, %173 : vector<16x64xf32>
    %175 = vector.extract_strided_slice %174 {offsets = [0, 0], sizes = [16, 32], strides = [1, 1]} : vector<16x64xf32> to vector<16x32xf32>
    %176 = vector.extract_strided_slice %174 {offsets = [0, 32], sizes = [16, 32], strides = [1, 1]} : vector<16x64xf32> to vector<16x32xf32>
    %cst_60 = arith.constant 5.000000e-01 : f32
    %177 = vector.broadcast %cst_60 : f32 to vector<8x32xf32>
    %178 = arith.mulf %170, %177 : vector<8x32xf32>
    %179 = vector.extract_strided_slice %178 {offsets = [0, 0], sizes = [8, 4], strides = [1, 1]} : vector<8x32xf32> to vector<8x4xf32>
    %180 = vector.extract_strided_slice %175 {offsets = [0, 0], sizes = [16, 4], strides = [1, 1]} : vector<16x32xf32> to vector<16x4xf32>
    %cst_61 = arith.constant dense<0.000000e+00> : vector<8x16xf32>
    %181 = tpu.matmul %179, %180, %cst_61 {dimension_numbers = #tpu.dot_dimension_numbers<[1], [1], [0], [0], [0, 0, 1, 0], [], []>} : vector<8x4xf32>, vector<16x4xf32>, vector<8x16xf32> -> vector<8x16xf32>
    %cst_62 = arith.constant dense<0xFF800000> : vector<8xf32>
    %182 = vector.multi_reduction <maximumf>, %181, %cst_62 [1] : vector<8x16xf32> to vector<8xf32>
    %183 = vector.shape_cast %182 : vector<8xf32> to vector<8x1xf32>
    %184 = vector.broadcast %183 : vector<8x1xf32> to vector<8x16xf32>
    %185 = arith.subf %181, %184 : vector<8x16xf32>
    %186 = math.exp %185 : vector<8x16xf32>
    %cst_63 = arith.constant dense<0.000000e+00> : vector<8xf32>
    %187 = vector.multi_reduction <add>, %186, %cst_63 [1] : vector<8x16xf32> to vector<8xf32>
    %188 = vector.shape_cast %187 : vector<8xf32> to vector<8x1xf32>
    %189 = vector.broadcast %188 : vector<8x1xf32> to vector<8x16xf32>
    %190 = arith.divf %186, %189 : vector<8x16xf32>
    %191 = vector.extract_strided_slice %176 {offsets = [0, 0], sizes = [16, 4], strides = [1, 1]} : vector<16x32xf32> to vector<16x4xf32>
    %cst_64 = arith.constant dense<0.000000e+00> : vector<8x4xf32>
    %192 = tpu.matmul %190, %191, %cst_64 {dimension_numbers = #tpu.dot_dimension_numbers<[1], [0], [0], [1], [0, 0, 1, 1], [], []>} : vector<8x16xf32>, vector<16x4xf32>, vector<8x4xf32> -> vector<8x4xf32>
    %193 = vector.extract_strided_slice %178 {offsets = [0, 4], sizes = [8, 4], strides = [1, 1]} : vector<8x32xf32> to vector<8x4xf32>
    %194 = vector.extract_strided_slice %175 {offsets = [0, 4], sizes = [16, 4], strides = [1, 1]} : vector<16x32xf32> to vector<16x4xf32>
    %cst_65 = arith.constant dense<0.000000e+00> : vector<8x16xf32>
    %195 = tpu.matmul %193, %194, %cst_65 {dimension_numbers = #tpu.dot_dimension_numbers<[1], [1], [0], [0], [0, 0, 1, 0], [], []>} : vector<8x4xf32>, vector<16x4xf32>, vector<8x16xf32> -> vector<8x16xf32>
    %cst_66 = arith.constant dense<0xFF800000> : vector<8xf32>
    %196 = vector.multi_reduction <maximumf>, %195, %cst_66 [1] : vector<8x16xf32> to vector<8xf32>
    %197 = vector.shape_cast %196 : vector<8xf32> to vector<8x1xf32>
    %198 = vector.broadcast %197 : vector<8x1xf32> to vector<8x16xf32>
    %199 = arith.subf %195, %198 : vector<8x16xf32>
    %200 = math.exp %199 : vector<8x16xf32>
    %cst_67 = arith.constant dense<0.000000e+00> : vector<8xf32>
    %201 = vector.multi_reduction <add>, %200, %cst_67 [1] : vector<8x16xf32> to vector<8xf32>
    %202 = vector.shape_cast %201 : vector<8xf32> to vector<8x1xf32>
    %203 = vector.broadcast %202 : vector<8x1xf32> to vector<8x16xf32>
    %204 = arith.divf %200, %203 : vector<8x16xf32>
    %205 = vector.extract_strided_slice %176 {offsets = [0, 4], sizes = [16, 4], strides = [1, 1]} : vector<16x32xf32> to vector<16x4xf32>
    %cst_68 = arith.constant dense<0.000000e+00> : vector<8x4xf32>
    %206 = tpu.matmul %204, %205, %cst_68 {dimension_numbers = #tpu.dot_dimension_numbers<[1], [0], [0], [1], [0, 0, 1, 1], [], []>} : vector<8x16xf32>, vector<16x4xf32>, vector<8x4xf32> -> vector<8x4xf32>
    %207 = vector.extract_strided_slice %178 {offsets = [0, 8], sizes = [8, 4], strides = [1, 1]} : vector<8x32xf32> to vector<8x4xf32>
    %208 = vector.extract_strided_slice %175 {offsets = [0, 8], sizes = [16, 4], strides = [1, 1]} : vector<16x32xf32> to vector<16x4xf32>
    %cst_69 = arith.constant dense<0.000000e+00> : vector<8x16xf32>
    %209 = tpu.matmul %207, %208, %cst_69 {dimension_numbers = #tpu.dot_dimension_numbers<[1], [1], [0], [0], [0, 0, 1, 0], [], []>} : vector<8x4xf32>, vector<16x4xf32>, vector<8x16xf32> -> vector<8x16xf32>
    %cst_70 = arith.constant dense<0xFF800000> : vector<8xf32>
    %210 = vector.multi_reduction <maximumf>, %209, %cst_70 [1] : vector<8x16xf32> to vector<8xf32>
    %211 = vector.shape_cast %210 : vector<8xf32> to vector<8x1xf32>
    %212 = vector.broadcast %211 : vector<8x1xf32> to vector<8x16xf32>
    %213 = arith.subf %209, %212 : vector<8x16xf32>
    %214 = math.exp %213 : vector<8x16xf32>
    %cst_71 = arith.constant dense<0.000000e+00> : vector<8xf32>
    %215 = vector.multi_reduction <add>, %214, %cst_71 [1] : vector<8x16xf32> to vector<8xf32>
    %216 = vector.shape_cast %215 : vector<8xf32> to vector<8x1xf32>
    %217 = vector.broadcast %216 : vector<8x1xf32> to vector<8x16xf32>
    %218 = arith.divf %214, %217 : vector<8x16xf32>
    %219 = vector.extract_strided_slice %176 {offsets = [0, 8], sizes = [16, 4], strides = [1, 1]} : vector<16x32xf32> to vector<16x4xf32>
    %cst_72 = arith.constant dense<0.000000e+00> : vector<8x4xf32>
    %220 = tpu.matmul %218, %219, %cst_72 {dimension_numbers = #tpu.dot_dimension_numbers<[1], [0], [0], [1], [0, 0, 1, 1], [], []>} : vector<8x16xf32>, vector<16x4xf32>, vector<8x4xf32> -> vector<8x4xf32>
    %221 = vector.extract_strided_slice %178 {offsets = [0, 12], sizes = [8, 4], strides = [1, 1]} : vector<8x32xf32> to vector<8x4xf32>
    %222 = vector.extract_strided_slice %175 {offsets = [0, 12], sizes = [16, 4], strides = [1, 1]} : vector<16x32xf32> to vector<16x4xf32>
    %cst_73 = arith.constant dense<0.000000e+00> : vector<8x16xf32>
    %223 = tpu.matmul %221, %222, %cst_73 {dimension_numbers = #tpu.dot_dimension_numbers<[1], [1], [0], [0], [0, 0, 1, 0], [], []>} : vector<8x4xf32>, vector<16x4xf32>, vector<8x16xf32> -> vector<8x16xf32>
    %cst_74 = arith.constant dense<0xFF800000> : vector<8xf32>
    %224 = vector.multi_reduction <maximumf>, %223, %cst_74 [1] : vector<8x16xf32> to vector<8xf32>
    %225 = vector.shape_cast %224 : vector<8xf32> to vector<8x1xf32>
    %226 = vector.broadcast %225 : vector<8x1xf32> to vector<8x16xf32>
    %227 = arith.subf %223, %226 : vector<8x16xf32>
    %228 = math.exp %227 : vector<8x16xf32>
    %cst_75 = arith.constant dense<0.000000e+00> : vector<8xf32>
    %229 = vector.multi_reduction <add>, %228, %cst_75 [1] : vector<8x16xf32> to vector<8xf32>
    %230 = vector.shape_cast %229 : vector<8xf32> to vector<8x1xf32>
    %231 = vector.broadcast %230 : vector<8x1xf32> to vector<8x16xf32>
    %232 = arith.divf %228, %231 : vector<8x16xf32>
    %233 = vector.extract_strided_slice %176 {offsets = [0, 12], sizes = [16, 4], strides = [1, 1]} : vector<16x32xf32> to vector<16x4xf32>
    %cst_76 = arith.constant dense<0.000000e+00> : vector<8x4xf32>
    %234 = tpu.matmul %232, %233, %cst_76 {dimension_numbers = #tpu.dot_dimension_numbers<[1], [0], [0], [1], [0, 0, 1, 1], [], []>} : vector<8x16xf32>, vector<16x4xf32>, vector<8x4xf32> -> vector<8x4xf32>
    %235 = vector.extract_strided_slice %178 {offsets = [0, 16], sizes = [8, 4], strides = [1, 1]} : vector<8x32xf32> to vector<8x4xf32>
    %236 = vector.extract_strided_slice %175 {offsets = [0, 16], sizes = [16, 4], strides = [1, 1]} : vector<16x32xf32> to vector<16x4xf32>
    %cst_77 = arith.constant dense<0.000000e+00> : vector<8x16xf32>
    %237 = tpu.matmul %235, %236, %cst_77 {dimension_numbers = #tpu.dot_dimension_numbers<[1], [1], [0], [0], [0, 0, 1, 0], [], []>} : vector<8x4xf32>, vector<16x4xf32>, vector<8x16xf32> -> vector<8x16xf32>
    %cst_78 = arith.constant dense<0xFF800000> : vector<8xf32>
    %238 = vector.multi_reduction <maximumf>, %237, %cst_78 [1] : vector<8x16xf32> to vector<8xf32>
    %239 = vector.shape_cast %238 : vector<8xf32> to vector<8x1xf32>
    %240 = vector.broadcast %239 : vector<8x1xf32> to vector<8x16xf32>
    %241 = arith.subf %237, %240 : vector<8x16xf32>
    %242 = math.exp %241 : vector<8x16xf32>
    %cst_79 = arith.constant dense<0.000000e+00> : vector<8xf32>
    %243 = vector.multi_reduction <add>, %242, %cst_79 [1] : vector<8x16xf32> to vector<8xf32>
    %244 = vector.shape_cast %243 : vector<8xf32> to vector<8x1xf32>
    %245 = vector.broadcast %244 : vector<8x1xf32> to vector<8x16xf32>
    %246 = arith.divf %242, %245 : vector<8x16xf32>
    %247 = vector.extract_strided_slice %176 {offsets = [0, 16], sizes = [16, 4], strides = [1, 1]} : vector<16x32xf32> to vector<16x4xf32>
    %cst_80 = arith.constant dense<0.000000e+00> : vector<8x4xf32>
    %248 = tpu.matmul %246, %247, %cst_80 {dimension_numbers = #tpu.dot_dimension_numbers<[1], [0], [0], [1], [0, 0, 1, 1], [], []>} : vector<8x16xf32>, vector<16x4xf32>, vector<8x4xf32> -> vector<8x4xf32>
    %249 = vector.extract_strided_slice %178 {offsets = [0, 20], sizes = [8, 4], strides = [1, 1]} : vector<8x32xf32> to vector<8x4xf32>
    %250 = vector.extract_strided_slice %175 {offsets = [0, 20], sizes = [16, 4], strides = [1, 1]} : vector<16x32xf32> to vector<16x4xf32>
    %cst_81 = arith.constant dense<0.000000e+00> : vector<8x16xf32>
    %251 = tpu.matmul %249, %250, %cst_81 {dimension_numbers = #tpu.dot_dimension_numbers<[1], [1], [0], [0], [0, 0, 1, 0], [], []>} : vector<8x4xf32>, vector<16x4xf32>, vector<8x16xf32> -> vector<8x16xf32>
    %cst_82 = arith.constant dense<0xFF800000> : vector<8xf32>
    %252 = vector.multi_reduction <maximumf>, %251, %cst_82 [1] : vector<8x16xf32> to vector<8xf32>
    %253 = vector.shape_cast %252 : vector<8xf32> to vector<8x1xf32>
    %254 = vector.broadcast %253 : vector<8x1xf32> to vector<8x16xf32>
    %255 = arith.subf %251, %254 : vector<8x16xf32>
    %256 = math.exp %255 : vector<8x16xf32>
    %cst_83 = arith.constant dense<0.000000e+00> : vector<8xf32>
    %257 = vector.multi_reduction <add>, %256, %cst_83 [1] : vector<8x16xf32> to vector<8xf32>
    %258 = vector.shape_cast %257 : vector<8xf32> to vector<8x1xf32>
    %259 = vector.broadcast %258 : vector<8x1xf32> to vector<8x16xf32>
    %260 = arith.divf %256, %259 : vector<8x16xf32>
    %261 = vector.extract_strided_slice %176 {offsets = [0, 20], sizes = [16, 4], strides = [1, 1]} : vector<16x32xf32> to vector<16x4xf32>
    %cst_84 = arith.constant dense<0.000000e+00> : vector<8x4xf32>
    %262 = tpu.matmul %260, %261, %cst_84 {dimension_numbers = #tpu.dot_dimension_numbers<[1], [0], [0], [1], [0, 0, 1, 1], [], []>} : vector<8x16xf32>, vector<16x4xf32>, vector<8x4xf32> -> vector<8x4xf32>
    %263 = vector.extract_strided_slice %178 {offsets = [0, 24], sizes = [8, 4], strides = [1, 1]} : vector<8x32xf32> to vector<8x4xf32>
    %264 = vector.extract_strided_slice %175 {offsets = [0, 24], sizes = [16, 4], strides = [1, 1]} : vector<16x32xf32> to vector<16x4xf32>
    %cst_85 = arith.constant dense<0.000000e+00> : vector<8x16xf32>
    %265 = tpu.matmul %263, %264, %cst_85 {dimension_numbers = #tpu.dot_dimension_numbers<[1], [1], [0], [0], [0, 0, 1, 0], [], []>} : vector<8x4xf32>, vector<16x4xf32>, vector<8x16xf32> -> vector<8x16xf32>
    %cst_86 = arith.constant dense<0xFF800000> : vector<8xf32>
    %266 = vector.multi_reduction <maximumf>, %265, %cst_86 [1] : vector<8x16xf32> to vector<8xf32>
    %267 = vector.shape_cast %266 : vector<8xf32> to vector<8x1xf32>
    %268 = vector.broadcast %267 : vector<8x1xf32> to vector<8x16xf32>
    %269 = arith.subf %265, %268 : vector<8x16xf32>
    %270 = math.exp %269 : vector<8x16xf32>
    %cst_87 = arith.constant dense<0.000000e+00> : vector<8xf32>
    %271 = vector.multi_reduction <add>, %270, %cst_87 [1] : vector<8x16xf32> to vector<8xf32>
    %272 = vector.shape_cast %271 : vector<8xf32> to vector<8x1xf32>
    %273 = vector.broadcast %272 : vector<8x1xf32> to vector<8x16xf32>
    %274 = arith.divf %270, %273 : vector<8x16xf32>
    %275 = vector.extract_strided_slice %176 {offsets = [0, 24], sizes = [16, 4], strides = [1, 1]} : vector<16x32xf32> to vector<16x4xf32>
    %cst_88 = arith.constant dense<0.000000e+00> : vector<8x4xf32>
    %276 = tpu.matmul %274, %275, %cst_88 {dimension_numbers = #tpu.dot_dimension_numbers<[1], [0], [0], [1], [0, 0, 1, 1], [], []>} : vector<8x16xf32>, vector<16x4xf32>, vector<8x4xf32> -> vector<8x4xf32>
    %277 = vector.extract_strided_slice %178 {offsets = [0, 28], sizes = [8, 4], strides = [1, 1]} : vector<8x32xf32> to vector<8x4xf32>
    %278 = vector.extract_strided_slice %175 {offsets = [0, 28], sizes = [16, 4], strides = [1, 1]} : vector<16x32xf32> to vector<16x4xf32>
    %cst_89 = arith.constant dense<0.000000e+00> : vector<8x16xf32>
    %279 = tpu.matmul %277, %278, %cst_89 {dimension_numbers = #tpu.dot_dimension_numbers<[1], [1], [0], [0], [0, 0, 1, 0], [], []>} : vector<8x4xf32>, vector<16x4xf32>, vector<8x16xf32> -> vector<8x16xf32>
    %cst_90 = arith.constant dense<0xFF800000> : vector<8xf32>
    %280 = vector.multi_reduction <maximumf>, %279, %cst_90 [1] : vector<8x16xf32> to vector<8xf32>
    %281 = vector.shape_cast %280 : vector<8xf32> to vector<8x1xf32>
    %282 = vector.broadcast %281 : vector<8x1xf32> to vector<8x16xf32>
    %283 = arith.subf %279, %282 : vector<8x16xf32>
    %284 = math.exp %283 : vector<8x16xf32>
    %cst_91 = arith.constant dense<0.000000e+00> : vector<8xf32>
    %285 = vector.multi_reduction <add>, %284, %cst_91 [1] : vector<8x16xf32> to vector<8xf32>
    %286 = vector.shape_cast %285 : vector<8xf32> to vector<8x1xf32>
    %287 = vector.broadcast %286 : vector<8x1xf32> to vector<8x16xf32>
    %288 = arith.divf %284, %287 : vector<8x16xf32>
    %289 = vector.extract_strided_slice %176 {offsets = [0, 28], sizes = [16, 4], strides = [1, 1]} : vector<16x32xf32> to vector<16x4xf32>
    %cst_92 = arith.constant dense<0.000000e+00> : vector<8x4xf32>
    %290 = tpu.matmul %288, %289, %cst_92 {dimension_numbers = #tpu.dot_dimension_numbers<[1], [0], [0], [1], [0, 0, 1, 1], [], []>} : vector<8x16xf32>, vector<16x4xf32>, vector<8x4xf32> -> vector<8x4xf32>
    %291 = tpu.concatenate %192, %206, %220, %234, %248, %262, %276, %290 in 1 : vector<8x4xf32>, vector<8x4xf32>, vector<8x4xf32>, vector<8x4xf32>, vector<8x4xf32>, vector<8x4xf32>, vector<8x4xf32>, vector<8x4xf32> -> vector<8x32xf32>
    %cst_93 = arith.constant dense<0.000000e+00> : vector<8x32xf32>
    %292 = tpu.matmul %291, %16, %cst_93 {dimension_numbers = #tpu.dot_dimension_numbers<[1], [0], [0], [1], [0, 0, 1, 1], [], []>} : vector<8x32xf32>, vector<32x32xf32>, vector<8x32xf32> -> vector<8x32xf32>
    %293 = vector.broadcast %7 : vector<1x32xf32> to vector<8x32xf32>
    %294 = arith.addf %292, %293 : vector<8x32xf32>
    %295 = arith.addf %166, %294 : vector<8x32xf32>
    %cst_94 = arith.constant dense<0.000000e+00> : vector<8xf32>
    %296 = vector.multi_reduction <add>, %295, %cst_94 [1] : vector<8x32xf32> to vector<8xf32>
    %297 = vector.shape_cast %296 : vector<8xf32> to vector<8x1xf32>
    %cst_95 = arith.constant 3.200000e+01 : f32
    %298 = vector.broadcast %cst_95 : f32 to vector<8x1xf32>
    %299 = arith.divf %297, %298 : vector<8x1xf32>
    %300 = vector.broadcast %299 : vector<8x1xf32> to vector<8x32xf32>
    %301 = arith.subf %295, %300 : vector<8x32xf32>
    %302 = arith.mulf %301, %301 : vector<8x32xf32>
    %cst_96 = arith.constant dense<0.000000e+00> : vector<8xf32>
    %303 = vector.multi_reduction <add>, %302, %cst_96 [1] : vector<8x32xf32> to vector<8xf32>
    %304 = vector.shape_cast %303 : vector<8xf32> to vector<8x1xf32>
    %cst_97 = arith.constant 3.200000e+01 : f32
    %305 = vector.broadcast %cst_97 : f32 to vector<8x1xf32>
    %306 = arith.divf %304, %305 : vector<8x1xf32>
    %cst_98 = arith.constant 9.99999974E-6 : f32
    %307 = vector.broadcast %cst_98 : f32 to vector<8x1xf32>
    %308 = arith.addf %306, %307 : vector<8x1xf32>
    %309 = math.rsqrt %308 : vector<8x1xf32>
    %310 = vector.broadcast %309 : vector<8x1xf32> to vector<8x32xf32>
    %311 = arith.mulf %301, %310 : vector<8x32xf32>
    %312 = vector.broadcast %11 : vector<1x32xf32> to vector<8x32xf32>
    %313 = arith.mulf %311, %312 : vector<8x32xf32>
    %314 = vector.broadcast %12 : vector<1x32xf32> to vector<8x32xf32>
    %315 = arith.addf %313, %314 : vector<8x32xf32>
    %c0_99 = arith.constant 0 : index
    %c0_100 = arith.constant 0 : index
    %316 = vector.load %arg8[%c0_99, %c0_100] : memref<32x128xf32, #tpu.memory_space<vmem>>, vector<32x128xf32>
    %cst_101 = arith.constant dense<0.000000e+00> : vector<8x128xf32>
    %317 = tpu.matmul %315, %316, %cst_101 {dimension_numbers = #tpu.dot_dimension_numbers<[1], [0], [0], [1], [0, 0, 1, 1], [], []>} : vector<8x32xf32>, vector<32x128xf32>, vector<8x128xf32> -> vector<8x128xf32>
    %318 = vector.broadcast %4 : vector<1x128xf32> to vector<8x128xf32>
    %319 = arith.addf %317, %318 : vector<8x128xf32>
    %cst_102 = arith.constant 0.000000e+00 : f32
    %320 = vector.broadcast %cst_102 : f32 to vector<8x128xf32>
    %321 = arith.maximumf %319, %320 : vector<8x128xf32>
    %c0_103 = arith.constant 0 : index
    %c0_104 = arith.constant 0 : index
    %322 = vector.load %arg9[%c0_103, %c0_104] : memref<128x32xf32, #tpu.memory_space<vmem>>, vector<128x32xf32>
    %cst_105 = arith.constant dense<0.000000e+00> : vector<8x32xf32>
    %323 = tpu.matmul %321, %322, %cst_105 {dimension_numbers = #tpu.dot_dimension_numbers<[1], [0], [0], [1], [0, 0, 1, 1], [], []>} : vector<8x128xf32>, vector<128x32xf32>, vector<8x32xf32> -> vector<8x32xf32>
    %324 = vector.broadcast %8 : vector<1x32xf32> to vector<8x32xf32>
    %325 = arith.addf %323, %324 : vector<8x32xf32>
    %326 = arith.addf %315, %325 : vector<8x32xf32>
    %cst_106 = arith.constant dense<0.000000e+00> : vector<8xf32>
    %327 = vector.multi_reduction <add>, %326, %cst_106 [1] : vector<8x32xf32> to vector<8xf32>
    %328 = vector.shape_cast %327 : vector<8xf32> to vector<8x1xf32>
    %cst_107 = arith.constant 3.200000e+01 : f32
    %329 = vector.broadcast %cst_107 : f32 to vector<8x1xf32>
    %330 = arith.divf %328, %329 : vector<8x1xf32>
    %331 = vector.broadcast %330 : vector<8x1xf32> to vector<8x32xf32>
    %332 = arith.subf %326, %331 : vector<8x32xf32>
    %333 = arith.mulf %332, %332 : vector<8x32xf32>
    %cst_108 = arith.constant dense<0.000000e+00> : vector<8xf32>
    %334 = vector.multi_reduction <add>, %333, %cst_108 [1] : vector<8x32xf32> to vector<8xf32>
    %335 = vector.shape_cast %334 : vector<8xf32> to vector<8x1xf32>
    %cst_109 = arith.constant 3.200000e+01 : f32
    %336 = vector.broadcast %cst_109 : f32 to vector<8x1xf32>
    %337 = arith.divf %335, %336 : vector<8x1xf32>
    %cst_110 = arith.constant 9.99999974E-6 : f32
    %338 = vector.broadcast %cst_110 : f32 to vector<8x1xf32>
    %339 = arith.addf %337, %338 : vector<8x1xf32>
    %340 = math.rsqrt %339 : vector<8x1xf32>
    %341 = vector.broadcast %340 : vector<8x1xf32> to vector<8x32xf32>
    %342 = arith.mulf %332, %341 : vector<8x32xf32>
    %343 = vector.broadcast %13 : vector<1x32xf32> to vector<8x32xf32>
    %344 = arith.mulf %342, %343 : vector<8x32xf32>
    %345 = vector.broadcast %14 : vector<1x32xf32> to vector<8x32xf32>
    %346 = arith.addf %344, %345 : vector<8x32xf32>
    %c0_111 = arith.constant 0 : index
    %c0_112 = arith.constant 0 : index
    %c0_113 = arith.constant 0 : index
    %347 = vector.load %arg12[%c0_111, %c0_112, %c0_113] : memref<2x8x32xf32, #tpu.memory_space<vmem>>, vector<1x8x32xf32>
    %348 = vector.shape_cast %347 : vector<1x8x32xf32> to vector<8x32xf32>
    %349 = vector.shape_cast %346 : vector<8x32xf32> to vector<1x8x32xf32>
    tpu.vector_store %arg12[%c0_111, %c0_112, %c0_113], %349 {strides = array<i32>} : memref<2x8x32xf32, #tpu.memory_space<vmem>>, vector<1x8x32xf32>,
    %c1 = arith.constant 1 : index
    %c0_114 = arith.constant 0 : index
    %c0_115 = arith.constant 0 : index
    %350 = vector.load %arg1[%c1, %c0_114, %c0_115] : memref<2x8x32xf32, #tpu.memory_space<vmem>>, vector<1x8x32xf32>
    %351 = vector.shape_cast %350 : vector<1x8x32xf32> to vector<8x32xf32>
    %c1_116 = arith.constant 1 : index
    %c0_117 = arith.constant 0 : index
    %c0_118 = arith.constant 0 : index
    %352 = vector.load %arg2[%c1_116, %c0_117, %c0_118] : memref<2x16x32xf32, #tpu.memory_space<vmem>>, vector<1x16x32xf32>
    %353 = vector.shape_cast %352 : vector<1x16x32xf32> to vector<16x32xf32>
    %c0_119 = arith.constant 0 : index
    %c0_120 = arith.constant 0 : index
    %354 = vector.load %arg3[%c0_119, %c0_120] : memref<32x96xf32, #tpu.memory_space<vmem>>, vector<32x96xf32>
    %cst_121 = arith.constant dense<0.000000e+00> : vector<8x96xf32>
    %355 = tpu.matmul %351, %354, %cst_121 {dimension_numbers = #tpu.dot_dimension_numbers<[1], [0], [0], [1], [0, 0, 1, 1], [], []>} : vector<8x32xf32>, vector<32x96xf32>, vector<8x96xf32> -> vector<8x96xf32>
    %356 = vector.broadcast %2 : vector<1x96xf32> to vector<8x96xf32>
    %357 = arith.addf %355, %356 : vector<8x96xf32>
    %358 = vector.extract_strided_slice %357 {offsets = [0, 0], sizes = [8, 32], strides = [1, 1]} : vector<8x96xf32> to vector<8x32xf32>
    %359 = vector.extract_strided_slice %357 {offsets = [0, 32], sizes = [8, 32], strides = [1, 1]} : vector<8x96xf32> to vector<8x32xf32>
    %360 = vector.extract_strided_slice %357 {offsets = [0, 64], sizes = [8, 32], strides = [1, 1]} : vector<8x96xf32> to vector<8x32xf32>
    %cst_122 = arith.constant 5.000000e-01 : f32
    %361 = vector.broadcast %cst_122 : f32 to vector<8x32xf32>
    %362 = arith.mulf %358, %361 : vector<8x32xf32>
    %363 = vector.extract_strided_slice %362 {offsets = [0, 0], sizes = [8, 4], strides = [1, 1]} : vector<8x32xf32> to vector<8x4xf32>
    %364 = vector.extract_strided_slice %359 {offsets = [0, 0], sizes = [8, 4], strides = [1, 1]} : vector<8x32xf32> to vector<8x4xf32>
    %cst_123 = arith.constant dense<0.000000e+00> : vector<8x8xf32>
    %365 = tpu.matmul %363, %364, %cst_123 {dimension_numbers = #tpu.dot_dimension_numbers<[1], [1], [0], [0], [0, 0, 1, 0], [], []>} : vector<8x4xf32>, vector<8x4xf32>, vector<8x8xf32> -> vector<8x8xf32>
    %cst_124 = arith.constant dense<0xFF800000> : vector<8xf32>
    %366 = vector.multi_reduction <maximumf>, %365, %cst_124 [1] : vector<8x8xf32> to vector<8xf32>
    %367 = vector.shape_cast %366 : vector<8xf32> to vector<8x1xf32>
    %368 = vector.broadcast %367 : vector<8x1xf32> to vector<8x8xf32>
    %369 = arith.subf %365, %368 : vector<8x8xf32>
    %370 = math.exp %369 : vector<8x8xf32>
    %cst_125 = arith.constant dense<0.000000e+00> : vector<8xf32>
    %371 = vector.multi_reduction <add>, %370, %cst_125 [1] : vector<8x8xf32> to vector<8xf32>
    %372 = vector.shape_cast %371 : vector<8xf32> to vector<8x1xf32>
    %373 = vector.broadcast %372 : vector<8x1xf32> to vector<8x8xf32>
    %374 = arith.divf %370, %373 : vector<8x8xf32>
    %375 = vector.extract_strided_slice %360 {offsets = [0, 0], sizes = [8, 4], strides = [1, 1]} : vector<8x32xf32> to vector<8x4xf32>
    %cst_126 = arith.constant dense<0.000000e+00> : vector<8x4xf32>
    %376 = tpu.matmul %374, %375, %cst_126 {dimension_numbers = #tpu.dot_dimension_numbers<[1], [0], [0], [1], [0, 0, 1, 1], [], []>} : vector<8x8xf32>, vector<8x4xf32>, vector<8x4xf32> -> vector<8x4xf32>
    %377 = vector.extract_strided_slice %362 {offsets = [0, 4], sizes = [8, 4], strides = [1, 1]} : vector<8x32xf32> to vector<8x4xf32>
    %378 = vector.extract_strided_slice %359 {offsets = [0, 4], sizes = [8, 4], strides = [1, 1]} : vector<8x32xf32> to vector<8x4xf32>
    %cst_127 = arith.constant dense<0.000000e+00> : vector<8x8xf32>
    %379 = tpu.matmul %377, %378, %cst_127 {dimension_numbers = #tpu.dot_dimension_numbers<[1], [1], [0], [0], [0, 0, 1, 0], [], []>} : vector<8x4xf32>, vector<8x4xf32>, vector<8x8xf32> -> vector<8x8xf32>
    %cst_128 = arith.constant dense<0xFF800000> : vector<8xf32>
    %380 = vector.multi_reduction <maximumf>, %379, %cst_128 [1] : vector<8x8xf32> to vector<8xf32>
    %381 = vector.shape_cast %380 : vector<8xf32> to vector<8x1xf32>
    %382 = vector.broadcast %381 : vector<8x1xf32> to vector<8x8xf32>
    %383 = arith.subf %379, %382 : vector<8x8xf32>
    %384 = math.exp %383 : vector<8x8xf32>
    %cst_129 = arith.constant dense<0.000000e+00> : vector<8xf32>
    %385 = vector.multi_reduction <add>, %384, %cst_129 [1] : vector<8x8xf32> to vector<8xf32>
    %386 = vector.shape_cast %385 : vector<8xf32> to vector<8x1xf32>
    %387 = vector.broadcast %386 : vector<8x1xf32> to vector<8x8xf32>
    %388 = arith.divf %384, %387 : vector<8x8xf32>
    %389 = vector.extract_strided_slice %360 {offsets = [0, 4], sizes = [8, 4], strides = [1, 1]} : vector<8x32xf32> to vector<8x4xf32>
    %cst_130 = arith.constant dense<0.000000e+00> : vector<8x4xf32>
    %390 = tpu.matmul %388, %389, %cst_130 {dimension_numbers = #tpu.dot_dimension_numbers<[1], [0], [0], [1], [0, 0, 1, 1], [], []>} : vector<8x8xf32>, vector<8x4xf32>, vector<8x4xf32> -> vector<8x4xf32>
    %391 = vector.extract_strided_slice %362 {offsets = [0, 8], sizes = [8, 4], strides = [1, 1]} : vector<8x32xf32> to vector<8x4xf32>
    %392 = vector.extract_strided_slice %359 {offsets = [0, 8], sizes = [8, 4], strides = [1, 1]} : vector<8x32xf32> to vector<8x4xf32>
    %cst_131 = arith.constant dense<0.000000e+00> : vector<8x8xf32>
    %393 = tpu.matmul %391, %392, %cst_131 {dimension_numbers = #tpu.dot_dimension_numbers<[1], [1], [0], [0], [0, 0, 1, 0], [], []>} : vector<8x4xf32>, vector<8x4xf32>, vector<8x8xf32> -> vector<8x8xf32>
    %cst_132 = arith.constant dense<0xFF800000> : vector<8xf32>
    %394 = vector.multi_reduction <maximumf>, %393, %cst_132 [1] : vector<8x8xf32> to vector<8xf32>
    %395 = vector.shape_cast %394 : vector<8xf32> to vector<8x1xf32>
    %396 = vector.broadcast %395 : vector<8x1xf32> to vector<8x8xf32>
    %397 = arith.subf %393, %396 : vector<8x8xf32>
    %398 = math.exp %397 : vector<8x8xf32>
    %cst_133 = arith.constant dense<0.000000e+00> : vector<8xf32>
    %399 = vector.multi_reduction <add>, %398, %cst_133 [1] : vector<8x8xf32> to vector<8xf32>
    %400 = vector.shape_cast %399 : vector<8xf32> to vector<8x1xf32>
    %401 = vector.broadcast %400 : vector<8x1xf32> to vector<8x8xf32>
    %402 = arith.divf %398, %401 : vector<8x8xf32>
    %403 = vector.extract_strided_slice %360 {offsets = [0, 8], sizes = [8, 4], strides = [1, 1]} : vector<8x32xf32> to vector<8x4xf32>
    %cst_134 = arith.constant dense<0.000000e+00> : vector<8x4xf32>
    %404 = tpu.matmul %402, %403, %cst_134 {dimension_numbers = #tpu.dot_dimension_numbers<[1], [0], [0], [1], [0, 0, 1, 1], [], []>} : vector<8x8xf32>, vector<8x4xf32>, vector<8x4xf32> -> vector<8x4xf32>
    %405 = vector.extract_strided_slice %362 {offsets = [0, 12], sizes = [8, 4], strides = [1, 1]} : vector<8x32xf32> to vector<8x4xf32>
    %406 = vector.extract_strided_slice %359 {offsets = [0, 12], sizes = [8, 4], strides = [1, 1]} : vector<8x32xf32> to vector<8x4xf32>
    %cst_135 = arith.constant dense<0.000000e+00> : vector<8x8xf32>
    %407 = tpu.matmul %405, %406, %cst_135 {dimension_numbers = #tpu.dot_dimension_numbers<[1], [1], [0], [0], [0, 0, 1, 0], [], []>} : vector<8x4xf32>, vector<8x4xf32>, vector<8x8xf32> -> vector<8x8xf32>
    %cst_136 = arith.constant dense<0xFF800000> : vector<8xf32>
    %408 = vector.multi_reduction <maximumf>, %407, %cst_136 [1] : vector<8x8xf32> to vector<8xf32>
    %409 = vector.shape_cast %408 : vector<8xf32> to vector<8x1xf32>
    %410 = vector.broadcast %409 : vector<8x1xf32> to vector<8x8xf32>
    %411 = arith.subf %407, %410 : vector<8x8xf32>
    %412 = math.exp %411 : vector<8x8xf32>
    %cst_137 = arith.constant dense<0.000000e+00> : vector<8xf32>
    %413 = vector.multi_reduction <add>, %412, %cst_137 [1] : vector<8x8xf32> to vector<8xf32>
    %414 = vector.shape_cast %413 : vector<8xf32> to vector<8x1xf32>
    %415 = vector.broadcast %414 : vector<8x1xf32> to vector<8x8xf32>
    %416 = arith.divf %412, %415 : vector<8x8xf32>
    %417 = vector.extract_strided_slice %360 {offsets = [0, 12], sizes = [8, 4], strides = [1, 1]} : vector<8x32xf32> to vector<8x4xf32>
    %cst_138 = arith.constant dense<0.000000e+00> : vector<8x4xf32>
    %418 = tpu.matmul %416, %417, %cst_138 {dimension_numbers = #tpu.dot_dimension_numbers<[1], [0], [0], [1], [0, 0, 1, 1], [], []>} : vector<8x8xf32>, vector<8x4xf32>, vector<8x4xf32> -> vector<8x4xf32>
    %419 = vector.extract_strided_slice %362 {offsets = [0, 16], sizes = [8, 4], strides = [1, 1]} : vector<8x32xf32> to vector<8x4xf32>
    %420 = vector.extract_strided_slice %359 {offsets = [0, 16], sizes = [8, 4], strides = [1, 1]} : vector<8x32xf32> to vector<8x4xf32>
    %cst_139 = arith.constant dense<0.000000e+00> : vector<8x8xf32>
    %421 = tpu.matmul %419, %420, %cst_139 {dimension_numbers = #tpu.dot_dimension_numbers<[1], [1], [0], [0], [0, 0, 1, 0], [], []>} : vector<8x4xf32>, vector<8x4xf32>, vector<8x8xf32> -> vector<8x8xf32>
    %cst_140 = arith.constant dense<0xFF800000> : vector<8xf32>
    %422 = vector.multi_reduction <maximumf>, %421, %cst_140 [1] : vector<8x8xf32> to vector<8xf32>
    %423 = vector.shape_cast %422 : vector<8xf32> to vector<8x1xf32>
    %424 = vector.broadcast %423 : vector<8x1xf32> to vector<8x8xf32>
    %425 = arith.subf %421, %424 : vector<8x8xf32>
    %426 = math.exp %425 : vector<8x8xf32>
    %cst_141 = arith.constant dense<0.000000e+00> : vector<8xf32>
    %427 = vector.multi_reduction <add>, %426, %cst_141 [1] : vector<8x8xf32> to vector<8xf32>
    %428 = vector.shape_cast %427 : vector<8xf32> to vector<8x1xf32>
    %429 = vector.broadcast %428 : vector<8x1xf32> to vector<8x8xf32>
    %430 = arith.divf %426, %429 : vector<8x8xf32>
    %431 = vector.extract_strided_slice %360 {offsets = [0, 16], sizes = [8, 4], strides = [1, 1]} : vector<8x32xf32> to vector<8x4xf32>
    %cst_142 = arith.constant dense<0.000000e+00> : vector<8x4xf32>
    %432 = tpu.matmul %430, %431, %cst_142 {dimension_numbers = #tpu.dot_dimension_numbers<[1], [0], [0], [1], [0, 0, 1, 1], [], []>} : vector<8x8xf32>, vector<8x4xf32>, vector<8x4xf32> -> vector<8x4xf32>
    %433 = vector.extract_strided_slice %362 {offsets = [0, 20], sizes = [8, 4], strides = [1, 1]} : vector<8x32xf32> to vector<8x4xf32>
    %434 = vector.extract_strided_slice %359 {offsets = [0, 20], sizes = [8, 4], strides = [1, 1]} : vector<8x32xf32> to vector<8x4xf32>
    %cst_143 = arith.constant dense<0.000000e+00> : vector<8x8xf32>
    %435 = tpu.matmul %433, %434, %cst_143 {dimension_numbers = #tpu.dot_dimension_numbers<[1], [1], [0], [0], [0, 0, 1, 0], [], []>} : vector<8x4xf32>, vector<8x4xf32>, vector<8x8xf32> -> vector<8x8xf32>
    %cst_144 = arith.constant dense<0xFF800000> : vector<8xf32>
    %436 = vector.multi_reduction <maximumf>, %435, %cst_144 [1] : vector<8x8xf32> to vector<8xf32>
    %437 = vector.shape_cast %436 : vector<8xf32> to vector<8x1xf32>
    %438 = vector.broadcast %437 : vector<8x1xf32> to vector<8x8xf32>
    %439 = arith.subf %435, %438 : vector<8x8xf32>
    %440 = math.exp %439 : vector<8x8xf32>
    %cst_145 = arith.constant dense<0.000000e+00> : vector<8xf32>
    %441 = vector.multi_reduction <add>, %440, %cst_145 [1] : vector<8x8xf32> to vector<8xf32>
    %442 = vector.shape_cast %441 : vector<8xf32> to vector<8x1xf32>
    %443 = vector.broadcast %442 : vector<8x1xf32> to vector<8x8xf32>
    %444 = arith.divf %440, %443 : vector<8x8xf32>
    %445 = vector.extract_strided_slice %360 {offsets = [0, 20], sizes = [8, 4], strides = [1, 1]} : vector<8x32xf32> to vector<8x4xf32>
    %cst_146 = arith.constant dense<0.000000e+00> : vector<8x4xf32>
    %446 = tpu.matmul %444, %445, %cst_146 {dimension_numbers = #tpu.dot_dimension_numbers<[1], [0], [0], [1], [0, 0, 1, 1], [], []>} : vector<8x8xf32>, vector<8x4xf32>, vector<8x4xf32> -> vector<8x4xf32>
    %447 = vector.extract_strided_slice %362 {offsets = [0, 24], sizes = [8, 4], strides = [1, 1]} : vector<8x32xf32> to vector<8x4xf32>
    %448 = vector.extract_strided_slice %359 {offsets = [0, 24], sizes = [8, 4], strides = [1, 1]} : vector<8x32xf32> to vector<8x4xf32>
    %cst_147 = arith.constant dense<0.000000e+00> : vector<8x8xf32>
    %449 = tpu.matmul %447, %448, %cst_147 {dimension_numbers = #tpu.dot_dimension_numbers<[1], [1], [0], [0], [0, 0, 1, 0], [], []>} : vector<8x4xf32>, vector<8x4xf32>, vector<8x8xf32> -> vector<8x8xf32>
    %cst_148 = arith.constant dense<0xFF800000> : vector<8xf32>
    %450 = vector.multi_reduction <maximumf>, %449, %cst_148 [1] : vector<8x8xf32> to vector<8xf32>
    %451 = vector.shape_cast %450 : vector<8xf32> to vector<8x1xf32>
    %452 = vector.broadcast %451 : vector<8x1xf32> to vector<8x8xf32>
    %453 = arith.subf %449, %452 : vector<8x8xf32>
    %454 = math.exp %453 : vector<8x8xf32>
    %cst_149 = arith.constant dense<0.000000e+00> : vector<8xf32>
    %455 = vector.multi_reduction <add>, %454, %cst_149 [1] : vector<8x8xf32> to vector<8xf32>
    %456 = vector.shape_cast %455 : vector<8xf32> to vector<8x1xf32>
    %457 = vector.broadcast %456 : vector<8x1xf32> to vector<8x8xf32>
    %458 = arith.divf %454, %457 : vector<8x8xf32>
    %459 = vector.extract_strided_slice %360 {offsets = [0, 24], sizes = [8, 4], strides = [1, 1]} : vector<8x32xf32> to vector<8x4xf32>
    %cst_150 = arith.constant dense<0.000000e+00> : vector<8x4xf32>
    %460 = tpu.matmul %458, %459, %cst_150 {dimension_numbers = #tpu.dot_dimension_numbers<[1], [0], [0], [1], [0, 0, 1, 1], [], []>} : vector<8x8xf32>, vector<8x4xf32>, vector<8x4xf32> -> vector<8x4xf32>
    %461 = vector.extract_strided_slice %362 {offsets = [0, 28], sizes = [8, 4], strides = [1, 1]} : vector<8x32xf32> to vector<8x4xf32>
    %462 = vector.extract_strided_slice %359 {offsets = [0, 28], sizes = [8, 4], strides = [1, 1]} : vector<8x32xf32> to vector<8x4xf32>
    %cst_151 = arith.constant dense<0.000000e+00> : vector<8x8xf32>
    %463 = tpu.matmul %461, %462, %cst_151 {dimension_numbers = #tpu.dot_dimension_numbers<[1], [1], [0], [0], [0, 0, 1, 0], [], []>} : vector<8x4xf32>, vector<8x4xf32>, vector<8x8xf32> -> vector<8x8xf32>
    %cst_152 = arith.constant dense<0xFF800000> : vector<8xf32>
    %464 = vector.multi_reduction <maximumf>, %463, %cst_152 [1] : vector<8x8xf32> to vector<8xf32>
    %465 = vector.shape_cast %464 : vector<8xf32> to vector<8x1xf32>
    %466 = vector.broadcast %465 : vector<8x1xf32> to vector<8x8xf32>
    %467 = arith.subf %463, %466 : vector<8x8xf32>
    %468 = math.exp %467 : vector<8x8xf32>
    %cst_153 = arith.constant dense<0.000000e+00> : vector<8xf32>
    %469 = vector.multi_reduction <add>, %468, %cst_153 [1] : vector<8x8xf32> to vector<8xf32>
    %470 = vector.shape_cast %469 : vector<8xf32> to vector<8x1xf32>
    %471 = vector.broadcast %470 : vector<8x1xf32> to vector<8x8xf32>
    %472 = arith.divf %468, %471 : vector<8x8xf32>
    %473 = vector.extract_strided_slice %360 {offsets = [0, 28], sizes = [8, 4], strides = [1, 1]} : vector<8x32xf32> to vector<8x4xf32>
    %cst_154 = arith.constant dense<0.000000e+00> : vector<8x4xf32>
    %474 = tpu.matmul %472, %473, %cst_154 {dimension_numbers = #tpu.dot_dimension_numbers<[1], [0], [0], [1], [0, 0, 1, 1], [], []>} : vector<8x8xf32>, vector<8x4xf32>, vector<8x4xf32> -> vector<8x4xf32>
    %475 = tpu.concatenate %376, %390, %404, %418, %432, %446, %460, %474 in 1 : vector<8x4xf32>, vector<8x4xf32>, vector<8x4xf32>, vector<8x4xf32>, vector<8x4xf32>, vector<8x4xf32>, vector<8x4xf32>, vector<8x4xf32> -> vector<8x32xf32>
    %cst_155 = arith.constant dense<0.000000e+00> : vector<8x32xf32>
    %476 = tpu.matmul %475, %15, %cst_155 {dimension_numbers = #tpu.dot_dimension_numbers<[1], [0], [0], [1], [0, 0, 1, 1], [], []>} : vector<8x32xf32>, vector<32x32xf32>, vector<8x32xf32> -> vector<8x32xf32>
    %477 = vector.broadcast %5 : vector<1x32xf32> to vector<8x32xf32>
    %478 = arith.addf %476, %477 : vector<8x32xf32>
    %479 = arith.addf %351, %478 : vector<8x32xf32>
    %cst_156 = arith.constant dense<0.000000e+00> : vector<8xf32>
    %480 = vector.multi_reduction <add>, %479, %cst_156 [1] : vector<8x32xf32> to vector<8xf32>
    %481 = vector.shape_cast %480 : vector<8xf32> to vector<8x1xf32>
    %cst_157 = arith.constant 3.200000e+01 : f32
    %482 = vector.broadcast %cst_157 : f32 to vector<8x1xf32>
    %483 = arith.divf %481, %482 : vector<8x1xf32>
    %484 = vector.broadcast %483 : vector<8x1xf32> to vector<8x32xf32>
    %485 = arith.subf %479, %484 : vector<8x32xf32>
    %486 = arith.mulf %485, %485 : vector<8x32xf32>
    %cst_158 = arith.constant dense<0.000000e+00> : vector<8xf32>
    %487 = vector.multi_reduction <add>, %486, %cst_158 [1] : vector<8x32xf32> to vector<8xf32>
    %488 = vector.shape_cast %487 : vector<8xf32> to vector<8x1xf32>
    %cst_159 = arith.constant 3.200000e+01 : f32
    %489 = vector.broadcast %cst_159 : f32 to vector<8x1xf32>
    %490 = arith.divf %488, %489 : vector<8x1xf32>
    %cst_160 = arith.constant 9.99999974E-6 : f32
    %491 = vector.broadcast %cst_160 : f32 to vector<8x1xf32>
    %492 = arith.addf %490, %491 : vector<8x1xf32>
    %493 = math.rsqrt %492 : vector<8x1xf32>
    %494 = vector.broadcast %493 : vector<8x1xf32> to vector<8x32xf32>
    %495 = arith.mulf %485, %494 : vector<8x32xf32>
    %496 = vector.broadcast %9 : vector<1x32xf32> to vector<8x32xf32>
    %497 = arith.mulf %495, %496 : vector<8x32xf32>
    %498 = vector.broadcast %10 : vector<1x32xf32> to vector<8x32xf32>
    %499 = arith.addf %497, %498 : vector<8x32xf32>
    %c0_161 = arith.constant 0 : index
    %c0_162 = arith.constant 0 : index
    %500 = vector.load %arg5[%c0_161, %c0_162] : memref<32x32xf32, #tpu.memory_space<vmem>>, vector<32x32xf32>
    %cst_163 = arith.constant dense<0.000000e+00> : vector<8x32xf32>
    %501 = tpu.matmul %499, %500, %cst_163 {dimension_numbers = #tpu.dot_dimension_numbers<[1], [0], [0], [1], [0, 0, 1, 1], [], []>} : vector<8x32xf32>, vector<32x32xf32>, vector<8x32xf32> -> vector<8x32xf32>
    %502 = vector.broadcast %6 : vector<1x32xf32> to vector<8x32xf32>
    %503 = arith.addf %501, %502 : vector<8x32xf32>
    %c0_164 = arith.constant 0 : index
    %c0_165 = arith.constant 0 : index
    %504 = vector.load %arg6[%c0_164, %c0_165] : memref<32x64xf32, #tpu.memory_space<vmem>>, vector<32x64xf32>
    %cst_166 = arith.constant dense<0.000000e+00> : vector<16x64xf32>
    %505 = tpu.matmul %353, %504, %cst_166 {dimension_numbers = #tpu.dot_dimension_numbers<[1], [0], [0], [1], [0, 0, 1, 1], [], []>} : vector<16x32xf32>, vector<32x64xf32>, vector<16x64xf32> -> vector<16x64xf32>
    %506 = vector.broadcast %3 : vector<1x64xf32> to vector<16x64xf32>
    %507 = arith.addf %505, %506 : vector<16x64xf32>
    %508 = vector.extract_strided_slice %507 {offsets = [0, 0], sizes = [16, 32], strides = [1, 1]} : vector<16x64xf32> to vector<16x32xf32>
    %509 = vector.extract_strided_slice %507 {offsets = [0, 32], sizes = [16, 32], strides = [1, 1]} : vector<16x64xf32> to vector<16x32xf32>
    %cst_167 = arith.constant 5.000000e-01 : f32
    %510 = vector.broadcast %cst_167 : f32 to vector<8x32xf32>
    %511 = arith.mulf %503, %510 : vector<8x32xf32>
    %512 = vector.extract_strided_slice %511 {offsets = [0, 0], sizes = [8, 4], strides = [1, 1]} : vector<8x32xf32> to vector<8x4xf32>
    %513 = vector.extract_strided_slice %508 {offsets = [0, 0], sizes = [16, 4], strides = [1, 1]} : vector<16x32xf32> to vector<16x4xf32>
    %cst_168 = arith.constant dense<0.000000e+00> : vector<8x16xf32>
    %514 = tpu.matmul %512, %513, %cst_168 {dimension_numbers = #tpu.dot_dimension_numbers<[1], [1], [0], [0], [0, 0, 1, 0], [], []>} : vector<8x4xf32>, vector<16x4xf32>, vector<8x16xf32> -> vector<8x16xf32>
    %cst_169 = arith.constant dense<0xFF800000> : vector<8xf32>
    %515 = vector.multi_reduction <maximumf>, %514, %cst_169 [1] : vector<8x16xf32> to vector<8xf32>
    %516 = vector.shape_cast %515 : vector<8xf32> to vector<8x1xf32>
    %517 = vector.broadcast %516 : vector<8x1xf32> to vector<8x16xf32>
    %518 = arith.subf %514, %517 : vector<8x16xf32>
    %519 = math.exp %518 : vector<8x16xf32>
    %cst_170 = arith.constant dense<0.000000e+00> : vector<8xf32>
    %520 = vector.multi_reduction <add>, %519, %cst_170 [1] : vector<8x16xf32> to vector<8xf32>
    %521 = vector.shape_cast %520 : vector<8xf32> to vector<8x1xf32>
    %522 = vector.broadcast %521 : vector<8x1xf32> to vector<8x16xf32>
    %523 = arith.divf %519, %522 : vector<8x16xf32>
    %524 = vector.extract_strided_slice %509 {offsets = [0, 0], sizes = [16, 4], strides = [1, 1]} : vector<16x32xf32> to vector<16x4xf32>
    %cst_171 = arith.constant dense<0.000000e+00> : vector<8x4xf32>
    %525 = tpu.matmul %523, %524, %cst_171 {dimension_numbers = #tpu.dot_dimension_numbers<[1], [0], [0], [1], [0, 0, 1, 1], [], []>} : vector<8x16xf32>, vector<16x4xf32>, vector<8x4xf32> -> vector<8x4xf32>
    %526 = vector.extract_strided_slice %511 {offsets = [0, 4], sizes = [8, 4], strides = [1, 1]} : vector<8x32xf32> to vector<8x4xf32>
    %527 = vector.extract_strided_slice %508 {offsets = [0, 4], sizes = [16, 4], strides = [1, 1]} : vector<16x32xf32> to vector<16x4xf32>
    %cst_172 = arith.constant dense<0.000000e+00> : vector<8x16xf32>
    %528 = tpu.matmul %526, %527, %cst_172 {dimension_numbers = #tpu.dot_dimension_numbers<[1], [1], [0], [0], [0, 0, 1, 0], [], []>} : vector<8x4xf32>, vector<16x4xf32>, vector<8x16xf32> -> vector<8x16xf32>
    %cst_173 = arith.constant dense<0xFF800000> : vector<8xf32>
    %529 = vector.multi_reduction <maximumf>, %528, %cst_173 [1] : vector<8x16xf32> to vector<8xf32>
    %530 = vector.shape_cast %529 : vector<8xf32> to vector<8x1xf32>
    %531 = vector.broadcast %530 : vector<8x1xf32> to vector<8x16xf32>
    %532 = arith.subf %528, %531 : vector<8x16xf32>
    %533 = math.exp %532 : vector<8x16xf32>
    %cst_174 = arith.constant dense<0.000000e+00> : vector<8xf32>
    %534 = vector.multi_reduction <add>, %533, %cst_174 [1] : vector<8x16xf32> to vector<8xf32>
    %535 = vector.shape_cast %534 : vector<8xf32> to vector<8x1xf32>
    %536 = vector.broadcast %535 : vector<8x1xf32> to vector<8x16xf32>
    %537 = arith.divf %533, %536 : vector<8x16xf32>
    %538 = vector.extract_strided_slice %509 {offsets = [0, 4], sizes = [16, 4], strides = [1, 1]} : vector<16x32xf32> to vector<16x4xf32>
    %cst_175 = arith.constant dense<0.000000e+00> : vector<8x4xf32>
    %539 = tpu.matmul %537, %538, %cst_175 {dimension_numbers = #tpu.dot_dimension_numbers<[1], [0], [0], [1], [0, 0, 1, 1], [], []>} : vector<8x16xf32>, vector<16x4xf32>, vector<8x4xf32> -> vector<8x4xf32>
    %540 = vector.extract_strided_slice %511 {offsets = [0, 8], sizes = [8, 4], strides = [1, 1]} : vector<8x32xf32> to vector<8x4xf32>
    %541 = vector.extract_strided_slice %508 {offsets = [0, 8], sizes = [16, 4], strides = [1, 1]} : vector<16x32xf32> to vector<16x4xf32>
    %cst_176 = arith.constant dense<0.000000e+00> : vector<8x16xf32>
    %542 = tpu.matmul %540, %541, %cst_176 {dimension_numbers = #tpu.dot_dimension_numbers<[1], [1], [0], [0], [0, 0, 1, 0], [], []>} : vector<8x4xf32>, vector<16x4xf32>, vector<8x16xf32> -> vector<8x16xf32>
    %cst_177 = arith.constant dense<0xFF800000> : vector<8xf32>
    %543 = vector.multi_reduction <maximumf>, %542, %cst_177 [1] : vector<8x16xf32> to vector<8xf32>
    %544 = vector.shape_cast %543 : vector<8xf32> to vector<8x1xf32>
    %545 = vector.broadcast %544 : vector<8x1xf32> to vector<8x16xf32>
    %546 = arith.subf %542, %545 : vector<8x16xf32>
    %547 = math.exp %546 : vector<8x16xf32>
    %cst_178 = arith.constant dense<0.000000e+00> : vector<8xf32>
    %548 = vector.multi_reduction <add>, %547, %cst_178 [1] : vector<8x16xf32> to vector<8xf32>
    %549 = vector.shape_cast %548 : vector<8xf32> to vector<8x1xf32>
    %550 = vector.broadcast %549 : vector<8x1xf32> to vector<8x16xf32>
    %551 = arith.divf %547, %550 : vector<8x16xf32>
    %552 = vector.extract_strided_slice %509 {offsets = [0, 8], sizes = [16, 4], strides = [1, 1]} : vector<16x32xf32> to vector<16x4xf32>
    %cst_179 = arith.constant dense<0.000000e+00> : vector<8x4xf32>
    %553 = tpu.matmul %551, %552, %cst_179 {dimension_numbers = #tpu.dot_dimension_numbers<[1], [0], [0], [1], [0, 0, 1, 1], [], []>} : vector<8x16xf32>, vector<16x4xf32>, vector<8x4xf32> -> vector<8x4xf32>
    %554 = vector.extract_strided_slice %511 {offsets = [0, 12], sizes = [8, 4], strides = [1, 1]} : vector<8x32xf32> to vector<8x4xf32>
    %555 = vector.extract_strided_slice %508 {offsets = [0, 12], sizes = [16, 4], strides = [1, 1]} : vector<16x32xf32> to vector<16x4xf32>
    %cst_180 = arith.constant dense<0.000000e+00> : vector<8x16xf32>
    %556 = tpu.matmul %554, %555, %cst_180 {dimension_numbers = #tpu.dot_dimension_numbers<[1], [1], [0], [0], [0, 0, 1, 0], [], []>} : vector<8x4xf32>, vector<16x4xf32>, vector<8x16xf32> -> vector<8x16xf32>
    %cst_181 = arith.constant dense<0xFF800000> : vector<8xf32>
    %557 = vector.multi_reduction <maximumf>, %556, %cst_181 [1] : vector<8x16xf32> to vector<8xf32>
    %558 = vector.shape_cast %557 : vector<8xf32> to vector<8x1xf32>
    %559 = vector.broadcast %558 : vector<8x1xf32> to vector<8x16xf32>
    %560 = arith.subf %556, %559 : vector<8x16xf32>
    %561 = math.exp %560 : vector<8x16xf32>
    %cst_182 = arith.constant dense<0.000000e+00> : vector<8xf32>
    %562 = vector.multi_reduction <add>, %561, %cst_182 [1] : vector<8x16xf32> to vector<8xf32>
    %563 = vector.shape_cast %562 : vector<8xf32> to vector<8x1xf32>
    %564 = vector.broadcast %563 : vector<8x1xf32> to vector<8x16xf32>
    %565 = arith.divf %561, %564 : vector<8x16xf32>
    %566 = vector.extract_strided_slice %509 {offsets = [0, 12], sizes = [16, 4], strides = [1, 1]} : vector<16x32xf32> to vector<16x4xf32>
    %cst_183 = arith.constant dense<0.000000e+00> : vector<8x4xf32>
    %567 = tpu.matmul %565, %566, %cst_183 {dimension_numbers = #tpu.dot_dimension_numbers<[1], [0], [0], [1], [0, 0, 1, 1], [], []>} : vector<8x16xf32>, vector<16x4xf32>, vector<8x4xf32> -> vector<8x4xf32>
    %568 = vector.extract_strided_slice %511 {offsets = [0, 16], sizes = [8, 4], strides = [1, 1]} : vector<8x32xf32> to vector<8x4xf32>
    %569 = vector.extract_strided_slice %508 {offsets = [0, 16], sizes = [16, 4], strides = [1, 1]} : vector<16x32xf32> to vector<16x4xf32>
    %cst_184 = arith.constant dense<0.000000e+00> : vector<8x16xf32>
    %570 = tpu.matmul %568, %569, %cst_184 {dimension_numbers = #tpu.dot_dimension_numbers<[1], [1], [0], [0], [0, 0, 1, 0], [], []>} : vector<8x4xf32>, vector<16x4xf32>, vector<8x16xf32> -> vector<8x16xf32>
    %cst_185 = arith.constant dense<0xFF800000> : vector<8xf32>
    %571 = vector.multi_reduction <maximumf>, %570, %cst_185 [1] : vector<8x16xf32> to vector<8xf32>
    %572 = vector.shape_cast %571 : vector<8xf32> to vector<8x1xf32>
    %573 = vector.broadcast %572 : vector<8x1xf32> to vector<8x16xf32>
    %574 = arith.subf %570, %573 : vector<8x16xf32>
    %575 = math.exp %574 : vector<8x16xf32>
    %cst_186 = arith.constant dense<0.000000e+00> : vector<8xf32>
    %576 = vector.multi_reduction <add>, %575, %cst_186 [1] : vector<8x16xf32> to vector<8xf32>
    %577 = vector.shape_cast %576 : vector<8xf32> to vector<8x1xf32>
    %578 = vector.broadcast %577 : vector<8x1xf32> to vector<8x16xf32>
    %579 = arith.divf %575, %578 : vector<8x16xf32>
    %580 = vector.extract_strided_slice %509 {offsets = [0, 16], sizes = [16, 4], strides = [1, 1]} : vector<16x32xf32> to vector<16x4xf32>
    %cst_187 = arith.constant dense<0.000000e+00> : vector<8x4xf32>
    %581 = tpu.matmul %579, %580, %cst_187 {dimension_numbers = #tpu.dot_dimension_numbers<[1], [0], [0], [1], [0, 0, 1, 1], [], []>} : vector<8x16xf32>, vector<16x4xf32>, vector<8x4xf32> -> vector<8x4xf32>
    %582 = vector.extract_strided_slice %511 {offsets = [0, 20], sizes = [8, 4], strides = [1, 1]} : vector<8x32xf32> to vector<8x4xf32>
    %583 = vector.extract_strided_slice %508 {offsets = [0, 20], sizes = [16, 4], strides = [1, 1]} : vector<16x32xf32> to vector<16x4xf32>
    %cst_188 = arith.constant dense<0.000000e+00> : vector<8x16xf32>
    %584 = tpu.matmul %582, %583, %cst_188 {dimension_numbers = #tpu.dot_dimension_numbers<[1], [1], [0], [0], [0, 0, 1, 0], [], []>} : vector<8x4xf32>, vector<16x4xf32>, vector<8x16xf32> -> vector<8x16xf32>
    %cst_189 = arith.constant dense<0xFF800000> : vector<8xf32>
    %585 = vector.multi_reduction <maximumf>, %584, %cst_189 [1] : vector<8x16xf32> to vector<8xf32>
    %586 = vector.shape_cast %585 : vector<8xf32> to vector<8x1xf32>
    %587 = vector.broadcast %586 : vector<8x1xf32> to vector<8x16xf32>
    %588 = arith.subf %584, %587 : vector<8x16xf32>
    %589 = math.exp %588 : vector<8x16xf32>
    %cst_190 = arith.constant dense<0.000000e+00> : vector<8xf32>
    %590 = vector.multi_reduction <add>, %589, %cst_190 [1] : vector<8x16xf32> to vector<8xf32>
    %591 = vector.shape_cast %590 : vector<8xf32> to vector<8x1xf32>
    %592 = vector.broadcast %591 : vector<8x1xf32> to vector<8x16xf32>
    %593 = arith.divf %589, %592 : vector<8x16xf32>
    %594 = vector.extract_strided_slice %509 {offsets = [0, 20], sizes = [16, 4], strides = [1, 1]} : vector<16x32xf32> to vector<16x4xf32>
    %cst_191 = arith.constant dense<0.000000e+00> : vector<8x4xf32>
    %595 = tpu.matmul %593, %594, %cst_191 {dimension_numbers = #tpu.dot_dimension_numbers<[1], [0], [0], [1], [0, 0, 1, 1], [], []>} : vector<8x16xf32>, vector<16x4xf32>, vector<8x4xf32> -> vector<8x4xf32>
    %596 = vector.extract_strided_slice %511 {offsets = [0, 24], sizes = [8, 4], strides = [1, 1]} : vector<8x32xf32> to vector<8x4xf32>
    %597 = vector.extract_strided_slice %508 {offsets = [0, 24], sizes = [16, 4], strides = [1, 1]} : vector<16x32xf32> to vector<16x4xf32>
    %cst_192 = arith.constant dense<0.000000e+00> : vector<8x16xf32>
    %598 = tpu.matmul %596, %597, %cst_192 {dimension_numbers = #tpu.dot_dimension_numbers<[1], [1], [0], [0], [0, 0, 1, 0], [], []>} : vector<8x4xf32>, vector<16x4xf32>, vector<8x16xf32> -> vector<8x16xf32>
    %cst_193 = arith.constant dense<0xFF800000> : vector<8xf32>
    %599 = vector.multi_reduction <maximumf>, %598, %cst_193 [1] : vector<8x16xf32> to vector<8xf32>
    %600 = vector.shape_cast %599 : vector<8xf32> to vector<8x1xf32>
    %601 = vector.broadcast %600 : vector<8x1xf32> to vector<8x16xf32>
    %602 = arith.subf %598, %601 : vector<8x16xf32>
    %603 = math.exp %602 : vector<8x16xf32>
    %cst_194 = arith.constant dense<0.000000e+00> : vector<8xf32>
    %604 = vector.multi_reduction <add>, %603, %cst_194 [1] : vector<8x16xf32> to vector<8xf32>
    %605 = vector.shape_cast %604 : vector<8xf32> to vector<8x1xf32>
    %606 = vector.broadcast %605 : vector<8x1xf32> to vector<8x16xf32>
    %607 = arith.divf %603, %606 : vector<8x16xf32>
    %608 = vector.extract_strided_slice %509 {offsets = [0, 24], sizes = [16, 4], strides = [1, 1]} : vector<16x32xf32> to vector<16x4xf32>
    %cst_195 = arith.constant dense<0.000000e+00> : vector<8x4xf32>
    %609 = tpu.matmul %607, %608, %cst_195 {dimension_numbers = #tpu.dot_dimension_numbers<[1], [0], [0], [1], [0, 0, 1, 1], [], []>} : vector<8x16xf32>, vector<16x4xf32>, vector<8x4xf32> -> vector<8x4xf32>
    %610 = vector.extract_strided_slice %511 {offsets = [0, 28], sizes = [8, 4], strides = [1, 1]} : vector<8x32xf32> to vector<8x4xf32>
    %611 = vector.extract_strided_slice %508 {offsets = [0, 28], sizes = [16, 4], strides = [1, 1]} : vector<16x32xf32> to vector<16x4xf32>
    %cst_196 = arith.constant dense<0.000000e+00> : vector<8x16xf32>
    %612 = tpu.matmul %610, %611, %cst_196 {dimension_numbers = #tpu.dot_dimension_numbers<[1], [1], [0], [0], [0, 0, 1, 0], [], []>} : vector<8x4xf32>, vector<16x4xf32>, vector<8x16xf32> -> vector<8x16xf32>
    %cst_197 = arith.constant dense<0xFF800000> : vector<8xf32>
    %613 = vector.multi_reduction <maximumf>, %612, %cst_197 [1] : vector<8x16xf32> to vector<8xf32>
    %614 = vector.shape_cast %613 : vector<8xf32> to vector<8x1xf32>
    %615 = vector.broadcast %614 : vector<8x1xf32> to vector<8x16xf32>
    %616 = arith.subf %612, %615 : vector<8x16xf32>
    %617 = math.exp %616 : vector<8x16xf32>
    %cst_198 = arith.constant dense<0.000000e+00> : vector<8xf32>
    %618 = vector.multi_reduction <add>, %617, %cst_198 [1] : vector<8x16xf32> to vector<8xf32>
    %619 = vector.shape_cast %618 : vector<8xf32> to vector<8x1xf32>
    %620 = vector.broadcast %619 : vector<8x1xf32> to vector<8x16xf32>
    %621 = arith.divf %617, %620 : vector<8x16xf32>
    %622 = vector.extract_strided_slice %509 {offsets = [0, 28], sizes = [16, 4], strides = [1, 1]} : vector<16x32xf32> to vector<16x4xf32>
    %cst_199 = arith.constant dense<0.000000e+00> : vector<8x4xf32>
    %623 = tpu.matmul %621, %622, %cst_199 {dimension_numbers = #tpu.dot_dimension_numbers<[1], [0], [0], [1], [0, 0, 1, 1], [], []>} : vector<8x16xf32>, vector<16x4xf32>, vector<8x4xf32> -> vector<8x4xf32>
    %624 = tpu.concatenate %525, %539, %553, %567, %581, %595, %609, %623 in 1 : vector<8x4xf32>, vector<8x4xf32>, vector<8x4xf32>, vector<8x4xf32>, vector<8x4xf32>, vector<8x4xf32>, vector<8x4xf32>, vector<8x4xf32> -> vector<8x32xf32>
    %cst_200 = arith.constant dense<0.000000e+00> : vector<8x32xf32>
    %625 = tpu.matmul %624, %16, %cst_200 {dimension_numbers = #tpu.dot_dimension_numbers<[1], [0], [0], [1], [0, 0, 1, 1], [], []>} : vector<8x32xf32>, vector<32x32xf32>, vector<8x32xf32> -> vector<8x32xf32>
    %626 = vector.broadcast %7 : vector<1x32xf32> to vector<8x32xf32>
    %627 = arith.addf %625, %626 : vector<8x32xf32>
    %628 = arith.addf %499, %627 : vector<8x32xf32>
    %cst_201 = arith.constant dense<0.000000e+00> : vector<8xf32>
    %629 = vector.multi_reduction <add>, %628, %cst_201 [1] : vector<8x32xf32> to vector<8xf32>
    %630 = vector.shape_cast %629 : vector<8xf32> to vector<8x1xf32>
    %cst_202 = arith.constant 3.200000e+01 : f32
    %631 = vector.broadcast %cst_202 : f32 to vector<8x1xf32>
    %632 = arith.divf %630, %631 : vector<8x1xf32>
    %633 = vector.broadcast %632 : vector<8x1xf32> to vector<8x32xf32>
    %634 = arith.subf %628, %633 : vector<8x32xf32>
    %635 = arith.mulf %634, %634 : vector<8x32xf32>
    %cst_203 = arith.constant dense<0.000000e+00> : vector<8xf32>
    %636 = vector.multi_reduction <add>, %635, %cst_203 [1] : vector<8x32xf32> to vector<8xf32>
    %637 = vector.shape_cast %636 : vector<8xf32> to vector<8x1xf32>
    %cst_204 = arith.constant 3.200000e+01 : f32
    %638 = vector.broadcast %cst_204 : f32 to vector<8x1xf32>
    %639 = arith.divf %637, %638 : vector<8x1xf32>
    %cst_205 = arith.constant 9.99999974E-6 : f32
    %640 = vector.broadcast %cst_205 : f32 to vector<8x1xf32>
    %641 = arith.addf %639, %640 : vector<8x1xf32>
    %642 = math.rsqrt %641 : vector<8x1xf32>
    %643 = vector.broadcast %642 : vector<8x1xf32> to vector<8x32xf32>
    %644 = arith.mulf %634, %643 : vector<8x32xf32>
    %645 = vector.broadcast %11 : vector<1x32xf32> to vector<8x32xf32>
    %646 = arith.mulf %644, %645 : vector<8x32xf32>
    %647 = vector.broadcast %12 : vector<1x32xf32> to vector<8x32xf32>
    %648 = arith.addf %646, %647 : vector<8x32xf32>
    %c0_206 = arith.constant 0 : index
    %c0_207 = arith.constant 0 : index
    %649 = vector.load %arg8[%c0_206, %c0_207] : memref<32x128xf32, #tpu.memory_space<vmem>>, vector<32x128xf32>
    %cst_208 = arith.constant dense<0.000000e+00> : vector<8x128xf32>
    %650 = tpu.matmul %648, %649, %cst_208 {dimension_numbers = #tpu.dot_dimension_numbers<[1], [0], [0], [1], [0, 0, 1, 1], [], []>} : vector<8x32xf32>, vector<32x128xf32>, vector<8x128xf32> -> vector<8x128xf32>
    %651 = vector.broadcast %4 : vector<1x128xf32> to vector<8x128xf32>
    %652 = arith.addf %650, %651 : vector<8x128xf32>
    %cst_209 = arith.constant 0.000000e+00 : f32
    %653 = vector.broadcast %cst_209 : f32 to vector<8x128xf32>
    %654 = arith.maximumf %652, %653 : vector<8x128xf32>
    %c0_210 = arith.constant 0 : index
    %c0_211 = arith.constant 0 : index
    %655 = vector.load %arg9[%c0_210, %c0_211] : memref<128x32xf32, #tpu.memory_space<vmem>>, vector<128x32xf32>
    %cst_212 = arith.constant dense<0.000000e+00> : vector<8x32xf32>
    %656 = tpu.matmul %654, %655, %cst_212 {dimension_numbers = #tpu.dot_dimension_numbers<[1], [0], [0], [1], [0, 0, 1, 1], [], []>} : vector<8x128xf32>, vector<128x32xf32>, vector<8x32xf32> -> vector<8x32xf32>
    %657 = vector.broadcast %8 : vector<1x32xf32> to vector<8x32xf32>
    %658 = arith.addf %656, %657 : vector<8x32xf32>
    %659 = arith.addf %648, %658 : vector<8x32xf32>
    %cst_213 = arith.constant dense<0.000000e+00> : vector<8xf32>
    %660 = vector.multi_reduction <add>, %659, %cst_213 [1] : vector<8x32xf32> to vector<8xf32>
    %661 = vector.shape_cast %660 : vector<8xf32> to vector<8x1xf32>
    %cst_214 = arith.constant 3.200000e+01 : f32
    %662 = vector.broadcast %cst_214 : f32 to vector<8x1xf32>
    %663 = arith.divf %661, %662 : vector<8x1xf32>
    %664 = vector.broadcast %663 : vector<8x1xf32> to vector<8x32xf32>
    %665 = arith.subf %659, %664 : vector<8x32xf32>
    %666 = arith.mulf %665, %665 : vector<8x32xf32>
    %cst_215 = arith.constant dense<0.000000e+00> : vector<8xf32>
    %667 = vector.multi_reduction <add>, %666, %cst_215 [1] : vector<8x32xf32> to vector<8xf32>
    %668 = vector.shape_cast %667 : vector<8xf32> to vector<8x1xf32>
    %cst_216 = arith.constant 3.200000e+01 : f32
    %669 = vector.broadcast %cst_216 : f32 to vector<8x1xf32>
    %670 = arith.divf %668, %669 : vector<8x1xf32>
    %cst_217 = arith.constant 9.99999974E-6 : f32
    %671 = vector.broadcast %cst_217 : f32 to vector<8x1xf32>
    %672 = arith.addf %670, %671 : vector<8x1xf32>
    %673 = math.rsqrt %672 : vector<8x1xf32>
    %674 = vector.broadcast %673 : vector<8x1xf32> to vector<8x32xf32>
    %675 = arith.mulf %665, %674 : vector<8x32xf32>
    %676 = vector.broadcast %13 : vector<1x32xf32> to vector<8x32xf32>
    %677 = arith.mulf %675, %676 : vector<8x32xf32>
    %678 = vector.broadcast %14 : vector<1x32xf32> to vector<8x32xf32>
    %679 = arith.addf %677, %678 : vector<8x32xf32>
    %c1_218 = arith.constant 1 : index
    %c0_219 = arith.constant 0 : index
    %c0_220 = arith.constant 0 : index
    %680 = vector.load %arg12[%c1_218, %c0_219, %c0_220] : memref<2x8x32xf32, #tpu.memory_space<vmem>>, vector<1x8x32xf32>
    %681 = vector.shape_cast %680 : vector<1x8x32xf32> to vector<8x32xf32>
    %682 = vector.shape_cast %679 : vector<8x32xf32> to vector<1x8x32xf32>
    tpu.vector_store %arg12[%c1_218, %c0_219, %c0_220], %682 {strides = array<i32>} : memref<2x8x32xf32, #tpu.memory_space<vmem>>, vector<1x8x32xf32>,
    return
  }
  func.func @transform_0(%arg0: i32) -> (i32, i32, i32) {
    %c0_i32 = arith.constant 0 : i32
    %c0_i32_0 = arith.constant 0 : i32
    %c0_i32_1 = arith.constant 0 : i32
    return %arg0, %c0_i32, %c0_i32_0 : i32, i32, i32
  }
  func.func @transform_1(%arg0: i32) -> (i32, i32, i32) {
    %c0_i32 = arith.constant 0 : i32
    %c0_i32_0 = arith.constant 0 : i32
    %c0_i32_1 = arith.constant 0 : i32
    return %arg0, %c0_i32, %c0_i32_0 : i32, i32, i32
  }
  func.func @transform_2(%arg0: i32) -> (i32, i32) {
    %c0_i32 = arith.constant 0 : i32
    %c0_i32_0 = arith.constant 0 : i32
    %c0_i32_1 = arith.constant 0 : i32
    return %c0_i32, %c0_i32_0 : i32, i32
  }
  func.func @transform_3(%arg0: i32) -> (i32, i32) {
    %c0_i32 = arith.constant 0 : i32
    %c0_i32_0 = arith.constant 0 : i32
    %c0_i32_1 = arith.constant 0 : i32
    return %c0_i32, %c0_i32_0 : i32, i32
  }
  func.func @transform_4(%arg0: i32) -> (i32, i32) {
    %c0_i32 = arith.constant 0 : i32
    %c0_i32_0 = arith.constant 0 : i32
    %c0_i32_1 = arith.constant 0 : i32
    return %c0_i32, %c0_i32_0 : i32, i32
  }
  func.func @transform_5(%arg0: i32) -> (i32, i32) {
    %c0_i32 = arith.constant 0 : i32
    %c0_i32_0 = arith.constant 0 : i32
    %c0_i32_1 = arith.constant 0 : i32
    return %c0_i32, %c0_i32_0 : i32, i32
  }
  func.func @transform_6(%arg0: i32) -> (i32, i32) {
    %c0_i32 = arith.constant 0 : i32
    %c0_i32_0 = arith.constant 0 : i32
    %c0_i32_1 = arith.constant 0 : i32
    return %c0_i32, %c0_i32_0 : i32, i32
  }
  func.func @transform_7(%arg0: i32) -> (i32, i32) {
    %c0_i32 = arith.constant 0 : i32
    %c0_i32_0 = arith.constant 0 : i32
    %c0_i32_1 = arith.constant 0 : i32
    return %c0_i32, %c0_i32_0 : i32, i32
  }
  func.func @transform_8(%arg0: i32) -> (i32, i32) {
    %c0_i32 = arith.constant 0 : i32
    %c0_i32_0 = arith.constant 0 : i32
    %c0_i32_1 = arith.constant 0 : i32
    return %c0_i32, %c0_i32_0 : i32, i32
  }
  func.func @transform_9(%arg0: i32) -> (i32, i32) {
    %c0_i32 = arith.constant 0 : i32
    %c0_i32_0 = arith.constant 0 : i32
    %c0_i32_1 = arith.constant 0 : i32
    return %c0_i32, %c0_i32_0 : i32, i32
  }
  func.func @transform_10(%arg0: i32) -> (i32, i32) {
    %c0_i32 = arith.constant 0 : i32
    %c0_i32_0 = arith.constant 0 : i32
    %c0_i32_1 = arith.constant 0 : i32
    return %c0_i32, %c0_i32_0 : i32, i32
  }
  func.func @transform_11(%arg0: i32) -> (i32, i32, i32) {
    %c0_i32 = arith.constant 0 : i32
    %c0_i32_0 = arith.constant 0 : i32
    %c0_i32_1 = arith.constant 0 : i32
    return %arg0, %c0_i32, %c0_i32_0 : i32, i32, i32
  }
}

</mosaic_0001>

<bundles_post_ra>
// kernel: tpu_custom_call.1
= control target key start
LH: loop header
LB: loop body
LE: loop exit
PB: predicated region body
PF: predicated region fallthrough
CT: control target
= control target key end

     0   :  { %16 = vsyncpa [#allocation3], 0  ;;  %s9537_s0 = inlined_call_operand.hbm [shape: f32[2,8,32], index: 0, kind: input, shape index: {}]   ;;  %s9538_s1 = inlined_call_operand.vmem [shape: f32[2,16,32], index: 1, kind: input, shape index: {}]   ;;  %s9539_s2 = inlined_call_operand.vmem [shape: f32[32,96], index: 2, kind: input, shape index: {}]   ;;  %s9540_s3 = inlined_call_operand.vmem [shape: f32[32,32], index: 3, kind: input, shape index: {}]   ;;  %s9541_s4 = inlined_call_operand.vmem [shape: f32[32,32], index: 4, kind: input, shape index: {}]   ;;  %s9542_s5 = inlined_call_operand.vmem [shape: f32[32,64], index: 5, kind: input, shape index: {}]   ;;  %s9543_s6 = inlined_call_operand.hbm [shape: f32[32,32], index: 6, kind: input, shape index: {}]   ;;  %s9544_s7 = inlined_call_operand.hbm [shape: f32[32,128], index: 7, kind: input, shape index: {}]   ;;  %s9545_s8 = inlined_call_operand.vmem [shape: f32[128,32], index: 8, kind: input, shape index: {}]   ;;  %s9546_s9 = inlined_call_operand.hbm [shape: f32[3,128], index: 9, kind: input, shape index: {}]   ;;  %s9547_s10 = inlined_call_operand.vmem [shape: f32[10,32], index: 10, kind: input, shape index: {}]   ;;  %s9548_s11 = inlined_call_operand.hbm [shape: f32[2,8,32], index: 11, kind: output, shape index: {}]  }
   0x1   :  { %17 = vsyncpa [#allocation6], 0 }
   0x2   :  { %18 = vsyncpa [#allocation9], 0 }
   0x3   :  { %19 = vsyncpa [#allocation4], 0  ;;  %s8184_s17 = smov [#allocation5]   ;;  %s8185_s19 = smov [#allocation2]  }
   0x4   :  { %s47_s18 = sshll.u32 %s8184_s17, 4  ;;  %s25_s20 = sshll.u32 %s8185_s19, 4  ;;  %s48_s18 = int_to_ptr.vmem [resolvable:$true] %s47_s18  ;;  %s26_s20 = int_to_ptr.vmem [resolvable:$true] %s25_s20 }
   0x5   :  { %s8084_s21 = scalar_lea.vmem %s48_s18, 512  ;;  %p8089_p1 = scmp.lt.s32.totalorder %s48_s18, %s48_s18 }
   0x6   :  { %p8085_p0 = scmp.ne.s32.totalorder %s48_s18, %s8084_s21  ;;  %p8090_p2 = scmp.lt.s32.totalorder %s8084_s21, %s8084_s21 }
   0x8   :  { %p8091_p3 = por %p8090_p2, %p8089_p1 }
   0xa   :  { %p8092_p4 = pnand %p8091_p3, %p8085_p0 }
   0xc   :  { %8095 = shalt.err (!%p8092_p4)
}
   0xd   :  { %s9549_s22 = smov 128   ;;  %s9566_s23 = smov 8  }
   0xe   :  { %53 = dma.hbm_to_vmem [thread:$0]  %s9543_s6, 512, %s48_s18, [#allocation6], %s9549_s22, %s9549_s22, %s9566_s23  }
   0xf   :  { %s8104_s26 = scalar_lea.vmem %s26_s20, 256  ;;  %p8109_p6 = scmp.lt.s32.totalorder %s26_s20, %s26_s20 }
  0x10   :  { %p8105_p5 = scmp.ne.s32.totalorder %s26_s20, %s8104_s26  ;;  %p8110_p7 = scmp.lt.s32.totalorder %s8104_s26, %s8104_s26 }
  0x12   :  { %p8111_p8 = por %p8110_p7, %p8109_p6 }
  0x14   :  { %p8112_p9 = pnand %p8111_p8, %p8105_p5 }
  0x16   :  { %8115 = shalt.err (!%p8112_p9)
}
  0x17   :  { %31 = dma.hbm_to_vmem [thread:$0]  %s9537_s0, 256, %s26_s20, [#allocation3], %s9549_s22, %s9549_s22, %s9566_s23  }
  0x18   :  { %s8188_s29 = smov [#allocation7]   ;;  %s8189_s12 = smov [#allocation8]  }
  0x19   :  { %s59_s30 = sshll.u32 %s8188_s29, 4  ;;  %s74_s13 = sshll.u32 %s8189_s12, 4  ;;  %s60_s30 = int_to_ptr.vmem [resolvable:$true] %s59_s30  ;;  %s75_s13 = int_to_ptr.vmem [resolvable:$true] %s74_s13 }
  0x1a   :  { %s8124_s6 = scalar_lea.vmem %s60_s30, 512  ;;  %p8129_p11 = scmp.lt.s32.totalorder %s60_s30, %s60_s30 }
  0x1b   :  { %p8125_p10 = scmp.ne.s32.totalorder %s60_s30, %s8124_s6  ;;  %p8130_p12 = scmp.lt.s32.totalorder %s8124_s6, %s8124_s6 }
  0x1d   :  { %p8131_p13 = por %p8130_p12, %p8129_p11 }
  0x1f   :  { %p8132_p0 = pnand %p8131_p13, %p8125_p10 }
  0x21   :  { %8135 = shalt.err (!%p8132_p0)
}
  0x22   :  { %65 = dma.hbm_to_vmem [thread:$0]  %s9544_s7, 512, %s60_s30, [#allocation6], %s9549_s22, %s9549_s22, %s9566_s23  }
  0x23   :  { %s8144_s0 = scalar_lea.vmem %s75_s13, 64  ;;  %p8149_p2 = scmp.lt.s32.totalorder %s75_s13, %s75_s13 }
  0x24   :  { %p8145_p1 = scmp.ne.s32.totalorder %s75_s13, %s8144_s0  ;;  %p8150_p3 = scmp.lt.s32.totalorder %s8144_s0, %s8144_s0 }
  0x26   :  { %p8151_p4 = por %p8150_p3, %p8149_p2 }
  0x28   :  { %p8152_p5 = pnand %p8151_p4, %p8145_p1 }
  0x2a   :  { %8155 = shalt.err (!%p8152_p5)
}
  0x2b   :  { %77 = dma.hbm_to_vmem [thread:$0]  %s9546_s9, 64, %s75_s13, [#allocation9]  }
  0x2c   :  { %8176 = dma.done.wait [#allocation3], 256  }
  0x2d   :  { %8177 = vsyncadd [#allocation3], 4294967040 }
  0x2e   :  { %8178 = dma.done.wait [#allocation6], 1024  }
  0x2f   :  { %8179 = vsyncadd [#allocation6], 4294966272 }
  0x30   :  { %8180 = dma.done.wait [#allocation9], 64  }
  0x31   :  { %8181 = vsyncadd [#allocation9], 4294967232  ;;  %v8190_v0 = vmov 0.0   ;;  %vm8191_vm0 = vmmov 0   ;;  %v109_v1 = vld [vmem:[%s9539_s2 + $0x18] sm:$0xff]  ;;  %v108_v2 = vld [vmem:[%s9539_s2 + $0x10] sm:$0xff]  ;;  %v110_v6 = vlaneseq }
  0x32   :  { %7302 = vmatprep.subr.mxu1 %v8190_v0  ;;  %7310 = vmatprep.mubr.msk.f32.mxu1 %vm8191_vm0, %v8190_v0  ;;  %v107_v3 = vld [vmem:[%s9539_s2 + $0x8] sm:$0xff]  ;;  %v106_v4 = vld [vmem:[%s9539_s2] sm:$0xff]  ;;  %vm114_vm1 = vcmask 261120   ;;  %v8336_v9 = vld [vmem:[#allocation8] sm:$0x7]  ;;  %s9598_s26 = smov 96  }
  0x33   :  { %7323 = vmatprep.subr.mxu0 %v8190_v0  ;;  %7325 = vmatprep.mubr.msk.f32.mxu0 %vm8191_vm0, %v8190_v0  ;;  %v8323_v5 = vld [vmem:[#allocation2] sm:$0xff]  ;;  %v8331_v7 = vshrl.u32 %v110_v6, 7  ;;  %s8193_s27 = smov 124   ;;  %s9596_s28 = smov 92   ;;  %vm192_vm2 = vcmask 31744   ;;  %vm268_vm3 = vcmask 64512  }
  0x34   :  { %7303 = vmatpush3.msra.mxu1 %v109_v1  ;;  %s9592_s29 = smov 88   ;;  %s9594_s30 = smov 120   ;;  %vm1541_vm4 = vcmask 97280   ;;  %vm1543_vm5 = vcmask 130048   ;;  %vm1545_vm6 = vcmask 162816   ;;  %vm1547_vm7 = vcmask 195584  }
  0x35   :  { %7304 = vmatprep.subr.mxu1 %v8190_v0  ;;  %v8334_v8 = vsub.s32 0, %v8331_v7  ;;  %s9582_s12 = smov 84   ;;  %s9590_s13 = smov 116   ;;  %vm1549_vm8 = vcmask 228352  }
  0x36   :  { %7305 = vmatpush3.msra.mxu1 %v108_v2  ;;  %s9580_s6 = smov 80   ;;  %s9588_s14 = smov 112  }
  0x37   :  { %7306 = vmatprep.subr.mxu1 %v8190_v0  ;;  %v8340_v10 = vrot.slane %v8336_v9, %v8334_v8  ;;  %s9578_s15 = smov 76   ;;  %s9586_s0 = smov 108  }
  0x38   :  { %7307 = vmatpush3.msra.mxu1 %v107_v3  ;;  %s9576_s16 = smov 72   ;;  %s9584_s17 = smov 104  }
  0x39   :  { %7308 = vmatprep.subr.mxu1 %v8190_v0  ;;  %s9572_s7 = smov 68   ;;  %s9574_s9 = smov 100  }
  0x3a   :  { %7309 = vmatpush3.msra.mxu1 %v106_v4  ;;  %s9557_s18 = smov 64   ;;  %s9555_s19 = smov 56  }
  0x3b   :  { %7311 = vmatmul.mubr.msk.f32.vlgmr.msra.gmra.mxu1 %vm114_vm1, %v8323_v5  ;;  %7313 = vmatprep.subr.mxu1 %v8190_v0  ;;  %s9556_s20 = smov 60   ;;  %s9554_s21 = smov 52  }
  0x3c   :  { %7315 = vmatprep.mubr.msk.f32.mxu1 %vm8191_vm0, %v8190_v0  ;;  %s9550_s24 = smov 48   ;;  %s9553_s25 = smov 44  }
  0x3d   :  { %s9551_s22 = smov 40  }
  0xfb   :  { %v184_v11 = vpop.f32.mrf.mxu1 }
  0xfc   :  { %v8343_v12 = vadd.f32 %v184_v11, %v8340_v10 }
  0xfd   :  { %v7312_v13 = vpop.f32.mrf.mxu1 }
  0xfe   :  { %190 = vrot.lane.b32.xlu0 %v8343_v12, %s9598_s26  ;;  %v188_v14 = vmul.f32 0.5, %v8343_v12 }
 0x100   :  { %356 = vrot.lane.b32.xlu1 %v188_v14, %s8193_s27 }
 0x102   :  { %358 = vrot.lane.b32.xlu0 %v8343_v12, %s9596_s28 }
 0x104   :  { %523 = vrot.lane.b32.xlu1 %v8343_v12, %s9592_s29 }
 0x106   :  { %521 = vrot.lane.b32.xlu0 %v188_v14, %s9594_s30 }
 0x108   :  { %688 = vrot.lane.b32.xlu1 %v8343_v12, %s9582_s12 }
 0x10a   :  { %686 = vrot.lane.b32.xlu0 %v188_v14, %s9590_s13 }
 0x10c   :  { %853 = vrot.lane.b32.xlu1 %v8343_v12, %s9580_s6 }
 0x10e   :  { %851 = vrot.lane.b32.xlu0 %v188_v14, %s9588_s14 }
 0x110   :  { %1018 = vrot.lane.b32.xlu1 %v8343_v12, %s9578_s15 }
 0x112   :  { %1016 = vrot.lane.b32.xlu0 %v188_v14, %s9586_s0 }
 0x114   :  { %1183 = vrot.lane.b32.xlu1 %v8343_v12, %s9576_s16 }
 0x116   :  { %1181 = vrot.lane.b32.xlu0 %v188_v14, %s9584_s17 }
 0x118   :  { %1348 = vrot.lane.b32.xlu1 %v8343_v12, %s9572_s7  ;;  %s9606_s7 = smov 16  }
 0x11a   :  { %1346 = vrot.lane.b32.xlu0 %v188_v14, %s9574_s9  ;;  %s9607_s9 = smov 24  }
 0x11c   :  { %280 = vrot.lane.b32.xlu1 %v8343_v12, %s9557_s18  ;;  %s9568_s18 = smov 20  }
 0x170   :  { %v191_v15 = vpop.permute.xlu0 %190 }
 0x171   :  { %7314 = vmatpush3.xpose.msk.msra.mxu1 %vm192_vm2, %v191_v15 }
 0x172   :  { %v357_v16 = vpop.permute.xlu1 %356  ;;  %7318 = vmatprep.subr.mxu1 %v8190_v0 }
 0x174   :  { %v359_v17 = vpop.permute.xlu0 %358  ;;  %7316 = vmatmul.mubr.msk.f32.vlgmr.msra.gmra.mxu1 %vm192_vm2, %v188_v14 }
 0x175   :  { %7324 = vmatpush3.xpose.msk.msra.mxu0 %vm192_vm2, %v359_v17  ;;  %7320 = vmatprep.mubr.msk.f32.mxu1 %vm8191_vm0, %v8190_v0 }
 0x176   :  { %v524_v18 = vpop.permute.xlu1 %523  ;;  %7333 = vmatprep.subr.mxu0 %v8190_v0 }
 0x178   :  { %v522_v19 = vpop.permute.xlu0 %521  ;;  %7326 = vmatmul.mubr.msk.f32.vlgmr.msra.gmra.mxu0 %vm192_vm2, %v357_v16 }
 0x179   :  { %7334 = vmatpush3.xpose.msk.msra.mxu0 %vm192_vm2, %v524_v18  ;;  %7335 = vmatprep.mubr.msk.f32.mxu0 %vm8191_vm0, %v8190_v0 }
 0x17a   :  { %v689_v20 = vpop.permute.xlu1 %688  ;;  %7343 = vmatprep.subr.mxu0 %v8190_v0 }
 0x17c   :  { %v687_v21 = vpop.permute.xlu0 %686  ;;  %7336 = vmatmul.mubr.msk.f32.vlgmr.msra.gmra.mxu0 %vm192_vm2, %v522_v19 }
 0x17d   :  { %7344 = vmatpush3.xpose.msk.msra.mxu0 %vm192_vm2, %v689_v20  ;;  %7345 = vmatprep.mubr.msk.f32.mxu0 %vm8191_vm0, %v8190_v0 }
 0x17e   :  { %v854_v22 = vpop.permute.xlu1 %853  ;;  %7353 = vmatprep.subr.mxu0 %v8190_v0 }
 0x180   :  { %v852_v23 = vpop.permute.xlu0 %851  ;;  %7346 = vmatmul.mubr.msk.f32.vlgmr.msra.gmra.mxu0 %vm192_vm2, %v687_v21 }
 0x181   :  { %7354 = vmatpush3.xpose.msk.msra.mxu0 %vm192_vm2, %v854_v22  ;;  %7355 = vmatprep.mubr.msk.f32.mxu0 %vm8191_vm0, %v8190_v0 }
 0x182   :  { %v1019_v24 = vpop.permute.xlu1 %1018  ;;  %7363 = vmatprep.subr.mxu0 %v8190_v0 }
 0x184   :  { %v1017_v25 = vpop.permute.xlu0 %1016  ;;  %7356 = vmatmul.mubr.msk.f32.vlgmr.msra.gmra.mxu0 %vm192_vm2, %v852_v23 }
 0x185   :  { %7364 = vmatpush3.xpose.msk.msra.mxu0 %vm192_vm2, %v1019_v24  ;;  %7365 = vmatprep.mubr.msk.f32.mxu0 %vm8191_vm0, %v8190_v0 }
 0x186   :  { %v1184_v26 = vpop.permute.xlu1 %1183  ;;  %7373 = vmatprep.subr.mxu0 %v8190_v0 }
 0x188   :  { %7366 = vmatmul.mubr.msk.f32.vlgmr.msra.gmra.mxu0 %vm192_vm2, %v1017_v25  ;;  %v1182_v27 = vpop.permute.xlu0 %1181 }
 0x189   :  { %7374 = vmatpush3.xpose.msk.msra.mxu0 %vm192_vm2, %v1184_v26  ;;  %7375 = vmatprep.mubr.msk.f32.mxu0 %vm8191_vm0, %v8190_v0 }
 0x18a   :  { %v1349_v28 = vpop.permute.xlu1 %1348  ;;  %7383 = vmatprep.subr.mxu0 %v8190_v0 }
 0x18c   :  { %7376 = vmatmul.mubr.msk.f32.vlgmr.msra.gmra.mxu0 %vm192_vm2, %v1182_v27  ;;  %v1347_v30 = vpop.permute.xlu0 %1346 }
 0x18d   :  { %7384 = vmatpush3.xpose.msk.msra.mxu0 %vm192_vm2, %v1349_v28  ;;  %7385 = vmatprep.mubr.msk.f32.mxu0 %vm8191_vm0, %v8190_v0 }
 0x18e   :  { %v281_v29 = vpop.permute.xlu1 %280 }
 0x18f   :  { %7319 = vmatpush3.msra.mxu1 %v281_v29 }
 0x190   :  { %7386 = vmatmul.mubr.msk.f32.vlgmr.msra.gmra.mxu0 %vm192_vm2, %v1347_v30  ;;  %7328 = vmatprep.subr.mxu1 %v8190_v0 }
 0x234   :  { %v264_v31 = vpop.f32.mrf.mxu1 }
 0x235   :  { %v269_v32 = vsel %vm268_vm3, %v264_v31, -inf }
 0x236   :  { %270 = vmax.xlane.f32.xlu1 %v269_v32  ;;  %v7317_v33 = vpop.f32.mrf.mxu1 }
 0x238   :  { %v430_v34 = vpop.f32.mrf.mxu0 }
 0x239   :  { %v434_v35 = vsel %vm268_vm3, %v430_v34, -inf }
 0x23a   :  { %435 = vmax.xlane.f32.xlu0 %v434_v35  ;;  %v7327_v36 = vpop.f32.mrf.mxu0 }
 0x23c   :  { %v595_v37 = vpop.f32.mrf.mxu0 }
 0x23d   :  { %v599_v38 = vsel %vm268_vm3, %v595_v37, -inf }
 0x23e   :  { %600 = vmax.xlane.f32.xlu0 %v599_v38  ;;  %v7337_v39 = vpop.f32.mrf.mxu0 }
 0x240   :  { %v760_v40 = vpop.f32.mrf.mxu0 }
 0x241   :  { %v764_v41 = vsel %vm268_vm3, %v760_v40, -inf }
 0x242   :  { %v7347_v42 = vpop.f32.mrf.mxu0  ;;  %765 = vmax.xlane.f32.xlu1 %v764_v41 }
 0x244   :  { %v925_v43 = vpop.f32.mrf.mxu0 }
 0x245   :  { %v929_v44 = vsel %vm268_vm3, %v925_v43, -inf }
 0x246   :  { %930 = vmax.xlane.f32.xlu0 %v929_v44  ;;  %v7357_v45 = vpop.f32.mrf.mxu0 }
 0x248   :  { %v1090_v46 = vpop.f32.mrf.mxu0 }
 0x249   :  { %v1094_v47 = vsel %vm268_vm3, %v1090_v46, -inf }
 0x24a   :  { %v7367_v48 = vpop.f32.mrf.mxu0  ;;  %1095 = vmax.xlane.f32.xlu1 %v1094_v47 }
 0x24c   :  { %v1255_v49 = vpop.f32.mrf.mxu0 }
 0x24d   :  { %v1259_v50 = vsel %vm268_vm3, %v1255_v49, -inf }
 0x24e   :  { %1260 = vmax.xlane.f32.xlu0 %v1259_v50  ;;  %v7377_v51 = vpop.f32.mrf.mxu0 }
 0x250   :  { %v1420_v52 = vpop.f32.mrf.mxu0 }
 0x251   :  { %v1424_v54 = vsel %vm268_vm3, %v1420_v52, -inf }
 0x252   :  { %v7387_v53 = vpop.f32.mrf.mxu0 }
 0x25b   :  { %610 = vrot.lane.b32.xlu1 %v8343_v12, %s9555_s19  ;;  %s9564_s19 = smov 16  }
 0x264   :  { %445 = vrot.lane.b32.xlu0 %v8343_v12, %s9556_s20  ;;  %s9562_s20 = smov 24  }
 0x27f   :  { %1425 = vmax.xlane.f32.xlu1 %v1424_v54 }
 0x290   :  { %775 = vrot.lane.b32.xlu1 %v8343_v12, %s9554_s21  ;;  %s9560_s21 = smov 28  }
 0x2bf   :  { %v271_v55 = vpop.xlane.xlu1 %270 }
 0x2c0   :  { %v272_v56 = vsub.f32 %v264_v31, %v271_v55 }
 0x2c2   :  { %v273_v57 = vmul.f32 1.442695, %v272_v56 }
 0x2c3   :  { %v436_v58 = vpop.xlane.xlu0 %435 }
 0x2c4   :  { %7926 = vpow2.f32 %v273_v57  ;;  %v437_v59 = vsub.f32 %v430_v34, %v436_v58 }
 0x2c6   :  { %v438_v60 = vmul.f32 1.442695, %v437_v59 }
 0x2c7   :  { %v601_v61 = vpop.xlane.xlu0 %600 }
 0x2c8   :  { %7928 = vpow2.f32 %v438_v60  ;;  %v602_v62 = vsub.f32 %v595_v37, %v601_v61 }
 0x2ca   :  { %v603_v63 = vmul.f32 1.442695, %v602_v62 }
 0x2cb   :  { %v766_v13 = vpop.xlane.xlu1 %765 }
 0x2cc   :  { %7930 = vpow2.f32 %v603_v63  ;;  %v767_v14 = vsub.f32 %v760_v40, %v766_v13 }
 0x2ce   :  { %v768_v18 = vmul.f32 1.442695, %v767_v14 }
 0x2cf   :  { %v931_v15 = vpop.xlane.xlu0 %930 }
 0x2d0   :  { %v932_v17 = vsub.f32 %v925_v43, %v931_v15  ;;  %7932 = vpow2.f32 %v768_v18 }
 0x2d1   :  { %v7927_v1 = vpop.eup %7926 }
 0x2d2   :  { %v275_v2 = vsel %vm268_vm3, %v7927_v1, 0.0  ;;  %v933_v21 = vmul.f32 1.442695, %v932_v17  ;;  %v98_v17 = vld [vmem:[%s9540_s3 + $0x18] sm:$0xff] }
 0x2d3   :  { %276 = vadd.xlane.f32.xlu0 %v275_v2  ;;  %v1096_v16 = vpop.xlane.xlu1 %1095 }
 0x2d4   :  { %v1097_v19 = vsub.f32 %v1090_v46, %v1096_v16  ;;  %7934 = vpow2.f32 %v933_v21 }
 0x2d5   :  { %v8424_v3 = vpop.eup %7928 }
 0x2d6   :  { %v440_v4 = vsel %vm268_vm3, %v8424_v3, 0.0  ;;  %v1098_v22 = vmul.f32 1.442695, %v1097_v19  ;;  %v97_v19 = vld [vmem:[%s9540_s3 + $0x10] sm:$0xff] }
 0x2d7   :  { %441 = vadd.xlane.f32.xlu1 %v440_v4  ;;  %v1261_v20 = vpop.xlane.xlu0 %1260  ;;  %v611_v25 = vpop.permute.xlu1 %610 }
 0x2d8   :  { %v1262_v23 = vsub.f32 %v1255_v49, %v1261_v20  ;;  %7936 = vpow2.f32 %v1098_v22  ;;  %v96_v20 = vld [vmem:[%s9540_s3 + $0x8] sm:$0xff] }
 0x2d9   :  { %v8428_v6 = vpop.eup %7930 }
 0x2da   :  { %v605_v11 = vsel %vm268_vm3, %v8428_v6, 0.0  ;;  %v1263_v24 = vmul.f32 1.442695, %v1262_v23  ;;  %v95_v23 = vld [vmem:[%s9540_s3] sm:$0xff] }
 0x2db   :  { %606 = vadd.xlane.f32.xlu0 %v605_v11  ;;  %v446_v39 = vpop.permute.xlu0 %445 }
 0x2dc   :  { %7938 = vpow2.f32 %v1263_v24 }
 0x2dd   :  { %v7933_v26 = vpop.eup %7932 }
 0x2de   :  { %v770_v31 = vsel %vm268_vm3, %v7933_v26, 0.0 }
 0x2e1   :  { %v8436_v29 = vpop.eup %7934 }
 0x2e2   :  { %v935_v33 = vsel %vm268_vm3, %v8436_v29, 0.0 }
 0x2e5   :  { %v8439_v32 = vpop.eup %7936 }
 0x2e6   :  { %v1100_v34 = vsel %vm268_vm3, %v8439_v32, 0.0 }
 0x2e8   :  { %940 = vrot.lane.b32.xlu1 %v8343_v12, %s9550_s24  ;;  %s9552_s24 = smov 36  }
 0x2e9   :  { %v8445_v35 = vpop.eup %7938 }
 0x2ea   :  { %v1265_v36 = vsel %vm268_vm3, %v8445_v35, 0.0 }
 0x2f1   :  { %1105 = vrot.lane.b32.xlu0 %v8343_v12, %s9553_s25  ;;  %s9601_s25 = smov 68  }
 0x308   :  { %v1426_v27 = vpop.xlane.xlu1 %1425 }
 0x309   :  { %v1427_v28 = vsub.f32 %v1420_v52, %v1426_v27 }
 0x30b   :  { %v1428_v30 = vmul.f32 1.442695, %v1427_v28 }
 0x30c   :  { %771 = vadd.xlane.f32.xlu1 %v770_v31  ;;  %v776_v40 = vpop.permute.xlu1 %775 }
 0x30d   :  { %7940 = vpow2.f32 %v1428_v30 }
 0x310   :  { %936 = vadd.xlane.f32.xlu0 %v935_v33  ;;  %1101 = vadd.xlane.f32.xlu1 %v1100_v34 }
 0x314   :  { %1266 = vadd.xlane.f32.xlu0 %v1265_v36 }
 0x31a   :  { %v8449_v37 = vpop.eup %7940 }
 0x31b   :  { %v1430_v38 = vsel %vm268_vm3, %v8449_v37, 0.0 }
 0x31c   :  { %1431 = vadd.xlane.f32.xlu0 %v1430_v38 }
 0x321   :  { %1270 = vrot.lane.b32.xlu1 %v8343_v12, %s9551_s22  ;;  %s9558_s22 = smov 4  }
 0x332   :  { %1435 = vrot.lane.b32.xlu0 %v8343_v12, %s9552_s24  ;;  %s9600_s24 = smov 100  }
 0x35c   :  { %v277_v41 = vpop.xlane.xlu0 %276 }
 0x35d   :  { %7942 = vrcp.f32 %v277_v41 }
 0x360   :  { %v442_v42 = vpop.xlane.xlu1 %441 }
 0x361   :  { %7944 = vrcp.f32 %v442_v42 }
 0x364   :  { %v607_v43 = vpop.xlane.xlu0 %606  ;;  %v941_v49 = vpop.permute.xlu1 %940 }
 0x365   :  { %7946 = vrcp.f32 %v607_v43 }
 0x368   :  { %v1106_v50 = vpop.permute.xlu0 %1105 }
 0x36a   :  { %v7943_v44 = vpop.eup %7942 }
 0x36b   :  { %v279_v45 = vmul.f32 %v7943_v44, %v7927_v1 }
 0x36d   :  { %7321 = vmatmul.mubr.msk.f32.vlgmr.msra.gmra.mxu1 %vm268_vm3, %v279_v45  ;;  %v8530_v45 = vld [vmem:[%s9547_s10] sm:$0xff] }
 0x36e   :  { %v7945_v46 = vpop.eup %7944  ;;  %7329 = vmatpush3.msra.mxu1 %v446_v39  ;;  %7330 = vmatprep.mubr.msk.f32.mxu1 %vm8191_vm0, %v8190_v0 }
 0x36f   :  { %7338 = vmatprep.subr.mxu1 %v8190_v0  ;;  %v444_v12 = vmul.f32 %v7945_v46, %v8424_v3  ;;  %v8534_v46 = vrot.slane %v8530_v45, %v8334_v8 }
 0x371   :  { %7331 = vmatmul.mubr.msk.f32.vlgmr.msra.gmra.mxu1 %vm268_vm3, %v444_v12 }
 0x372   :  { %v7947_v47 = vpop.eup %7946  ;;  %7339 = vmatpush3.msra.mxu1 %v611_v25  ;;  %7340 = vmatprep.mubr.msk.f32.mxu1 %vm8191_vm0, %v8190_v0 }
 0x373   :  { %7348 = vmatprep.subr.mxu1 %v8190_v0  ;;  %v609_v48 = vmul.f32 %v7947_v47, %v8428_v6 }
 0x375   :  { %7341 = vmatmul.mubr.msk.f32.vlgmr.msra.gmra.mxu1 %vm268_vm3, %v609_v48 }
 0x376   :  { %7349 = vmatpush3.msra.mxu1 %v776_v40  ;;  %7350 = vmatprep.mubr.msk.f32.mxu1 %vm8191_vm0, %v8190_v0 }
 0x377   :  { %7358 = vmatprep.subr.mxu1 %v8190_v0 }
 0x395   :  { %v772_v51 = vpop.xlane.xlu1 %771 }
 0x396   :  { %7948 = vrcp.f32 %v772_v51 }
 0x399   :  { %v937_v52 = vpop.xlane.xlu0 %936  ;;  %v1102_v53 = vpop.xlane.xlu1 %1101 }
 0x39a   :  { %7950 = vrcp.f32 %v937_v52 }
 0x39b   :  { %7952 = vrcp.f32 %v1102_v53 }
 0x39d   :  { %v1267_v54 = vpop.xlane.xlu0 %1266  ;;  %v1271_v63 = vpop.permute.xlu1 %1270 }
 0x39e   :  { %7954 = vrcp.f32 %v1267_v54 }
 0x3a3   :  { %v7949_v55 = vpop.eup %7948 }
 0x3a4   :  { %v774_v56 = vmul.f32 %v7949_v55, %v7933_v26 }
 0x3a5   :  { %v1432_v57 = vpop.xlane.xlu0 %1431 }
 0x3a6   :  { %7956 = vrcp.f32 %v1432_v57  ;;  %7351 = vmatmul.mubr.msk.f32.vlgmr.msra.gmra.mxu1 %vm268_vm3, %v774_v56  ;;  %v1737_v56 = vld [vmem:[%s9542_s5 + $0x18] sm:$0xff]  ;;  %v1736_v57 = vld [vmem:[%s9542_s5 + $0x10] sm:$0xff] }
 0x3a7   :  { %v7951_v58 = vpop.eup %7950  ;;  %7359 = vmatpush3.msra.mxu1 %v941_v49  ;;  %7360 = vmatprep.mubr.msk.f32.mxu1 %vm8191_vm0, %v8190_v0 }
 0x3a8   :  { %7368 = vmatprep.subr.mxu1 %v8190_v0  ;;  %v939_v59 = vmul.f32 %v7951_v58, %v8436_v29  ;;  %v7953_v60 = vpop.eup %7952  ;;  %7415 = vmatprep.subr.mxu0 %v1737_v56  ;;  %v1735_v58 = vld [vmem:[%s9542_s5 + $0x8] sm:$0xff] }
 0x3a9   :  { %v1104_v61 = vmul.f32 %v7953_v60, %v8439_v32  ;;  %v1436_v2 = vpop.permute.xlu0 %1435  ;;  %7416 = vmatpush3.msra.mxu0 %v1737_v56  ;;  %v1655_v60 = vld [vmem:[%s9541_s4 + $0x10] sm:$0xff] }
 0x3aa   :  { %7361 = vmatmul.mubr.msk.f32.vlgmr.msra.gmra.mxu1 %vm268_vm3, %v939_v59  ;;  %v1656_v59 = vld [vmem:[%s9541_s4 + $0x18] sm:$0xff]  ;;  %7417 = vmatprep.subr.mxu0 %v1736_v57 }
 0x3ab   :  { %7369 = vmatpush3.msra.mxu1 %v1106_v50  ;;  %7370 = vmatprep.mubr.msk.f32.mxu1 %vm8191_vm0, %v8190_v0  ;;  %v7955_v62 = vpop.eup %7954 }
 0x3ac   :  { %7378 = vmatprep.subr.mxu1 %v8190_v0  ;;  %v1269_v1 = vmul.f32 %v7955_v62, %v8445_v35  ;;  %7418 = vmatpush3.msra.mxu0 %v1736_v57  ;;  %v1654_v62 = vld [vmem:[%s9541_s4 + $0x8] sm:$0xff] }
 0x3ad   :  { %7419 = vmatprep.subr.mxu0 %v1735_v58 }
 0x3ae   :  { %7371 = vmatmul.mubr.msk.f32.vlgmr.msra.gmra.mxu1 %vm268_vm3, %v1104_v61  ;;  %v1734_v61 = vld [vmem:[%s9542_s5] sm:$0xff]  ;;  %7420 = vmatpush3.msra.mxu0 %v1735_v58 }
 0x3af   :  { %7379 = vmatpush3.msra.mxu1 %v1271_v63  ;;  %7380 = vmatprep.mubr.msk.f32.mxu1 %vm8191_vm0, %v8190_v0  ;;  %v105_v63 = vld [vmem:[%s9538_s1 + $0x8] sm:$0xff] }
 0x3b0   :  { %7388 = vmatprep.subr.mxu1 %v8190_v0  ;;  %7421 = vmatprep.subr.mxu0 %v1734_v61 }
 0x3b1   :  { %7422 = vmatpush3.msra.mxu0 %v1734_v61 }
 0x3b2   :  { %7381 = vmatmul.mubr.msk.f32.vlgmr.msra.gmra.mxu1 %vm268_vm3, %v1269_v1  ;;  %v1653_v1 = vld [vmem:[%s9541_s4] sm:$0xff]  ;;  %7433 = vmatprep.subr.mxu0 %v8190_v0 }
 0x3b3   :  { %v7957_v3 = vpop.eup %7956  ;;  %7389 = vmatpush3.msra.mxu1 %v1436_v2  ;;  %7390 = vmatprep.mubr.msk.f32.mxu1 %vm8191_vm0, %v8190_v0 }
 0x3b4   :  { %v1434_v4 = vmul.f32 %v7957_v3, %v8449_v37  ;;  %7393 = vmatprep.subr.mxu1 %v8190_v0 }
 0x3b6   :  { %7391 = vmatmul.mubr.msk.f32.vlgmr.msra.gmra.mxu1 %vm268_vm3, %v1434_v4 }
 0x3b7   :  { %7401 = vmatprep.mubr.msk.f32.mxu1 %vm8191_vm0, %v8190_v0  ;;  %7394 = vmatpush3.msra.mxu1 %v98_v17 }
 0x3b8   :  { %7395 = vmatprep.subr.mxu1 %v8190_v0 }
 0x3b9   :  { %7396 = vmatpush3.msra.mxu1 %v97_v19  ;;  %v8596_v19 = vsub.s32 1, %v8331_v7 }
 0x3ba   :  { %7397 = vmatprep.subr.mxu1 %v8190_v0 }
 0x3bb   :  { %7398 = vmatpush3.msra.mxu1 %v96_v20  ;;  %v8600_v20 = vrot.slane %v8336_v9, %v8596_v19  ;;  %v8620_v9 = vrot.slane %v8530_v45, %v8596_v19 }
 0x3bc   :  { %7399 = vmatprep.subr.mxu1 %v8190_v0 }
 0x3bd   :  { %7400 = vmatpush3.msra.mxu1 %v95_v23 }
 0x3be   :  { %7404 = vmatprep.subr.mxu1 %v8190_v0 }
 0x42d   :  { %v352_v6 = vpop.f32.mrf.mxu1 }
 0x42f   :  { %v7322_v11 = vpop.f32.mrf.mxu1 }
 0x430   :  { %v1650_v11 = vsub.s32 5, %v8331_v7 }
 0x431   :  { %v517_v13 = vpop.f32.mrf.mxu1 }
 0x432   :  { %1512 = vrot.lane.b32.xlu1 %v517_v13, %s9558_s22  ;;  %s9570_s22 = smov 12  }
 0x433   :  { %v7332_v14 = vpop.f32.mrf.mxu1 }
 0x435   :  { %v682_v15 = vpop.f32.mrf.mxu1 }
 0x436   :  { %1516 = vrot.lane.b32.xlu0 %v682_v15, %s9566_s23  ;;  %s9602_s23 = smov 4  }
 0x437   :  { %v7342_v16 = vpop.f32.mrf.mxu1 }
 0x438   :  { %v8585_v16 = vrot.slane %v8530_v45, %v1650_v11 }
 0x466   :  { %v847_v18 = vpop.f32.mrf.mxu1 }
 0x467   :  { %1520 = vrot.lane.b32.xlu1 %v847_v18, %s9570_s22  ;;  %s9604_s22 = smov 20  }
 0x468   :  { %v7352_v21 = vpop.f32.mrf.mxu1 }
 0x46a   :  { %v1012_v22 = vpop.f32.mrf.mxu1 }
 0x46b   :  { %1524 = vrot.lane.b32.xlu0 %v1012_v22, %s9564_s19  ;;  %s9603_s19 = smov 12  }
 0x46c   :  { %v7362_v24 = vpop.f32.mrf.mxu1 }
 0x46e   :  { %v1177_v25 = vpop.f32.mrf.mxu1 }
 0x46f   :  { %1528 = vrot.lane.b32.xlu1 %v1177_v25, %s9568_s18  ;;  %s9605_s18 = smov 8  }
 0x470   :  { %v7372_v26 = vpop.f32.mrf.mxu1 }
 0x472   :  { %v1342_v27 = vpop.f32.mrf.mxu1 }
 0x473   :  { %1532 = vrot.lane.b32.xlu0 %v1342_v27, %s9562_s20  ;;  %s9608_s20 = smov 28  }
 0x474   :  { %v7382_v28 = vpop.f32.mrf.mxu1 }
 0x476   :  { %v1507_v29 = vpop.f32.mrf.mxu1 }
 0x477   :  { %1536 = vrot.lane.b32.xlu1 %v1507_v29, %s9560_s21  ;;  %s9609_s21 = smov 64  }
 0x478   :  { %v7392_v30 = vpop.f32.mrf.mxu1 }
 0x4a4   :  { %v1513_v31 = vpop.permute.xlu1 %1512 }
 0x4a5   :  { %v1539_v35 = vsel %vm192_vm2, %v352_v6, %v1513_v31  ;;  %v1645_v6 = vsub.s32 4, %v8331_v7 }
 0x4a7   :  { %v8582_v13 = vrot.slane %v8530_v45, %v1645_v6 }
 0x4a8   :  { %v1517_v32 = vpop.permute.xlu0 %1516 }
 0x4a9   :  { %v1540_v36 = vsel %vm268_vm3, %v1539_v35, %v1517_v32 }
 0x4d9   :  { %v1521_v33 = vpop.permute.xlu1 %1520 }
 0x4da   :  { %v1542_v38 = vsel %vm1541_vm4, %v1540_v36, %v1521_v33 }
 0x4dd   :  { %v1525_v34 = vpop.permute.xlu0 %1524 }
 0x4de   :  { %v1544_v40 = vsel %vm1543_vm5, %v1542_v38, %v1525_v34 }
 0x4e1   :  { %v1529_v37 = vpop.permute.xlu1 %1528 }
 0x4e2   :  { %v1546_v41 = vsel %vm1545_vm6, %v1544_v40, %v1529_v37 }
 0x4e5   :  { %v1533_v39 = vpop.permute.xlu0 %1532 }
 0x4e6   :  { %v1548_v42 = vsel %vm1547_vm7, %v1546_v41, %v1533_v39 }
 0x4e9   :  { %v1537_v43 = vpop.permute.xlu1 %1536 }
 0x4ea   :  { %v1550_v44 = vsel %vm1549_vm8, %v1548_v42, %v1537_v43 }
 0x4eb   :  { %7402 = vmatmul.mubr.msk.f32.vlgmr.msra.gmra.mxu1 %vm114_vm1, %v1550_v44 }
 0x4ec   :  { %7412 = vmatprep.mubr.msk.f32.mxu1 %vm8191_vm0, %v8190_v0  ;;  %7405 = vmatpush3.msra.mxu1 %v1656_v59 }
 0x4ed   :  { %7406 = vmatprep.subr.mxu1 %v8190_v0 }
 0x4ee   :  { %7407 = vmatpush3.msra.mxu1 %v1655_v60 }
 0x4ef   :  { %7408 = vmatprep.subr.mxu1 %v8190_v0 }
 0x4f0   :  { %7409 = vmatpush3.msra.mxu1 %v1654_v62 }
 0x4f1   :  { %7410 = vmatprep.subr.mxu1 %v8190_v0 }
 0x4f2   :  { %7411 = vmatpush3.msra.mxu1 %v1653_v1 }
 0x4f3   :  { %7426 = vmatprep.subr.mxu1 %v8190_v0 }
 0x5ab   :  { %v1624_v12 = vpop.f32.mrf.mxu1 }
 0x5ac   :  { %v1625_v47 = vadd.f32 %v1624_v12, %v8534_v46 }
 0x5ad   :  { %v7403_v48 = vpop.f32.mrf.mxu1 }
 0x5ae   :  { %v1628_v49 = vadd.f32 %v1625_v47, %v8323_v5  ;;  %v104_v5 = vld [vmem:[%s9538_s1] sm:$0xff] }
 0x5af   :  { %7423 = vmatprep.mubr.msk.f32.mxu0 %vm114_vm1, %v104_v5 }
 0x5b0   :  { %v1629_v50 = vsel %vm114_vm1, %v1628_v49, 0.0  ;;  %7424 = vmatmul.mubr.msk.f32.vlgmr.msra.gmra.mxu0 %vm114_vm1, %v105_v63 }
 0x5b1   :  { %1630 = vadd.xlane.f32.xlu0 %v1629_v50  ;;  %7437 = vmatprep.mubr.msk.f32.mxu0 %vm8191_vm0, %v8190_v0 }
 0x63a   :  { %v1631_v51 = vpop.xlane.xlu0 %1630 }
 0x63b   :  { %v1633_v52 = vmul.f32 0.03125, %v1631_v51 }
 0x63d   :  { %v1634_v53 = vsub.f32 %v1628_v49, %v1633_v52 }
 0x63f   :  { %v1635_v54 = vmul.f32 %v1634_v53, %v1634_v53 }
 0x641   :  { %v1636_v55 = vsel %vm114_vm1, %v1635_v54, 0.0 }
 0x642   :  { %1637 = vadd.xlane.f32.xlu1 %v1636_v55 }
 0x670   :  { %v7425_v21 = vpop.f32.mrf.mxu0 }
 0x671   :  { %v8603_v22 = vadd.f32 %v7425_v21, %v8600_v20 }
 0x672   :  { %v1814_v23 = vpop.f32.mrf.mxu0 }
 0x673   :  { %1997 = vrot.lane.b32.xlu0 %v8603_v22, %s8193_s27  ;;  %v8610_v24 = vadd.f32 %v1814_v23, %v8600_v20 }
 0x675   :  { %1995 = vrot.lane.b32.xlu1 %v8610_v24, %s8193_s27 }
 0x6cb   :  { %v1638_v2 = vpop.xlane.xlu1 %1637 }
 0x6cc   :  { %v1639_v3 = vmul.f32 0.03125, %v1638_v2 }
 0x6ce   :  { %v1640_v4 = vadd.f32 1e-05, %v1639_v3 }
 0x6d0   :  { %7958 = vrsqrt.f32 %v1640_v4 }
 0x6dd   :  { %v7959_v14 = vpop.eup %7958 }
 0x6de   :  { %v1642_v15 = vmul.f32 %v7959_v14, %v1634_v53 }
 0x6e0   :  { %v1647_v17 = vmul.f32 %v8582_v13, %v1642_v15 }
 0x6e2   :  { %v8589_v18 = vadd.f32 %v8585_v16, %v1647_v17 }
 0x6e4   :  { %7413 = vmatmul.mubr.msk.f32.vlgmr.msra.gmra.mxu1 %vm114_vm1, %v8589_v18 }
 0x6e5   :  { %7430 = vmatprep.mubr.msk.f32.mxu1 %vm8191_vm0, %v8190_v0  ;;  %7427 = vmatpush3.xpose.msk.msra.mxu1 %vm192_vm2, %v8603_v22  ;;  %v1998_v29 = vpop.permute.xlu0 %1997 }
 0x6e6   :  { %7428 = vmatprep.subr.mxu1 %v8190_v0 }
 0x6e7   :  { %v1996_v30 = vpop.permute.xlu1 %1995 }
 0x6e9   :  { %7429 = vmatpush3.xpose.msk.msra.mxu1 %vm192_vm2, %v8610_v24 }
 0x6ea   :  { %7440 = vmatprep.subr.mxu1 %v8190_v0 }
 0x7a4   :  { %v1730_v25 = vpop.f32.mrf.mxu1 }
 0x7a5   :  { %v1731_v26 = vadd.f32 %v1730_v25, %v8620_v9 }
 0x7a6   :  { %v7414_v27 = vpop.f32.mrf.mxu1 }
 0x7a7   :  { %v8623_v28 = vmul.f32 0.5, %v1731_v26 }
 0x7a9   :  { %1993 = vrot.lane.b32.xlu0 %v8623_v28, %s8193_s27  ;;  %7431 = vmatmul.mubr.msk.f32.vlgmr.msra.gmra.mxu1 %vm192_vm2, %v8623_v28 }
 0x7aa   :  { %7441 = vmatpush3.xpose.msk.msra.mxu1 %vm192_vm2, %v1998_v29  ;;  %7444 = vmatprep.mubr.msk.f32.mxu1 %vm8191_vm0, %v8190_v0 }
 0x7ab   :  { %7442 = vmatprep.subr.mxu1 %v8190_v0 }
 0x7ae   :  { %7443 = vmatpush3.xpose.msk.msra.mxu1 %vm192_vm2, %v1996_v30 }
 0x7af   :  { %7461 = vmatprep.subr.mxu1 %v8190_v0 }
 0x81b   :  { %v1994_v31 = vpop.permute.xlu0 %1993 }
 0x81c   :  { %7445 = vmatmul.mubr.msk.f32.vlgmr.msra.gmra.mxu1 %vm192_vm2, %v1994_v31 }
 0x81d   :  { %7465 = vmatprep.mubr.msk.f32.mxu1 %vm8191_vm0, %v8190_v0 }
 0x869   :  { %v1899_v32 = vpop.f32.mrf.mxu1 }
 0x86a   :  { %v1903_v33 = vsel %vm1543_vm5, %v1899_v32, -inf }
 0x86b   :  { %1904 = vmax.xlane.f32.xlu1 %v1903_v33  ;;  %v7432_v34 = vpop.f32.mrf.mxu1 }
 0x87c   :  { %1914 = vrot.lane.b32.xlu1 %v8610_v24, %s9598_s26 }
 0x880   :  { %2088 = vrot.lane.b32.xlu1 %v8603_v22, %s9596_s28 }
 0x884   :  { %2169 = vrot.lane.b32.xlu1 %v8603_v22, %s9594_s30 }
 0x8dc   :  { %v2071_v35 = vpop.f32.mrf.mxu1 }
 0x8dd   :  { %v2075_v36 = vsel %vm1543_vm5, %v2071_v35, -inf }
 0x8de   :  { %2076 = vmax.xlane.f32.xlu0 %v2075_v36  ;;  %v7446_v37 = vpop.f32.mrf.mxu1 }
 0x8f4   :  { %1916 = vrot.lane.b32.xlu0 %v8603_v22, %s9598_s26  ;;  %v1905_v38 = vpop.xlane.xlu1 %1904 }
 0x8f5   :  { %v1906_v39 = vsub.f32 %v1899_v32, %v1905_v38 }
 0x8f7   :  { %v1907_v40 = vmul.f32 1.442695, %v1906_v39 }
 0x8f8   :  { %v1915_v48 = vpop.permute.xlu1 %1914 }
 0x8f9   :  { %7960 = vpow2.f32 %v1907_v40 }
 0x8fc   :  { %v2089_v54 = vpop.permute.xlu1 %2088 }
 0x900   :  { %v2170_v56 = vpop.permute.xlu1 %2169 }
 0x906   :  { %v7961_v41 = vpop.eup %7960 }
 0x907   :  { %v1909_v42 = vsel %vm1543_vm5, %v7961_v41, 0.0 }
 0x913   :  { %1910 = vadd.xlane.f32.xlu0 %v1909_v42 }
 0x929   :  { %2086 = vrot.lane.b32.xlu0 %v8610_v24, %s9596_s28 }
 0x92d   :  { %2167 = vrot.lane.b32.xlu0 %v8610_v24, %s9594_s30 }
 0x967   :  { %v2077_v43 = vpop.xlane.xlu0 %2076 }
 0x968   :  { %v2078_v44 = vsub.f32 %v2071_v35, %v2077_v43 }
 0x96a   :  { %v2079_v12 = vmul.f32 1.442695, %v2078_v44 }
 0x96b   :  { %v1917_v47 = vpop.permute.xlu0 %1916 }
 0x96c   :  { %7962 = vpow2.f32 %v2079_v12  ;;  %7434 = vmatpush3.msra.mxu0 %v1917_v47 }
 0x96d   :  { %7435 = vmatprep.subr.mxu0 %v8190_v0 }
 0x96e   :  { %7436 = vmatpush3.msra.mxu0 %v1915_v48 }
 0x96f   :  { %7447 = vmatprep.subr.mxu0 %v8190_v0 }
 0x979   :  { %v7963_v49 = vpop.eup %7962 }
 0x97a   :  { %v2081_v50 = vsel %vm1543_vm5, %v7963_v49, 0.0 }
 0x97b   :  { %2082 = vadd.xlane.f32.xlu1 %v2081_v50 }
 0x98c   :  { %2165 = vrot.lane.b32.xlu1 %v8623_v28, %s9594_s30 }
 0x990   :  { %2258 = vrot.lane.b32.xlu1 %v8610_v24, %s9592_s29 }
 0x99c   :  { %v1911_v51 = vpop.xlane.xlu0 %1910 }
 0x99d   :  { %7964 = vrcp.f32 %v1911_v51 }
 0x9a0   :  { %v2087_v55 = vpop.permute.xlu0 %2086 }
 0x9a4   :  { %v2168_v59 = vpop.permute.xlu0 %2167 }
 0x9aa   :  { %v7965_v52 = vpop.eup %7964 }
 0x9ab   :  { %v1913_v53 = vmul.f32 %v7965_v52, %v7961_v41 }
 0x9ad   :  { %7438 = vmatmul.mubr.msk.f32.vlgmr.msra.gmra.mxu0 %vm1543_vm5, %v1913_v53 }
 0x9ae   :  { %7448 = vmatpush3.msra.mxu0 %v2089_v54  ;;  %7451 = vmatprep.mubr.msk.f32.mxu0 %vm8191_vm0, %v8190_v0 }
 0x9af   :  { %7449 = vmatprep.subr.mxu0 %v8190_v0 }
 0x9b0   :  { %7450 = vmatpush3.msra.mxu0 %v2087_v55 }
 0x9b1   :  { %7454 = vmatprep.subr.mxu0 %v8190_v0 }
 0xa04   :  { %v2083_v57 = vpop.xlane.xlu1 %2082 }
 0xa05   :  { %7966 = vrcp.f32 %v2083_v57 }
 0xa08   :  { %v2166_v60 = vpop.permute.xlu1 %2165 }
 0xa0c   :  { %v2259_v17 = vpop.permute.xlu1 %2258 }
 0xa12   :  { %v7967_v5 = vpop.eup %7966 }
 0xa13   :  { %v2085_v58 = vmul.f32 %v7967_v5, %v7963_v49 }
 0xa15   :  { %7452 = vmatmul.mubr.msk.f32.vlgmr.msra.gmra.mxu0 %vm1543_vm5, %v2085_v58 }
 0xa16   :  { %7455 = vmatpush3.xpose.msk.msra.mxu0 %vm192_vm2, %v2170_v56  ;;  %7458 = vmatprep.mubr.msk.f32.mxu0 %vm8191_vm0, %v8190_v0 }
 0xa17   :  { %7456 = vmatprep.subr.mxu0 %v8190_v0 }
 0xa1a   :  { %7457 = vmatpush3.xpose.msk.msra.mxu0 %vm192_vm2, %v2168_v59 }
 0xa1b   :  { %7475 = vmatprep.subr.mxu0 %v8190_v0 }
 0xa1d   :  { %7459 = vmatmul.mubr.msk.f32.vlgmr.msra.gmra.mxu0 %vm192_vm2, %v2166_v60 }
 0xa1e   :  { %7479 = vmatprep.mubr.msk.f32.mxu0 %vm8191_vm0, %v8190_v0 }
 0xa6d   :  { %v8675_v61 = vpop.f32.mrf.mxu0 }
 0xa6f   :  { %v7439_v62 = vpop.f32.mrf.mxu0 }
 0xad5   :  { %v8677_v63 = vpop.f32.mrf.mxu0 }
 0xad7   :  { %v7453_v1 = vpop.f32.mrf.mxu0 }
 0xadd   :  { %v2243_v2 = vpop.f32.mrf.mxu0 }
 0xade   :  { %v2247_v3 = vsel %vm1543_vm5, %v2243_v2, -inf }
 0xadf   :  { %2248 = vmax.xlane.f32.xlu0 %v2247_v3  ;;  %v7460_v4 = vpop.f32.mrf.mxu0 }
 0xaf5   :  { %2260 = vrot.lane.b32.xlu0 %v8603_v22, %s9592_s29 }
 0xaf9   :  { %2341 = vrot.lane.b32.xlu0 %v8603_v22, %s9590_s13 }
 0xafd   :  { %2337 = vrot.lane.b32.xlu0 %v8623_v28, %s9590_s13 }
 0xb68   :  { %v2249_v6 = vpop.xlane.xlu0 %2248 }
 0xb69   :  { %v2250_v11 = vsub.f32 %v2243_v2, %v2249_v6 }
 0xb6b   :  { %v2251_v14 = vmul.f32 1.442695, %v2250_v11 }
 0xb6c   :  { %v2261_v15 = vpop.permute.xlu0 %2260 }
 0xb6d   :  { %7968 = vpow2.f32 %v2251_v14  ;;  %7462 = vmatpush3.msra.mxu1 %v2261_v15 }
 0xb6e   :  { %7463 = vmatprep.subr.mxu1 %v8190_v0 }
 0xb6f   :  { %7464 = vmatpush3.msra.mxu1 %v2259_v17 }
 0xb70   :  { %7468 = vmatprep.subr.mxu1 %v8190_v0  ;;  %v2342_v29 = vpop.permute.xlu0 %2341 }
 0xb74   :  { %v2338_v31 = vpop.permute.xlu0 %2337 }
 0xb7a   :  { %v7969_v21 = vpop.eup %7968 }
 0xb7b   :  { %v2253_v23 = vsel %vm1543_vm5, %v7969_v21, 0.0 }
 0xb7c   :  { %2254 = vadd.xlane.f32.xlu1 %v2253_v23 }
 0xb8d   :  { %2339 = vrot.lane.b32.xlu1 %v8610_v24, %s9590_s13 }
 0xc05   :  { %v2255_v25 = vpop.xlane.xlu1 %2254 }
 0xc06   :  { %7970 = vrcp.f32 %v2255_v25 }
 0xc09   :  { %v2340_v30 = vpop.permute.xlu1 %2339 }
 0xc13   :  { %v7971_v26 = vpop.eup %7970 }
 0xc14   :  { %v2257_v27 = vmul.f32 %v7971_v26, %v7969_v21 }
 0xc16   :  { %7466 = vmatmul.mubr.msk.f32.vlgmr.msra.gmra.mxu1 %vm1543_vm5, %v2257_v27 }
 0xc17   :  { %7469 = vmatpush3.xpose.msk.msra.mxu1 %vm192_vm2, %v2342_v29  ;;  %7472 = vmatprep.mubr.msk.f32.mxu1 %vm8191_vm0, %v8190_v0 }
 0xc18   :  { %7470 = vmatprep.subr.mxu1 %v8190_v0 }
 0xc1b   :  { %7471 = vmatpush3.xpose.msk.msra.mxu1 %vm192_vm2, %v2340_v30 }
 0xc1c   :  { %7489 = vmatprep.subr.mxu1 %v8190_v0 }
 0xc1e   :  { %7473 = vmatmul.mubr.msk.f32.vlgmr.msra.gmra.mxu1 %vm192_vm2, %v2338_v31 }
 0xc1f   :  { %7493 = vmatprep.mubr.msk.f32.mxu1 %vm8191_vm0, %v8190_v0 }
 0xcd6   :  { %v8701_v32 = vpop.f32.mrf.mxu1 }
 0xcd8   :  { %v7467_v33 = vpop.f32.mrf.mxu1 }
 0xcde   :  { %v2415_v34 = vpop.f32.mrf.mxu1 }
 0xcdf   :  { %v2419_v35 = vsel %vm1543_vm5, %v2415_v34, -inf }
 0xce0   :  { %2420 = vmax.xlane.f32.xlu1 %v2419_v35  ;;  %v7474_v36 = vpop.f32.mrf.mxu1 }
 0xcf1   :  { %2430 = vrot.lane.b32.xlu1 %v8610_v24, %s9582_s12 }
 0xcf5   :  { %2513 = vrot.lane.b32.xlu1 %v8603_v22, %s9588_s14 }
 0xcf9   :  { %2509 = vrot.lane.b32.xlu1 %v8623_v28, %s9588_s14 }
 0xcfd   :  { %2602 = vrot.lane.b32.xlu1 %v8610_v24, %s9580_s6 }
 0xd69   :  { %v2421_v37 = vpop.xlane.xlu1 %2420 }
 0xd6a   :  { %v2422_v38 = vsub.f32 %v2415_v34, %v2421_v37 }
 0xd6c   :  { %v2423_v39 = vmul.f32 1.442695, %v2422_v38 }
 0xd6d   :  { %v2431_v44 = vpop.permute.xlu1 %2430 }
 0xd6e   :  { %7972 = vpow2.f32 %v2423_v39 }
 0xd71   :  { %v2514_v48 = vpop.permute.xlu1 %2513 }
 0xd75   :  { %v2510_v50 = vpop.permute.xlu1 %2509 }
 0xd79   :  { %v2603_v59 = vpop.permute.xlu1 %2602 }
 0xd7b   :  { %v7973_v40 = vpop.eup %7972 }
 0xd7c   :  { %v2425_v41 = vsel %vm1543_vm5, %v7973_v40, 0.0 }
 0xd7d   :  { %2426 = vadd.xlane.f32.xlu0 %v2425_v41 }
 0xd93   :  { %2432 = vrot.lane.b32.xlu0 %v8603_v22, %s9582_s12  ;;  %s9613_s12 = smov 104  }
 0xd97   :  { %2511 = vrot.lane.b32.xlu0 %v8610_v24, %s9588_s14  ;;  %s9616_s14 = smov 76  }
 0xe06   :  { %v2427_v42 = vpop.xlane.xlu0 %2426 }
 0xe07   :  { %7974 = vrcp.f32 %v2427_v42 }
 0xe0a   :  { %v2433_v43 = vpop.permute.xlu0 %2432 }
 0xe0b   :  { %7476 = vmatpush3.msra.mxu0 %v2433_v43 }
 0xe0c   :  { %7477 = vmatprep.subr.mxu0 %v8190_v0 }
 0xe0d   :  { %7478 = vmatpush3.msra.mxu0 %v2431_v44 }
 0xe0e   :  { %7482 = vmatprep.subr.mxu0 %v8190_v0  ;;  %v2512_v49 = vpop.permute.xlu0 %2511 }
 0xe14   :  { %v7975_v12 = vpop.eup %7974 }
 0xe15   :  { %v2429_v47 = vmul.f32 %v7975_v12, %v7973_v40 }
 0xe17   :  { %7480 = vmatmul.mubr.msk.f32.vlgmr.msra.gmra.mxu0 %vm1543_vm5, %v2429_v47 }
 0xe18   :  { %7483 = vmatpush3.xpose.msk.msra.mxu0 %vm192_vm2, %v2514_v48  ;;  %7486 = vmatprep.mubr.msk.f32.mxu0 %vm8191_vm0, %v8190_v0 }
 0xe19   :  { %7484 = vmatprep.subr.mxu0 %v8190_v0 }
 0xe1c   :  { %7485 = vmatpush3.xpose.msk.msra.mxu0 %vm192_vm2, %v2512_v49 }
 0xe1d   :  { %7503 = vmatprep.subr.mxu0 %v8190_v0 }
 0xe1f   :  { %7487 = vmatmul.mubr.msk.f32.vlgmr.msra.gmra.mxu0 %vm192_vm2, %v2510_v50 }
 0xe20   :  { %7507 = vmatprep.mubr.msk.f32.mxu0 %vm8191_vm0, %v8190_v0 }
 0xed7   :  { %v8729_v51 = vpop.f32.mrf.mxu0 }
 0xed9   :  { %v7481_v52 = vpop.f32.mrf.mxu0 }
 0xedf   :  { %v2587_v53 = vpop.f32.mrf.mxu0 }
 0xee0   :  { %v2591_v54 = vsel %vm1543_vm5, %v2587_v53, -inf }
 0xee1   :  { %2592 = vmax.xlane.f32.xlu0 %v2591_v54  ;;  %v7488_v55 = vpop.f32.mrf.mxu0 }
 0xef7   :  { %2604 = vrot.lane.b32.xlu0 %v8603_v22, %s9580_s6  ;;  %s9611_s6 = smov 112  }
 0xefb   :  { %2685 = vrot.lane.b32.xlu0 %v8603_v22, %s9586_s0 }
 0xeff   :  { %2681 = vrot.lane.b32.xlu0 %v8623_v28, %s9586_s0 }
 0xf6a   :  { %v2593_v56 = vpop.xlane.xlu0 %2592 }
 0xf6b   :  { %v2594_v57 = vsub.f32 %v2587_v53, %v2593_v56 }
 0xf6d   :  { %v2595_v5 = vmul.f32 1.442695, %v2594_v57 }
 0xf6e   :  { %v2605_v58 = vpop.permute.xlu0 %2604 }
 0xf6f   :  { %7976 = vpow2.f32 %v2595_v5  ;;  %7490 = vmatpush3.msra.mxu1 %v2605_v58 }
 0xf70   :  { %7491 = vmatprep.subr.mxu1 %v8190_v0 }
 0xf71   :  { %7492 = vmatpush3.msra.mxu1 %v2603_v59 }
 0xf72   :  { %7496 = vmatprep.subr.mxu1 %v8190_v0  ;;  %v2686_v4 = vpop.permute.xlu0 %2685 }
 0xf76   :  { %v2682_v11 = vpop.permute.xlu0 %2681 }
 0xf7c   :  { %v7977_v60 = vpop.eup %7976 }
 0xf7d   :  { %v2597_v62 = vsel %vm1543_vm5, %v7977_v60, 0.0 }
 0xf7e   :  { %2598 = vadd.xlane.f32.xlu1 %v2597_v62 }
 0xf8f   :  { %2683 = vrot.lane.b32.xlu1 %v8610_v24, %s9586_s0  ;;  %s9617_s0 = smov 72  }
0x1007   :  { %v2599_v1 = vpop.xlane.xlu1 %2598 }
0x1008   :  { %7978 = vrcp.f32 %v2599_v1 }
0x100b   :  { %v2684_v6 = vpop.permute.xlu1 %2683 }
0x1015   :  { %v7979_v2 = vpop.eup %7978 }
0x1016   :  { %v2601_v3 = vmul.f32 %v7979_v2, %v7977_v60 }
0x1018   :  { %7494 = vmatmul.mubr.msk.f32.vlgmr.msra.gmra.mxu1 %vm1543_vm5, %v2601_v3 }
0x1019   :  { %7497 = vmatpush3.xpose.msk.msra.mxu1 %vm192_vm2, %v2686_v4  ;;  %7500 = vmatprep.mubr.msk.f32.mxu1 %vm8191_vm0, %v8190_v0 }
0x101a   :  { %7498 = vmatprep.subr.mxu1 %v8190_v0 }
0x101d   :  { %7499 = vmatpush3.xpose.msk.msra.mxu1 %vm192_vm2, %v2684_v6 }
0x101e   :  { %7517 = vmatprep.subr.mxu1 %v8190_v0 }
0x1020   :  { %7501 = vmatmul.mubr.msk.f32.vlgmr.msra.gmra.mxu1 %vm192_vm2, %v2682_v11 }
0x1021   :  { %7521 = vmatprep.mubr.msk.f32.mxu1 %vm8191_vm0, %v8190_v0 }
0x10d8   :  { %v8753_v14 = vpop.f32.mrf.mxu1 }
0x10da   :  { %v7495_v15 = vpop.f32.mrf.mxu1 }
0x10e0   :  { %v2759_v17 = vpop.f32.mrf.mxu1 }
0x10e1   :  { %v2763_v21 = vsel %vm1543_vm5, %v2759_v17, -inf }
0x10e2   :  { %2764 = vmax.xlane.f32.xlu1 %v2763_v21  ;;  %v7502_v23 = vpop.f32.mrf.mxu1  ;;  %v99_v21 = vld [vmem:[#allocation5] sm:$0xff] }
0x10f3   :  { %2774 = vrot.lane.b32.xlu1 %v8610_v24, %s9578_s15 }
0x10f7   :  { %2857 = vrot.lane.b32.xlu1 %v8603_v22, %s9584_s17 }
0x10fb   :  { %2853 = vrot.lane.b32.xlu1 %v8623_v28, %s9584_s17 }
0x10ff   :  { %2946 = vrot.lane.b32.xlu1 %v8610_v24, %s9576_s16 }
0x116b   :  { %v2765_v25 = vpop.xlane.xlu1 %2764 }
0x116c   :  { %v2766_v26 = vsub.f32 %v2759_v17, %v2765_v25  ;;  %v100_v17 = vld [vmem:[#allocation5 + $0x8] sm:$0xff] }
0x116e   :  { %v2767_v27 = vmul.f32 1.442695, %v2766_v26 }
0x116f   :  { %v2775_v34 = vpop.permute.xlu1 %2774 }
0x1170   :  { %7980 = vpow2.f32 %v2767_v27 }
0x1173   :  { %v2858_v37 = vpop.permute.xlu1 %2857 }
0x1177   :  { %v2854_v39 = vpop.permute.xlu1 %2853 }
0x117b   :  { %v2947_v50 = vpop.permute.xlu1 %2946 }
0x117d   :  { %v7981_v29 = vpop.eup %7980 }
0x117e   :  { %v2769_v30 = vsel %vm1543_vm5, %v7981_v29, 0.0 }
0x117f   :  { %2770 = vadd.xlane.f32.xlu0 %v2769_v30 }
0x1195   :  { %2776 = vrot.lane.b32.xlu0 %v8603_v22, %s9578_s15  ;;  %s9612_s15 = smov 108  }
0x1199   :  { %2855 = vrot.lane.b32.xlu0 %v8610_v24, %s9584_s17  ;;  %s9615_s17 = smov 80  }
0x1208   :  { %v2771_v31 = vpop.xlane.xlu0 %2770 }
0x1209   :  { %7982 = vrcp.f32 %v2771_v31 }
0x120c   :  { %v2777_v33 = vpop.permute.xlu0 %2776 }
0x120d   :  { %7504 = vmatpush3.msra.mxu0 %v2777_v33 }
0x120e   :  { %7505 = vmatprep.subr.mxu0 %v8190_v0 }
0x120f   :  { %7506 = vmatpush3.msra.mxu0 %v2775_v34 }
0x1210   :  { %7510 = vmatprep.subr.mxu0 %v8190_v0  ;;  %v2856_v38 = vpop.permute.xlu0 %2855 }
0x1216   :  { %v7983_v35 = vpop.eup %7982 }
0x1217   :  { %v2773_v36 = vmul.f32 %v7983_v35, %v7981_v29 }
0x1219   :  { %7508 = vmatmul.mubr.msk.f32.vlgmr.msra.gmra.mxu0 %vm1543_vm5, %v2773_v36 }
0x121a   :  { %7511 = vmatpush3.xpose.msk.msra.mxu0 %vm192_vm2, %v2858_v37  ;;  %7514 = vmatprep.mubr.msk.f32.mxu0 %vm8191_vm0, %v8190_v0 }
0x121b   :  { %7512 = vmatprep.subr.mxu0 %v8190_v0 }
0x121e   :  { %7513 = vmatpush3.xpose.msk.msra.mxu0 %vm192_vm2, %v2856_v38 }
0x121f   :  { %7531 = vmatprep.subr.mxu0 %v8190_v0 }
0x1221   :  { %7515 = vmatmul.mubr.msk.f32.vlgmr.msra.gmra.mxu0 %vm192_vm2, %v2854_v39 }
0x1222   :  { %7535 = vmatprep.mubr.msk.f32.mxu0 %vm8191_vm0, %v8190_v0 }
0x12d9   :  { %v2849_v40 = vpop.f32.mrf.mxu0 }
0x12db   :  { %v7509_v41 = vpop.f32.mrf.mxu0 }
0x12e1   :  { %v2931_v42 = vpop.f32.mrf.mxu0 }
0x12e2   :  { %v2935_v43 = vsel %vm1543_vm5, %v2931_v42, -inf }
0x12e3   :  { %2936 = vmax.xlane.f32.xlu0 %v2935_v43  ;;  %v7516_v44 = vpop.f32.mrf.mxu0 }
0x12f9   :  { %2948 = vrot.lane.b32.xlu0 %v8603_v22, %s9576_s16  ;;  %s9610_s16 = smov 60  }
0x12fd   :  { %3029 = vrot.lane.b32.xlu0 %v8603_v22, %s9600_s24 }
0x1301   :  { %3025 = vrot.lane.b32.xlu0 %v8623_v28, %s9600_s24 }
0x136c   :  { %v2937_v12 = vpop.xlane.xlu0 %2936 }
0x136d   :  { %v2938_v47 = vsub.f32 %v2931_v42, %v2937_v12 }
0x136f   :  { %v2939_v48 = vmul.f32 1.442695, %v2938_v47 }
0x1370   :  { %v2949_v49 = vpop.permute.xlu0 %2948 }
0x1371   :  { %7984 = vpow2.f32 %v2939_v48  ;;  %7518 = vmatpush3.msra.mxu1 %v2949_v49 }
0x1372   :  { %7519 = vmatprep.subr.mxu1 %v8190_v0 }
0x1373   :  { %7520 = vmatpush3.msra.mxu1 %v2947_v50 }
0x1374   :  { %7524 = vmatprep.subr.mxu1 %v8190_v0  ;;  %v3030_v56 = vpop.permute.xlu0 %3029 }
0x1378   :  { %v3026_v5 = vpop.permute.xlu0 %3025 }
0x137e   :  { %v7985_v52 = vpop.eup %7984 }
0x137f   :  { %v2941_v53 = vsel %vm1543_vm5, %v7985_v52, 0.0 }
0x1380   :  { %2942 = vadd.xlane.f32.xlu1 %v2941_v53 }
0x1391   :  { %3027 = vrot.lane.b32.xlu1 %v8610_v24, %s9600_s24 }
0x1409   :  { %v2943_v28 = vpop.xlane.xlu1 %2942 }
0x140a   :  { %7986 = vrcp.f32 %v2943_v28 }
0x140d   :  { %v3028_v57 = vpop.permute.xlu1 %3027 }
0x1417   :  { %v7987_v54 = vpop.eup %7986 }
0x1418   :  { %v2945_v55 = vmul.f32 %v7987_v54, %v7985_v52  ;;  %v3336_v54 = vld [vmem:[#allocation7 + $0x18] sm:$0xff] }
0x141a   :  { %7522 = vmatmul.mubr.msk.f32.vlgmr.msra.gmra.mxu1 %vm1543_vm5, %v2945_v55  ;;  %v3335_v55 = vld [vmem:[#allocation7 + $0x10] sm:$0xff] }
0x141b   :  { %7525 = vmatpush3.xpose.msk.msra.mxu1 %vm192_vm2, %v3030_v56  ;;  %7528 = vmatprep.mubr.msk.f32.mxu1 %vm8191_vm0, %v8190_v0  ;;  %v3334_v56 = vld [vmem:[#allocation7 + $0x8] sm:$0xff] }
0x141c   :  { %7526 = vmatprep.subr.mxu1 %v8190_v0 }
0x141f   :  { %7527 = vmatpush3.xpose.msk.msra.mxu1 %vm192_vm2, %v3028_v57  ;;  %v3430_v57 = vld [vmem:[%s9545_s8 + $0x78] sm:$0xff] }
0x1420   :  { %7549 = vmatprep.subr.mxu1 %v8190_v0 }
0x1422   :  { %7529 = vmatmul.mubr.msk.f32.vlgmr.msra.gmra.mxu1 %vm192_vm2, %v3026_v5  ;;  %v3429_v5 = vld [vmem:[%s9545_s8 + $0x70] sm:$0xff] }
0x1423   :  { %7557 = vmatprep.mubr.msk.f32.mxu1 %vm8191_vm0, %v8190_v0  ;;  %7550 = vmatpush3.msra.mxu1 %v3336_v54 }
0x1424   :  { %7551 = vmatprep.subr.mxu1 %v8190_v0 }
0x1425   :  { %7552 = vmatpush3.msra.mxu1 %v3335_v55 }
0x1426   :  { %7553 = vmatprep.subr.mxu1 %v8190_v0 }
0x1427   :  { %7554 = vmatpush3.msra.mxu1 %v3334_v56 }
0x1428   :  { %7555 = vmatprep.subr.mxu1 %v8190_v0 }
0x14da   :  { %v3021_v58 = vpop.f32.mrf.mxu1 }
0x14dc   :  { %v7523_v59 = vpop.f32.mrf.mxu1 }
0x14dd   :  { %v3427_v59 = vld [vmem:[%s9545_s8 + $0x60] sm:$0xff] }
0x14e2   :  { %v3103_v60 = vpop.f32.mrf.mxu1 }
0x14e3   :  { %v3107_v62 = vsel %vm1543_vm5, %v3103_v60, -inf }
0x14e4   :  { %3108 = vmax.xlane.f32.xlu1 %v3107_v62  ;;  %v7530_v1 = vpop.f32.mrf.mxu1  ;;  %v3425_v62 = vld [vmem:[%s9545_s8 + $0x50] sm:$0xff] }
0x14e5   :  { %v3424_v1 = vld [vmem:[%s9545_s8 + $0x48] sm:$0xff] }
0x14f5   :  { %3118 = vrot.lane.b32.xlu1 %v8610_v24, %s9601_s25 }
0x14f9   :  { %3198 = vrot.lane.b32.xlu1 %v8677_v63, %s9602_s23 }
0x14fd   :  { %3206 = vrot.lane.b32.xlu1 %v8729_v51, %s9603_s19 }
0x1501   :  { %3214 = vrot.lane.b32.xlu1 %v2849_v40, %s9604_s22 }
0x156d   :  { %v3109_v2 = vpop.xlane.xlu1 %3108 }
0x156e   :  { %v3110_v3 = vsub.f32 %v3103_v60, %v3109_v2  ;;  %v3426_v60 = vld [vmem:[%s9545_s8 + $0x58] sm:$0xff]  ;;  %v3423_v2 = vld [vmem:[%s9545_s8 + $0x40] sm:$0xff] }
0x1570   :  { %v3111_v4 = vmul.f32 1.442695, %v3110_v3  ;;  %v3422_v3 = vld [vmem:[%s9545_s8 + $0x38] sm:$0xff] }
0x1571   :  { %v3119_v51 = vpop.permute.xlu1 %3118 }
0x1572   :  { %7988 = vpow2.f32 %v3111_v4  ;;  %v3421_v4 = vld [vmem:[%s9545_s8 + $0x30] sm:$0xff] }
0x1575   :  { %v3199_v26 = vpop.permute.xlu1 %3198 }
0x1576   :  { %v3225_v30 = vsel %vm192_vm2, %v8675_v61, %v3199_v26  ;;  %v3234_v61 = vsub.s32 2, %v8331_v7 }
0x1578   :  { %v8844_v42 = vrot.slane %v8530_v45, %v3234_v61 }
0x1579   :  { %v3207_v29 = vpop.permute.xlu1 %3206 }
0x157d   :  { %v3215_v35 = vpop.permute.xlu1 %3214 }
0x157f   :  { %v7989_v6 = vpop.eup %7988 }
0x1580   :  { %v3113_v11 = vsel %vm1543_vm5, %v7989_v6, 0.0 }
0x1581   :  { %3114 = vadd.xlane.f32.xlu0 %v3113_v11  ;;  %v3419_v11 = vld [vmem:[%s9545_s8 + $0x20] sm:$0xff] }
0x1597   :  { %3120 = vrot.lane.b32.xlu0 %v8603_v22, %s9601_s25 }
0x159b   :  { %3202 = vrot.lane.b32.xlu0 %v8701_v32, %s9605_s18  ;;  %v102_v32 = vld [vmem:[#allocation5 + $0x18] sm:$0xff] }
0x159f   :  { %3210 = vrot.lane.b32.xlu0 %v8753_v14, %s9606_s7  ;;  %v101_v14 = vld [vmem:[#allocation5 + $0x10] sm:$0xff] }
0x15a3   :  { %3218 = vrot.lane.b32.xlu0 %v3021_v58, %s9607_s9  ;;  %v3428_v58 = vld [vmem:[%s9545_s8 + $0x68] sm:$0xff] }
0x160a   :  { %v3115_v24 = vpop.xlane.xlu0 %3114 }
0x160b   :  { %7990 = vrcp.f32 %v3115_v24  ;;  %v3418_v24 = vld [vmem:[%s9545_s8 + $0x18] sm:$0xff] }
0x160e   :  { %v3121_v63 = vpop.permute.xlu0 %3120 }
0x160f   :  { %7532 = vmatpush3.msra.mxu0 %v3121_v63 }
0x1610   :  { %7533 = vmatprep.subr.mxu0 %v8190_v0 }
0x1611   :  { %7534 = vmatpush3.msra.mxu0 %v3119_v51 }
0x1612   :  { %7538 = vmatprep.subr.mxu0 %v8190_v0  ;;  %v3203_v27 = vpop.permute.xlu0 %3202 }
0x1613   :  { %v3226_v33 = vsel %vm268_vm3, %v3225_v30, %v3203_v27  ;;  %v3538_v27 = vld [vmem:[%s9539_s2 + $0x18] sm:$0xff]  ;;  %v3535_v30 = vld [vmem:[%s9539_s2] sm:$0xff] }
0x1614   :  { %v3227_v34 = vsel %vm1541_vm4, %v3226_v33, %v3207_v29  ;;  %v3537_v29 = vld [vmem:[%s9539_s2 + $0x10] sm:$0xff] }
0x1615   :  { %v3417_v33 = vld [vmem:[%s9545_s8 + $0x10] sm:$0xff] }
0x1616   :  { %v3211_v31 = vpop.permute.xlu0 %3210 }
0x1617   :  { %v3228_v36 = vsel %vm1543_vm5, %v3227_v34, %v3211_v31  ;;  %v8941_v31 = vld [vmem:[#allocation2 + $0x8] sm:$0xff] }
0x1618   :  { %v7991_v15 = vpop.eup %7990  ;;  %v3229_v38 = vsel %vm1545_vm6, %v3228_v36, %v3215_v35  ;;  %v3416_v34 = vld [vmem:[%s9545_s8 + $0x8] sm:$0xff]  ;;  %v3415_v35 = vld [vmem:[%s9545_s8] sm:$0xff]  ;;  %v8066_v36 = vld [vmem:[#allocation8] sm:$0x7] }
0x1619   :  { %v3117_v22 = vmul.f32 %v7991_v15, %v7989_v6  ;;  %v3420_v6 = vld [vmem:[%s9545_s8 + $0x28] sm:$0xff] }
0x161a   :  { %v3219_v37 = vpop.permute.xlu0 %3218 }
0x161b   :  { %7536 = vmatmul.mubr.msk.f32.vlgmr.msra.gmra.mxu0 %vm1543_vm5, %v3117_v22  ;;  %v3230_v39 = vsel %vm1547_vm7, %v3229_v38, %v3219_v37  ;;  %v3325_v22 = vsub.s32 6, %v8331_v7  ;;  %v8963_v37 = vrot.slane %v8066_v36, %v3234_v61 }
0x161c   :  { %7546 = vmatprep.mubr.msk.f32.mxu0 %vm8191_vm0, %v8190_v0  ;;  %7539 = vmatpush3.msra.mxu0 %v102_v32  ;;  %v3330_v32 = vsub.s32 7, %v8331_v7 }
0x161d   :  { %7540 = vmatprep.subr.mxu0 %v8190_v0 }
0x161e   :  { %7541 = vmatpush3.msra.mxu0 %v101_v14  ;;  %v8913_v14 = vrot.slane %v8530_v45, %v3325_v22 }
0x161f   :  { %7542 = vmatprep.subr.mxu0 %v8190_v0 }
0x1620   :  { %7543 = vmatpush3.msra.mxu0 %v100_v17 }
0x1621   :  { %7544 = vmatprep.subr.mxu0 %v8190_v0 }
0x1622   :  { %7545 = vmatpush3.msra.mxu0 %v99_v21 }
0x1623   :  { %7560 = vmatprep.subr.mxu0 %v8190_v0 }
0x16db   :  { %v3193_v23 = vpop.f32.mrf.mxu0 }
0x16dc   :  { %3222 = vrot.lane.b32.xlu1 %v3193_v23, %s9608_s20  ;;  %v8917_v23 = vrot.slane %v8530_v45, %v3330_v32  ;;  %v3536_v45 = vld [vmem:[%s9539_s2 + $0x8] sm:$0xff]  ;;  %s9614_s2 = smov 84  }
0x16dd   :  { %v7537_v25 = vpop.f32.mrf.mxu0 }
0x174e   :  { %v3223_v40 = vpop.permute.xlu1 %3222 }
0x174f   :  { %v3231_v41 = vsel %vm1549_vm8, %v3230_v39, %v3223_v40 }
0x1750   :  { %7547 = vmatmul.mubr.msk.f32.vlgmr.msra.gmra.mxu0 %vm114_vm1, %v3231_v41 }
0x1751   :  { %7592 = vmatprep.mubr.msk.f32.mxu0 %vm8191_vm0, %v8190_v0  ;;  %7561 = vmatpush3.msra.mxu0 %v3430_v57 }
0x1752   :  { %7562 = vmatprep.subr.mxu0 %v8190_v0 }
0x1753   :  { %7563 = vmatpush3.msra.mxu0 %v3429_v5 }
0x1754   :  { %7564 = vmatprep.subr.mxu0 %v8190_v0 }
0x1755   :  { %7565 = vmatpush3.msra.mxu0 %v3428_v58 }
0x1756   :  { %7566 = vmatprep.subr.mxu0 %v8190_v0 }
0x1757   :  { %7567 = vmatpush3.msra.mxu0 %v3427_v59 }
0x1758   :  { %7568 = vmatprep.subr.mxu0 %v8190_v0 }
0x1759   :  { %7569 = vmatpush3.msra.mxu0 %v3426_v60 }
0x175a   :  { %7570 = vmatprep.subr.mxu0 %v8190_v0 }
0x175b   :  { %7571 = vmatpush3.msra.mxu0 %v3425_v62 }
0x175c   :  { %7572 = vmatprep.subr.mxu0 %v8190_v0 }
0x175d   :  { %7573 = vmatpush3.msra.mxu0 %v3424_v1 }
0x175e   :  { %7574 = vmatprep.subr.mxu0 %v8190_v0 }
0x175f   :  { %7575 = vmatpush3.msra.mxu0 %v3423_v2 }
0x1760   :  { %7576 = vmatprep.subr.mxu0 %v8190_v0 }
0x1761   :  { %7577 = vmatpush3.msra.mxu0 %v3422_v3 }
0x1762   :  { %7578 = vmatprep.subr.mxu0 %v8190_v0 }
0x1763   :  { %7579 = vmatpush3.msra.mxu0 %v3421_v4 }
0x1764   :  { %7580 = vmatprep.subr.mxu0 %v8190_v0 }
0x1765   :  { %7581 = vmatpush3.msra.mxu0 %v3420_v6 }
0x1766   :  { %7582 = vmatprep.subr.mxu0 %v8190_v0 }
0x1767   :  { %7583 = vmatpush3.msra.mxu0 %v3419_v11 }
0x1768   :  { %7584 = vmatprep.subr.mxu0 %v8190_v0 }
0x1769   :  { %7585 = vmatpush3.msra.mxu0 %v3418_v24 }
0x176a   :  { %7586 = vmatprep.subr.mxu0 %v8190_v0 }
0x176b   :  { %7587 = vmatpush3.msra.mxu0 %v3417_v33 }
0x176c   :  { %7588 = vmatprep.subr.mxu0 %v8190_v0 }
0x176d   :  { %7589 = vmatpush3.msra.mxu0 %v3416_v34 }
0x176e   :  { %7590 = vmatprep.subr.mxu0 %v8190_v0 }
0x176f   :  { %7591 = vmatpush3.msra.mxu0 %v3415_v35 }
0x1770   :  { %7636 = vmatprep.subr.mxu0 %v8190_v0 }
0x1810   :  { %v3305_v43 = vpop.f32.mrf.mxu0 }
0x1811   :  { %v3306_v44 = vadd.f32 %v3305_v43, %v8844_v42 }
0x1812   :  { %v7548_v12 = vpop.f32.mrf.mxu0 }
0x1813   :  { %v3309_v47 = vadd.f32 %v3306_v44, %v8589_v18  ;;  %v3333_v18 = vld [vmem:[#allocation7] sm:$0xff] }
0x1814   :  { %7556 = vmatpush3.msra.mxu1 %v3333_v18 }
0x1815   :  { %v3310_v48 = vsel %vm114_vm1, %v3309_v47, 0.0  ;;  %7595 = vmatprep.subr.mxu1 %v8190_v0 }
0x1816   :  { %3311 = vadd.xlane.f32.xlu0 %v3310_v48 }
0x189f   :  { %v3312_v49 = vpop.xlane.xlu0 %3311 }
0x18a0   :  { %v3313_v50 = vmul.f32 0.03125, %v3312_v49 }
0x18a2   :  { %v8849_v52 = vsub.f32 %v3309_v47, %v3313_v50 }
0x18a4   :  { %v3315_v53 = vmul.f32 %v8849_v52, %v8849_v52 }
0x18a6   :  { %v3316_v28 = vsel %vm114_vm1, %v3315_v53, 0.0 }
0x18a7   :  { %3317 = vadd.xlane.f32.xlu1 %v3316_v28 }
0x1930   :  { %v3318_v63 = vpop.xlane.xlu1 %3317 }
0x1931   :  { %v3319_v51 = vmul.f32 0.03125, %v3318_v63 }
0x1933   :  { %v3320_v15 = vadd.f32 1e-05, %v3319_v51 }
0x1935   :  { %7992 = vrsqrt.f32 %v3320_v15 }
0x1942   :  { %v7993_v17 = vpop.eup %7992 }
0x1943   :  { %v3322_v21 = vmul.f32 %v7993_v17, %v8849_v52 }
0x1945   :  { %v3327_v25 = vmul.f32 %v8913_v14, %v3322_v21 }
0x1947   :  { %v8921_v26 = vadd.f32 %v8917_v23, %v3327_v25 }
0x1949   :  { %7558 = vmatmul.mubr.msk.f32.vlgmr.msra.gmra.mxu1 %vm114_vm1, %v8921_v26 }
0x194a   :  { %7596 = vmatpush3.msra.mxu1 %v3538_v27  ;;  %7603 = vmatprep.mubr.msk.f32.mxu1 %vm8191_vm0, %v8190_v0 }
0x194b   :  { %7597 = vmatprep.subr.mxu1 %v8190_v0 }
0x194c   :  { %7598 = vmatpush3.msra.mxu1 %v3537_v29 }
0x194d   :  { %7599 = vmatprep.subr.mxu1 %v8190_v0 }
0x194e   :  { %7600 = vmatpush3.msra.mxu1 %v3536_v45 }
0x194f   :  { %7601 = vmatprep.subr.mxu1 %v8190_v0 }
0x1950   :  { %7602 = vmatpush3.msra.mxu1 %v3535_v30 }
0x1951   :  { %7604 = vmatmul.mubr.msk.f32.vlgmr.msra.gmra.mxu1 %vm114_vm1, %v8941_v31  ;;  %7606 = vmatprep.subr.mxu1 %v8190_v0 }
0x1952   :  { %7608 = vmatprep.mubr.msk.f32.mxu1 %vm8191_vm0, %v8190_v0 }
0x1a09   :  { %v3410_v38 = vpop.f32.mrf.mxu1 }
0x1a0a   :  { %v3411_v39 = vadd.f32 %v3410_v38, %v8963_v37 }
0x1a0b   :  { %v7559_v40 = vpop.f32.mrf.mxu1 }
0x1a0c   :  { %v3414_v41 = vmax.f32 %v3411_v39, 0.0  ;;  %v8067_v40 = vld [vmem:[%s9540_s3 + $0x18] sm:$0xff] }
0x1a0e   :  { %7593 = vmatmul.mubr.f32.vlgmr.msra.gmra.mxu0 %v3414_v41  ;;  %v8068_v41 = vld [vmem:[%s9540_s3 + $0x10] sm:$0xff] }
0x1a0f   :  { %7638 = vmatprep.mubr.msk.f32.mxu0 %vm8191_vm0, %v8190_v0 }
0x1a11   :  { %v3608_v43 = vpop.f32.mrf.mxu1 }
0x1a12   :  { %v8969_v44 = vadd.f32 %v3608_v43, %v8340_v10  ;;  %v8069_v43 = vld [vmem:[%s9540_s3 + $0x8] sm:$0xff] }
0x1a13   :  { %v7605_v12 = vpop.f32.mrf.mxu1 }
0x1a14   :  { %3614 = vrot.lane.b32.xlu0 %v8969_v44, %s9598_s26  ;;  %v3612_v61 = vmul.f32 0.5, %v8969_v44  ;;  %v8070_v12 = vld [vmem:[%s9540_s3] sm:$0xff]  ;;  %s9618_s3 = smov 56  }
0x1a18   :  { %3780 = vrot.lane.b32.xlu0 %v8969_v44, %s9596_s28  ;;  %s9619_s28 = smov 52  }
0x1a1c   :  { %3778 = vrot.lane.b32.xlu0 %v3612_v61, %s8193_s27 }
0x1a86   :  { %v3615_v47 = vpop.permute.xlu0 %3614 }
0x1a87   :  { %7607 = vmatpush3.xpose.msk.msra.mxu1 %vm192_vm2, %v3615_v47 }
0x1a88   :  { %7611 = vmatprep.subr.mxu1 %v8190_v0 }
0x1a8a   :  { %7609 = vmatmul.mubr.msk.f32.vlgmr.msra.gmra.mxu1 %vm192_vm2, %v3612_v61  ;;  %v3781_v58 = vpop.permute.xlu0 %3780 }
0x1a8b   :  { %7613 = vmatprep.mubr.msk.f32.mxu1 %vm8191_vm0, %v8190_v0 }
0x1a8e   :  { %v3779_v60 = vpop.permute.xlu0 %3778 }
0x1ace   :  { %v8982_v10 = vpop.f32.mrf.mxu0 }
0x1ad0   :  { %v7594_v48 = vpop.f32.mrf.mxu0 }
0x1b4a   :  { %v3687_v49 = vpop.f32.mrf.mxu1 }
0x1b4b   :  { %v3691_v50 = vsel %vm268_vm3, %v3687_v49, -inf }
0x1b4c   :  { %3692 = vmax.xlane.f32.xlu1 %v3691_v50  ;;  %v7610_v52 = vpop.f32.mrf.mxu1 }
0x1bd5   :  { %v3693_v53 = vpop.xlane.xlu1 %3692 }
0x1bd6   :  { %v3694_v28 = vsub.f32 %v3687_v49, %v3693_v53 }
0x1bd8   :  { %v3695_v54 = vmul.f32 1.442695, %v3694_v28 }
0x1bda   :  { %7994 = vpow2.f32 %v3695_v54 }
0x1be7   :  { %v7995_v55 = vpop.eup %7994 }
0x1be8   :  { %v3697_v56 = vsel %vm268_vm3, %v7995_v55, 0.0 }
0x1be9   :  { %3698 = vadd.xlane.f32.xlu1 %v3697_v56 }
0x1bfa   :  { %3702 = vrot.lane.b32.xlu1 %v8969_v44, %s9609_s21  ;;  %s9623_s21 = smov 40  }
0x1bfe   :  { %3945 = vrot.lane.b32.xlu1 %v8969_v44, %s9592_s29  ;;  %s9620_s29 = smov 44  }
0x1c72   :  { %v3699_v18 = vpop.xlane.xlu1 %3698 }
0x1c73   :  { %7996 = vrcp.f32 %v3699_v18 }
0x1c76   :  { %v3703_v57 = vpop.permute.xlu1 %3702 }
0x1c77   :  { %7612 = vmatpush3.msra.mxu1 %v3703_v57 }
0x1c78   :  { %7616 = vmatprep.subr.mxu1 %v8190_v0 }
0x1c7a   :  { %v3946_v32 = vpop.permute.xlu1 %3945 }
0x1c80   :  { %v7997_v5 = vpop.eup %7996 }
0x1c81   :  { %v3701_v59 = vmul.f32 %v7997_v5, %v7995_v55 }
0x1c83   :  { %7614 = vmatmul.mubr.msk.f32.vlgmr.msra.gmra.mxu1 %vm268_vm3, %v3701_v59 }
0x1c84   :  { %7617 = vmatpush3.xpose.msk.msra.mxu1 %vm192_vm2, %v3781_v58  ;;  %7618 = vmatprep.mubr.msk.f32.mxu1 %vm8191_vm0, %v8190_v0 }
0x1c85   :  { %7621 = vmatprep.subr.mxu1 %v8190_v0 }
0x1c87   :  { %7619 = vmatmul.mubr.msk.f32.vlgmr.msra.gmra.mxu1 %vm192_vm2, %v3779_v60 }
0x1c88   :  { %7623 = vmatprep.mubr.msk.f32.mxu1 %vm8191_vm0, %v8190_v0 }
0x1d43   :  { %v8999_v62 = vpop.f32.mrf.mxu1 }
0x1d45   :  { %v7615_v1 = vpop.f32.mrf.mxu1 }
0x1d47   :  { %v3852_v2 = vpop.f32.mrf.mxu1 }
0x1d48   :  { %v3856_v3 = vsel %vm268_vm3, %v3852_v2, -inf }
0x1d49   :  { %3857 = vmax.xlane.f32.xlu0 %v3856_v3  ;;  %v7620_v4 = vpop.f32.mrf.mxu1 }
0x1d5f   :  { %3867 = vrot.lane.b32.xlu0 %v8969_v44, %s9610_s16 }
0x1d63   :  { %3943 = vrot.lane.b32.xlu0 %v3612_v61, %s9594_s30  ;;  %s9621_s30 = smov 48  }
0x1d67   :  { %4108 = vrot.lane.b32.xlu0 %v3612_v61, %s9590_s13  ;;  %s9622_s13 = smov 36  }
0x1d6b   :  { %4273 = vrot.lane.b32.xlu0 %v3612_v61, %s9611_s6 }
0x1d6f   :  { %4438 = vrot.lane.b32.xlu0 %v3612_v61, %s9612_s15 }
0x1d73   :  { %4603 = vrot.lane.b32.xlu0 %v3612_v61, %s9613_s12 }
0x1d77   :  { %4768 = vrot.lane.b32.xlu0 %v3612_v61, %s9600_s24 }
0x1dd2   :  { %v3858_v6 = vpop.xlane.xlu0 %3857 }
0x1dd3   :  { %v3859_v11 = vsub.f32 %v3852_v2, %v3858_v6 }
0x1dd5   :  { %v3860_v24 = vmul.f32 1.442695, %v3859_v11 }
0x1dd6   :  { %v3868_v63 = vpop.permute.xlu0 %3867 }
0x1dd7   :  { %7998 = vpow2.f32 %v3860_v24  ;;  %7622 = vmatpush3.msra.mxu1 %v3868_v63 }
0x1dd8   :  { %7626 = vmatprep.subr.mxu1 %v8190_v0 }
0x1dda   :  { %v3944_v22 = vpop.permute.xlu0 %3943 }
0x1dde   :  { %v4109_v17 = vpop.permute.xlu0 %4108 }
0x1de2   :  { %v4274_v27 = vpop.permute.xlu0 %4273 }
0x1de4   :  { %v7999_v51 = vpop.eup %7998 }
0x1de5   :  { %v3862_v15 = vsel %vm268_vm3, %v7999_v51, 0.0 }
0x1de6   :  { %3863 = vadd.xlane.f32.xlu1 %v3862_v15  ;;  %v4439_v45 = vpop.permute.xlu0 %4438 }
0x1dea   :  { %v4604_v36 = vpop.permute.xlu0 %4603 }
0x1dee   :  { %v4769_v39 = vpop.permute.xlu0 %4768 }
0x1df7   :  { %4110 = vrot.lane.b32.xlu1 %v8969_v44, %s9614_s2 }
0x1dfb   :  { %4275 = vrot.lane.b32.xlu1 %v8969_v44, %s9615_s17 }
0x1dff   :  { %4440 = vrot.lane.b32.xlu1 %v8969_v44, %s9616_s14 }
0x1e03   :  { %4605 = vrot.lane.b32.xlu1 %v8969_v44, %s9617_s0 }
0x1e07   :  { %4770 = vrot.lane.b32.xlu1 %v8969_v44, %s9601_s25 }
0x1e6f   :  { %v3864_v21 = vpop.xlane.xlu1 %3863 }
0x1e70   :  { %8000 = vrcp.f32 %v3864_v21 }
0x1e73   :  { %v4111_v25 = vpop.permute.xlu1 %4110 }
0x1e74   :  { %7637 = vmatpush3.xpose.msk.msra.mxu0 %vm192_vm2, %v4111_v25 }
0x1e75   :  { %7646 = vmatprep.subr.mxu0 %v8190_v0 }
0x1e77   :  { %v4276_v29 = vpop.permute.xlu1 %4275  ;;  %7639 = vmatmul.mubr.msk.f32.vlgmr.msra.gmra.mxu0 %vm192_vm2, %v4109_v17 }
0x1e78   :  { %7647 = vmatpush3.xpose.msk.msra.mxu0 %vm192_vm2, %v4276_v29  ;;  %7648 = vmatprep.mubr.msk.f32.mxu0 %vm8191_vm0, %v8190_v0 }
0x1e79   :  { %7656 = vmatprep.subr.mxu0 %v8190_v0 }
0x1e7b   :  { %v4441_v30 = vpop.permute.xlu1 %4440  ;;  %7649 = vmatmul.mubr.msk.f32.vlgmr.msra.gmra.mxu0 %vm192_vm2, %v4274_v27 }
0x1e7c   :  { %7657 = vmatpush3.xpose.msk.msra.mxu0 %vm192_vm2, %v4441_v30  ;;  %7658 = vmatprep.mubr.msk.f32.mxu0 %vm8191_vm0, %v8190_v0 }
0x1e7d   :  { %v8001_v33 = vpop.eup %8000  ;;  %7666 = vmatprep.subr.mxu0 %v8190_v0 }
0x1e7e   :  { %v3866_v34 = vmul.f32 %v8001_v33, %v7999_v51 }
0x1e7f   :  { %v4606_v35 = vpop.permute.xlu1 %4605  ;;  %7659 = vmatmul.mubr.msk.f32.vlgmr.msra.gmra.mxu0 %vm192_vm2, %v4439_v45 }
0x1e80   :  { %7624 = vmatmul.mubr.msk.f32.vlgmr.msra.gmra.mxu1 %vm268_vm3, %v3866_v34  ;;  %7667 = vmatpush3.xpose.msk.msra.mxu0 %vm192_vm2, %v4606_v35 }
0x1e81   :  { %7627 = vmatpush3.xpose.msk.msra.mxu1 %vm192_vm2, %v3946_v32  ;;  %7668 = vmatprep.mubr.msk.f32.mxu0 %vm8191_vm0, %v8190_v0 }
0x1e82   :  { %7628 = vmatprep.mubr.msk.f32.mxu1 %vm8191_vm0, %v8190_v0  ;;  %7676 = vmatprep.subr.mxu0 %v8190_v0 }
0x1e83   :  { %v4771_v38 = vpop.permute.xlu1 %4770  ;;  %7669 = vmatmul.mubr.msk.f32.vlgmr.msra.gmra.mxu0 %vm192_vm2, %v4604_v36  ;;  %7631 = vmatprep.subr.mxu1 %v8190_v0 }
0x1e84   :  { %7629 = vmatmul.mubr.msk.f32.vlgmr.msra.gmra.mxu1 %vm192_vm2, %v3944_v22  ;;  %7677 = vmatpush3.xpose.msk.msra.mxu0 %vm192_vm2, %v4771_v38 }
0x1e85   :  { %7678 = vmatprep.mubr.msk.f32.mxu0 %vm8191_vm0, %v8190_v0  ;;  %7633 = vmatprep.mubr.msk.f32.mxu1 %vm8191_vm0, %v8190_v0 }
0x1e86   :  { %7686 = vmatprep.subr.mxu0 %v8190_v0 }
0x1e87   :  { %7679 = vmatmul.mubr.msk.f32.vlgmr.msra.gmra.mxu0 %vm192_vm2, %v4769_v39 }
0x1e88   :  { %7687 = vmatpush3.msra.mxu0 %v8067_v40  ;;  %7694 = vmatprep.mubr.msk.f32.mxu0 %vm8191_vm0, %v8190_v0 }
0x1e89   :  { %7688 = vmatprep.subr.mxu0 %v8190_v0 }
0x1e8a   :  { %7689 = vmatpush3.msra.mxu0 %v8068_v41 }
0x1e8b   :  { %7690 = vmatprep.subr.mxu0 %v8190_v0 }
0x1e8c   :  { %7691 = vmatpush3.msra.mxu0 %v8069_v43 }
0x1e8d   :  { %7692 = vmatprep.subr.mxu0 %v8190_v0 }
0x1e8e   :  { %7693 = vmatpush3.msra.mxu0 %v8070_v12 }
0x1f37   :  { %v4182_v61 = vpop.f32.mrf.mxu0 }
0x1f38   :  { %v4186_v47 = vsel %vm268_vm3, %v4182_v61, -inf }
0x1f39   :  { %4187 = vmax.xlane.f32.xlu0 %v4186_v47  ;;  %v7640_v48 = vpop.f32.mrf.mxu0 }
0x1f3b   :  { %v4347_v49 = vpop.f32.mrf.mxu0 }
0x1f3c   :  { %v4351_v50 = vsel %vm268_vm3, %v4347_v49, -inf }
0x1f3d   :  { %4352 = vmax.xlane.f32.xlu0 %v4351_v50  ;;  %v7650_v52 = vpop.f32.mrf.mxu0 }
0x1f3f   :  { %v4512_v53 = vpop.f32.mrf.mxu0 }
0x1f40   :  { %v9072_v28 = vpop.f32.mrf.mxu1  ;;  %v4516_v2 = vsel %vm268_vm3, %v4512_v53, -inf }
0x1f41   :  { %v7660_v54 = vpop.f32.mrf.mxu0 }
0x1f42   :  { %v7625_v55 = vpop.f32.mrf.mxu1 }
0x1f43   :  { %v4677_v56 = vpop.f32.mrf.mxu0 }
0x1f44   :  { %v4017_v18 = vpop.f32.mrf.mxu1  ;;  %v4681_v57 = vsel %vm268_vm3, %v4677_v56, -inf }
0x1f45   :  { %4682 = vmax.xlane.f32.xlu0 %v4681_v57  ;;  %v7670_v5 = vpop.f32.mrf.mxu0  ;;  %v4021_v58 = vsel %vm268_vm3, %v4017_v18, -inf }
0x1f46   :  { %4022 = vmax.xlane.f32.xlu1 %v4021_v58  ;;  %v7630_v59 = vpop.f32.mrf.mxu1 }
0x1f47   :  { %v4842_v60 = vpop.f32.mrf.mxu0 }
0x1f48   :  { %v4846_v3 = vsel %vm268_vm3, %v4842_v60, -inf }
0x1f49   :  { %v7680_v1 = vpop.f32.mrf.mxu0 }
0x1f4a   :  { %4517 = vmax.xlane.f32.xlu1 %v4516_v2 }
0x1f4e   :  { %4847 = vmax.xlane.f32.xlu1 %v4846_v3 }
0x1fc2   :  { %v4188_v4 = vpop.xlane.xlu0 %4187 }
0x1fc3   :  { %v4189_v6 = vsub.f32 %v4182_v61, %v4188_v4 }
0x1fc5   :  { %v4190_v11 = vmul.f32 1.442695, %v4189_v6 }
0x1fc6   :  { %v4353_v24 = vpop.xlane.xlu0 %4352 }
0x1fc7   :  { %8002 = vpow2.f32 %v4190_v11  ;;  %v4354_v63 = vsub.f32 %v4347_v49, %v4353_v24 }
0x1fc9   :  { %v4355_v51 = vmul.f32 1.442695, %v4354_v63 }
0x1fcb   :  { %8004 = vpow2.f32 %v4355_v51 }
0x1fce   :  { %v4683_v15 = vpop.xlane.xlu0 %4682 }
0x1fcf   :  { %v4684_v22 = vsub.f32 %v4677_v56, %v4683_v15  ;;  %v4023_v32 = vpop.xlane.xlu1 %4022 }
0x1fd0   :  { %v4024_v17 = vsub.f32 %v4017_v18, %v4023_v32 }
0x1fd1   :  { %v4685_v21 = vmul.f32 1.442695, %v4684_v22 }
0x1fd2   :  { %v4025_v25 = vmul.f32 1.442695, %v4024_v17 }
0x1fd3   :  { %8006 = vpow2.f32 %v4685_v21  ;;  %v4518_v27 = vpop.xlane.xlu1 %4517 }
0x1fd4   :  { %v8003_v29 = vpop.eup %8002  ;;  %v4519_v45 = vsub.f32 %v4512_v53, %v4518_v27  ;;  %8008 = vpow2.f32 %v4025_v25 }
0x1fd5   :  { %v4192_v30 = vsel %vm268_vm3, %v8003_v29, 0.0 }
0x1fd6   :  { %v4520_v33 = vmul.f32 1.442695, %v4519_v45  ;;  %4193 = vadd.xlane.f32.xlu1 %v4192_v30 }
0x1fd7   :  { %v4848_v34 = vpop.xlane.xlu1 %4847 }
0x1fd8   :  { %v8005_v35 = vpop.eup %8004  ;;  %8010 = vpow2.f32 %v4520_v33  ;;  %v4849_v36 = vsub.f32 %v4842_v60, %v4848_v34 }
0x1fd9   :  { %v4357_v38 = vsel %vm268_vm3, %v8005_v35, 0.0 }
0x1fda   :  { %v4850_v39 = vmul.f32 1.442695, %v4849_v36  ;;  %4358 = vadd.xlane.f32.xlu0 %v4357_v38 }
0x1fdc   :  { %8012 = vpow2.f32 %v4850_v39 }
0x1fe0   :  { %v9080_v40 = vpop.eup %8006 }
0x1fe1   :  { %v4687_v41 = vsel %vm268_vm3, %v9080_v40, 0.0  ;;  %v8009_v43 = vpop.eup %8008 }
0x1fe2   :  { %4688 = vadd.xlane.f32.xlu0 %v4687_v41  ;;  %v4027_v61 = vsel %vm268_vm3, %v8009_v43, 0.0 }
0x1fe5   :  { %v8011_v12 = vpop.eup %8010 }
0x1fe6   :  { %4028 = vadd.xlane.f32.xlu0 %v4027_v61  ;;  %v4522_v47 = vsel %vm268_vm3, %v8011_v12, 0.0 }
0x1fe7   :  { %4523 = vadd.xlane.f32.xlu1 %v4522_v47 }
0x1fe9   :  { %v8013_v48 = vpop.eup %8012 }
0x1fea   :  { %v4852_v49 = vsel %vm268_vm3, %v8013_v48, 0.0 }
0x1feb   :  { %4853 = vadd.xlane.f32.xlu1 %v4852_v49 }
0x1ffc   :  { %4032 = vrot.lane.b32.xlu0 %v8969_v44, %s9618_s3  ;;  %4197 = vrot.lane.b32.xlu1 %v8969_v44, %s9619_s28  ;;  %s9626_s28 = smov 120  }
0x2000   :  { %4527 = vrot.lane.b32.xlu0 %v8969_v44, %s9620_s29  ;;  %4362 = vrot.lane.b32.xlu1 %v8969_v44, %s9621_s30  ;;  %s9627_s29 = smov 88   ;;  %s9628_s30 = smov 116  }
0x2004   :  { %4857 = vrot.lane.b32.xlu0 %v8969_v44, %s9622_s13  ;;  %4692 = vrot.lane.b32.xlu1 %v8969_v44, %s9623_s21 }
0x2008   :  { %4934 = vrot.lane.b32.xlu1 %v9072_v28, %s9602_s23 }
0x205f   :  { %v4194_v53 = vpop.xlane.xlu1 %4193 }
0x2063   :  { %v4359_v50 = vpop.xlane.xlu0 %4358 }
0x206b   :  { %v4689_v52 = vpop.xlane.xlu0 %4688 }
0x206f   :  { %v4029_v54 = vpop.xlane.xlu0 %4028 }
0x2070   :  { %8014 = vrcp.f32 %v4029_v54  ;;  %v4524_v55 = vpop.xlane.xlu1 %4523 }
0x2071   :  { %8016 = vrcp.f32 %v4194_v53 }
0x2072   :  { %8018 = vrcp.f32 %v4359_v50 }
0x2073   :  { %v4033_v56 = vpop.permute.xlu0 %4032  ;;  %8020 = vrcp.f32 %v4524_v55 }
0x2074   :  { %7632 = vmatpush3.msra.mxu1 %v4033_v56  ;;  %v4854_v18 = vpop.xlane.xlu1 %4853  ;;  %8022 = vrcp.f32 %v4689_v52 }
0x2075   :  { %7641 = vmatprep.subr.mxu1 %v8190_v0  ;;  %8024 = vrcp.f32 %v4854_v18 }
0x2077   :  { %v4528_v3 = vpop.permute.xlu0 %4527 }
0x2078   :  { %v4198_v44 = vpop.permute.xlu1 %4197 }
0x207b   :  { %v4858_v51 = vpop.permute.xlu0 %4857 }
0x207c   :  { %v4363_v60 = vpop.permute.xlu1 %4362 }
0x207d   :  { %v8015_v57 = vpop.eup %8014 }
0x207e   :  { %v4031_v5 = vmul.f32 %v8015_v57, %v8009_v43  ;;  %v8017_v58 = vpop.eup %8016 }
0x207f   :  { %v4196_v28 = vmul.f32 %v8017_v58, %v8003_v29  ;;  %v8019_v59 = vpop.eup %8018 }
0x2080   :  { %7634 = vmatmul.mubr.msk.f32.vlgmr.msra.gmra.mxu1 %vm268_vm3, %v4031_v5  ;;  %v4361_v1 = vmul.f32 %v8019_v59, %v8005_v35  ;;  %v8021_v2 = vpop.eup %8020  ;;  %v4693_v11 = vpop.permute.xlu1 %4692  ;;  %v5137_v59 = vld [vmem:[%s9542_s5 + $0x18] sm:$0xff] }
0x2081   :  { %7642 = vmatpush3.msra.mxu1 %v4198_v44  ;;  %7643 = vmatprep.mubr.msk.f32.mxu1 %vm8191_vm0, %v8190_v0  ;;  %v4526_v4 = vmul.f32 %v8021_v2, %v8011_v12  ;;  %v8023_v6 = vpop.eup %8022  ;;  %v6982_v2 = vld [vmem:[%s9538_s1 + $0x18] sm:$0xff] }
0x2082   :  { %7651 = vmatprep.subr.mxu1 %v8190_v0  ;;  %v4691_v24 = vmul.f32 %v8023_v6, %v9080_v40  ;;  %v8025_v63 = vpop.eup %8024  ;;  %7708 = vmatprep.subr.mxu0 %v5137_v59  ;;  %v5058_v6 = vld [vmem:[%s9541_s4 + $0x8] sm:$0xff] }
0x2083   :  { %v4856_v15 = vmul.f32 %v8025_v63, %v8013_v48 }
0x2084   :  { %7644 = vmatmul.mubr.msk.f32.vlgmr.msra.gmra.mxu1 %vm268_vm3, %v4196_v28  ;;  %v4935_v36 = vpop.permute.xlu1 %4934 }
0x2085   :  { %7652 = vmatpush3.msra.mxu1 %v4363_v60  ;;  %7653 = vmatprep.mubr.msk.f32.mxu1 %vm8191_vm0, %v8190_v0  ;;  %v4961_v41 = vsel %vm192_vm2, %v8999_v62, %v4935_v36  ;;  %v5134_v60 = vld [vmem:[%s9542_s5] sm:$0xff] }
0x2086   :  { %7661 = vmatprep.subr.mxu1 %v8190_v0 }
0x2088   :  { %7654 = vmatmul.mubr.msk.f32.vlgmr.msra.gmra.mxu1 %vm268_vm3, %v4361_v1  ;;  %v6981_v1 = vld [vmem:[%s9538_s1 + $0x10] sm:$0xff] }
0x2089   :  { %7662 = vmatpush3.msra.mxu1 %v4528_v3  ;;  %7663 = vmatprep.mubr.msk.f32.mxu1 %vm8191_vm0, %v8190_v0  ;;  %v5060_v3 = vld [vmem:[%s9541_s4 + $0x18] sm:$0xff] }
0x208a   :  { %7671 = vmatprep.subr.mxu1 %v8190_v0 }
0x208c   :  { %7664 = vmatmul.mubr.msk.f32.vlgmr.msra.gmra.mxu1 %vm268_vm3, %v4526_v4  ;;  %v5059_v4 = vld [vmem:[%s9541_s4 + $0x10] sm:$0xff] }
0x208d   :  { %7672 = vmatpush3.msra.mxu1 %v4693_v11  ;;  %7673 = vmatprep.mubr.msk.f32.mxu1 %vm8191_vm0, %v8190_v0  ;;  %v5057_v11 = vld [vmem:[%s9541_s4] sm:$0xff]  ;;  %s9624_s4 = smov 96  }
0x208e   :  { %7681 = vmatprep.subr.mxu1 %v8190_v0 }
0x2090   :  { %7674 = vmatmul.mubr.msk.f32.vlgmr.msra.gmra.mxu1 %vm268_vm3, %v4691_v24 }
0x2091   :  { %7682 = vmatpush3.msra.mxu1 %v4858_v51  ;;  %7683 = vmatprep.mubr.msk.f32.mxu1 %vm8191_vm0, %v8190_v0 }
0x2092   :  { %7697 = vmatprep.subr.mxu1 %v8190_v0 }
0x2094   :  { %7684 = vmatmul.mubr.msk.f32.vlgmr.msra.gmra.mxu1 %vm268_vm3, %v4856_v15 }
0x2095   :  { %7705 = vmatprep.mubr.msk.f32.mxu1 %vm8191_vm0, %v8190_v0  ;;  %7698 = vmatpush3.msra.mxu1 %v5060_v3 }
0x2096   :  { %7699 = vmatprep.subr.mxu1 %v8190_v0 }
0x2097   :  { %7700 = vmatpush3.msra.mxu1 %v5059_v4 }
0x2098   :  { %7701 = vmatprep.subr.mxu1 %v8190_v0 }
0x2099   :  { %7702 = vmatpush3.msra.mxu1 %v5058_v6 }
0x209a   :  { %7703 = vmatprep.subr.mxu1 %v8190_v0 }
0x209b   :  { %7704 = vmatpush3.msra.mxu1 %v5057_v11 }
0x209c   :  { %7719 = vmatprep.subr.mxu1 %v8190_v0 }
0x2140   :  { %v4104_v22 = vpop.f32.mrf.mxu1 }
0x2141   :  { %4938 = vrot.lane.b32.xlu0 %v4104_v22, %s9605_s18 }
0x2142   :  { %v7635_v32 = vpop.f32.mrf.mxu1 }
0x2144   :  { %v4269_v17 = vpop.f32.mrf.mxu1 }
0x2145   :  { %4942 = vrot.lane.b32.xlu1 %v4269_v17, %s9603_s19 }
0x2146   :  { %v7645_v21 = vpop.f32.mrf.mxu1 }
0x2148   :  { %v4434_v25 = vpop.f32.mrf.mxu1 }
0x2149   :  { %4946 = vrot.lane.b32.xlu0 %v4434_v25, %s9606_s7 }
0x214a   :  { %v7655_v27 = vpop.f32.mrf.mxu1 }
0x214c   :  { %v4599_v29 = vpop.f32.mrf.mxu1 }
0x214d   :  { %4950 = vrot.lane.b32.xlu1 %v4599_v29, %s9604_s22 }
0x214e   :  { %v7665_v45 = vpop.f32.mrf.mxu1 }
0x2150   :  { %v4764_v30 = vpop.f32.mrf.mxu1 }
0x2151   :  { %4954 = vrot.lane.b32.xlu0 %v4764_v30, %s9607_s9 }
0x2152   :  { %v7675_v33 = vpop.f32.mrf.mxu1 }
0x2154   :  { %v4929_v34 = vpop.f32.mrf.mxu1 }
0x2155   :  { %4958 = vrot.lane.b32.xlu1 %v4929_v34, %s9608_s20 }
0x2156   :  { %v7685_v35 = vpop.f32.mrf.mxu1 }
0x21b3   :  { %v4939_v38 = vpop.permute.xlu0 %4938 }
0x21b4   :  { %v4962_v43 = vsel %vm268_vm3, %v4961_v41, %v4939_v38 }
0x21b7   :  { %v4943_v39 = vpop.permute.xlu1 %4942 }
0x21b8   :  { %v4963_v61 = vsel %vm1541_vm4, %v4962_v43, %v4943_v39 }
0x21bb   :  { %v4947_v40 = vpop.permute.xlu0 %4946 }
0x21bc   :  { %v4964_v48 = vsel %vm1543_vm5, %v4963_v61, %v4947_v40 }
0x21bf   :  { %v4951_v12 = vpop.permute.xlu1 %4950 }
0x21c0   :  { %v4965_v49 = vsel %vm1545_vm6, %v4964_v48, %v4951_v12 }
0x21c3   :  { %v4955_v47 = vpop.permute.xlu0 %4954 }
0x21c4   :  { %v4966_v50 = vsel %vm1547_vm7, %v4965_v49, %v4955_v47 }
0x21c7   :  { %v4959_v52 = vpop.permute.xlu1 %4958 }
0x21c8   :  { %v4967_v53 = vsel %vm1549_vm8, %v4966_v50, %v4959_v52 }
0x21c9   :  { %7695 = vmatmul.mubr.msk.f32.vlgmr.msra.gmra.mxu0 %vm114_vm1, %v4967_v53 }
0x21ca   :  { %7709 = vmatpush3.msra.mxu0 %v5137_v59  ;;  %7716 = vmatprep.mubr.msk.f32.mxu0 %vm114_vm1, %v6981_v1 }
0x2289   :  { %v5037_v54 = vpop.f32.mrf.mxu0 }
0x228a   :  { %v5038_v62 = vadd.f32 %v5037_v54, %v8534_v46  ;;  %v5136_v46 = vld [vmem:[%s9542_s5 + $0x10] sm:$0xff] }
0x228b   :  { %v7696_v55 = vpop.f32.mrf.mxu0  ;;  %7710 = vmatprep.subr.mxu0 %v5136_v46 }
0x228c   :  { %v5041_v56 = vadd.f32 %v5038_v62, %v8941_v31  ;;  %7711 = vmatpush3.msra.mxu0 %v5136_v46  ;;  %v5135_v31 = vld [vmem:[%s9542_s5 + $0x8] sm:$0xff] }
0x228d   :  { %7712 = vmatprep.subr.mxu0 %v5135_v31 }
0x228e   :  { %v5042_v18 = vsel %vm114_vm1, %v5041_v56, 0.0  ;;  %7713 = vmatpush3.msra.mxu0 %v5135_v31 }
0x228f   :  { %5043 = vadd.xlane.f32.xlu0 %v5042_v18  ;;  %7714 = vmatprep.subr.mxu0 %v5134_v60 }
0x2290   :  { %7715 = vmatpush3.msra.mxu0 %v5134_v60 }
0x2291   :  { %7717 = vmatmul.mubr.msk.f32.vlgmr.msra.gmra.mxu0 %vm114_vm1, %v6982_v2  ;;  %7726 = vmatprep.subr.mxu0 %v8190_v0 }
0x2292   :  { %7730 = vmatprep.mubr.msk.f32.mxu0 %vm8191_vm0, %v8190_v0 }
0x2318   :  { %v5044_v57 = vpop.xlane.xlu0 %5043 }
0x2319   :  { %v5045_v44 = vmul.f32 0.03125, %v5044_v57 }
0x231b   :  { %v5046_v5 = vsub.f32 %v5041_v56, %v5045_v44 }
0x231d   :  { %v5047_v58 = vmul.f32 %v5046_v5, %v5046_v5 }
0x231f   :  { %v5048_v28 = vsel %vm114_vm1, %v5047_v58, 0.0 }
0x2320   :  { %5049 = vadd.xlane.f32.xlu1 %v5048_v28 }
0x2351   :  { %v7718_v21 = vpop.f32.mrf.mxu0 }
0x2352   :  { %v9193_v25 = vadd.f32 %v7718_v21, %v8600_v20 }
0x2353   :  { %v5210_v27 = vpop.f32.mrf.mxu0 }
0x2354   :  { %5393 = vrot.lane.b32.xlu0 %v9193_v25, %s8193_s27 }
0x23a9   :  { %v5050_v24 = vpop.xlane.xlu1 %5049 }
0x23aa   :  { %v5051_v63 = vmul.f32 0.03125, %v5050_v24 }
0x23ac   :  { %v5052_v51 = vadd.f32 1e-05, %v5051_v63 }
0x23ae   :  { %8026 = vrsqrt.f32 %v5052_v51 }
0x23bb   :  { %v8027_v15 = vpop.eup %8026 }
0x23bc   :  { %v5054_v22 = vmul.f32 %v8027_v15, %v5046_v5 }
0x23be   :  { %v5055_v32 = vmul.f32 %v5054_v22, %v8582_v13  ;;  %v9200_v13 = vadd.f32 %v5210_v27, %v8600_v20 }
0x23c0   :  { %v9186_v17 = vadd.f32 %v5055_v32, %v8585_v16  ;;  %5391 = vrot.lane.b32.xlu1 %v9200_v13, %s8193_s27 }
0x23c2   :  { %7706 = vmatmul.mubr.msk.f32.vlgmr.msra.gmra.mxu1 %vm114_vm1, %v9186_v17 }
0x23c3   :  { %7723 = vmatprep.mubr.msk.f32.mxu1 %vm8191_vm0, %v8190_v0  ;;  %7720 = vmatpush3.xpose.msk.msra.mxu1 %vm192_vm2, %v9193_v25 }
0x23c4   :  { %7721 = vmatprep.subr.mxu1 %v8190_v0 }
0x23c6   :  { %v5394_v33 = vpop.permute.xlu0 %5393 }
0x23c7   :  { %7722 = vmatpush3.xpose.msk.msra.mxu1 %vm192_vm2, %v9200_v13 }
0x23c8   :  { %7733 = vmatprep.subr.mxu1 %v8190_v0 }
0x2432   :  { %v5392_v20 = vpop.permute.xlu1 %5391 }
0x2482   :  { %v5130_v16 = vpop.f32.mrf.mxu1 }
0x2483   :  { %v5131_v29 = vadd.f32 %v5130_v16, %v8620_v9 }
0x2484   :  { %v7707_v45 = vpop.f32.mrf.mxu1 }
0x2485   :  { %v9209_v30 = vmul.f32 0.5, %v5131_v29 }
0x2487   :  { %5389 = vrot.lane.b32.xlu0 %v9209_v30, %s8193_s27  ;;  %7724 = vmatmul.mubr.msk.f32.vlgmr.msra.gmra.mxu1 %vm192_vm2, %v9209_v30  ;;  %s9625_s27 = smov 92  }
0x2488   :  { %7734 = vmatpush3.xpose.msk.msra.mxu1 %vm192_vm2, %v5394_v33  ;;  %7737 = vmatprep.mubr.msk.f32.mxu1 %vm8191_vm0, %v8190_v0 }
0x2489   :  { %7735 = vmatprep.subr.mxu1 %v8190_v0 }
0x248c   :  { %7736 = vmatpush3.xpose.msk.msra.mxu1 %vm192_vm2, %v5392_v20 }
0x248d   :  { %7754 = vmatprep.subr.mxu1 %v8190_v0 }
0x24f9   :  { %v5390_v9 = vpop.permute.xlu0 %5389 }
0x24fa   :  { %7738 = vmatmul.mubr.msk.f32.vlgmr.msra.gmra.mxu1 %vm192_vm2, %v5390_v9 }
0x24fb   :  { %7758 = vmatprep.mubr.msk.f32.mxu1 %vm8191_vm0, %v8190_v0 }
0x2547   :  { %v5295_v34 = vpop.f32.mrf.mxu1 }
0x2548   :  { %v5299_v35 = vsel %vm1543_vm5, %v5295_v34, -inf }
0x2549   :  { %5300 = vmax.xlane.f32.xlu1 %v5299_v35  ;;  %v7725_v36 = vpop.f32.mrf.mxu1 }
0x255a   :  { %5310 = vrot.lane.b32.xlu1 %v9200_v13, %s9624_s4 }
0x255e   :  { %5484 = vrot.lane.b32.xlu1 %v9193_v25, %s9625_s27 }
0x2562   :  { %5565 = vrot.lane.b32.xlu1 %v9193_v25, %s9626_s28 }
0x25ba   :  { %v5467_v38 = vpop.f32.mrf.mxu1 }
0x25bb   :  { %v5471_v39 = vsel %vm1543_vm5, %v5467_v38, -inf }
0x25bc   :  { %5472 = vmax.xlane.f32.xlu0 %v5471_v39  ;;  %v7739_v40 = vpop.f32.mrf.mxu1 }
0x25d2   :  { %5312 = vrot.lane.b32.xlu0 %v9193_v25, %s9624_s4  ;;  %v5301_v41 = vpop.xlane.xlu1 %5300 }
0x25d3   :  { %v5302_v43 = vsub.f32 %v5295_v34, %v5301_v41 }
0x25d5   :  { %v5303_v12 = vmul.f32 1.442695, %v5302_v43 }
0x25d6   :  { %v5311_v53 = vpop.permute.xlu1 %5310 }
0x25d7   :  { %8028 = vpow2.f32 %v5303_v12 }
0x25da   :  { %v5485_v57 = vpop.permute.xlu1 %5484 }
0x25de   :  { %v5566_v5 = vpop.permute.xlu1 %5565 }
0x25e4   :  { %v8029_v61 = vpop.eup %8028 }
0x25e5   :  { %v5305_v47 = vsel %vm1543_vm5, %v8029_v61, 0.0 }
0x25f1   :  { %5306 = vadd.xlane.f32.xlu0 %v5305_v47 }
0x2607   :  { %5482 = vrot.lane.b32.xlu0 %v9200_v13, %s9625_s27 }
0x260b   :  { %5563 = vrot.lane.b32.xlu0 %v9200_v13, %s9626_s28 }
0x2645   :  { %v5473_v48 = vpop.xlane.xlu0 %5472 }
0x2646   :  { %v5474_v49 = vsub.f32 %v5467_v38, %v5473_v48 }
0x2648   :  { %v5475_v50 = vmul.f32 1.442695, %v5474_v49 }
0x2649   :  { %v5313_v52 = vpop.permute.xlu0 %5312 }
0x264a   :  { %8030 = vpow2.f32 %v5475_v50  ;;  %7727 = vmatpush3.msra.mxu0 %v5313_v52 }
0x264b   :  { %7728 = vmatprep.subr.mxu0 %v8190_v0 }
0x264c   :  { %7729 = vmatpush3.msra.mxu0 %v5311_v53 }
0x264d   :  { %7740 = vmatprep.subr.mxu0 %v8190_v0 }
0x2657   :  { %v8031_v54 = vpop.eup %8030 }
0x2658   :  { %v5477_v62 = vsel %vm1543_vm5, %v8031_v54, 0.0 }
0x2659   :  { %5478 = vadd.xlane.f32.xlu1 %v5477_v62 }
0x266a   :  { %5561 = vrot.lane.b32.xlu1 %v9209_v30, %s9626_s28 }
0x266e   :  { %5654 = vrot.lane.b32.xlu1 %v9200_v13, %s9627_s29 }
0x267a   :  { %v5307_v55 = vpop.xlane.xlu0 %5306 }
0x267b   :  { %8032 = vrcp.f32 %v5307_v55 }
0x267e   :  { %v5483_v44 = vpop.permute.xlu0 %5482 }
0x2682   :  { %v5564_v46 = vpop.permute.xlu0 %5563 }
0x2688   :  { %v8033_v56 = vpop.eup %8032 }
0x2689   :  { %v5309_v18 = vmul.f32 %v8033_v56, %v8029_v61 }
0x268b   :  { %7731 = vmatmul.mubr.msk.f32.vlgmr.msra.gmra.mxu0 %vm1543_vm5, %v5309_v18 }
0x268c   :  { %7741 = vmatpush3.msra.mxu0 %v5485_v57  ;;  %7744 = vmatprep.mubr.msk.f32.mxu0 %vm8191_vm0, %v8190_v0 }
0x268d   :  { %7742 = vmatprep.subr.mxu0 %v8190_v0 }
0x268e   :  { %7743 = vmatpush3.msra.mxu0 %v5483_v44 }
0x268f   :  { %7747 = vmatprep.subr.mxu0 %v8190_v0 }
0x26e2   :  { %v5479_v58 = vpop.xlane.xlu1 %5478 }
0x26e3   :  { %8034 = vrcp.f32 %v5479_v58 }
0x26e6   :  { %v5562_v31 = vpop.permute.xlu1 %5561 }
0x26ea   :  { %v5655_v22 = vpop.permute.xlu1 %5654 }
0x26f0   :  { %v8035_v28 = vpop.eup %8034 }
0x26f1   :  { %v5481_v59 = vmul.f32 %v8035_v28, %v8031_v54 }
0x26f3   :  { %7745 = vmatmul.mubr.msk.f32.vlgmr.msra.gmra.mxu0 %vm1543_vm5, %v5481_v59 }
0x26f4   :  { %7748 = vmatpush3.xpose.msk.msra.mxu0 %vm192_vm2, %v5566_v5  ;;  %7751 = vmatprep.mubr.msk.f32.mxu0 %vm8191_vm0, %v8190_v0 }
0x26f5   :  { %7749 = vmatprep.subr.mxu0 %v8190_v0 }
0x26f8   :  { %7750 = vmatpush3.xpose.msk.msra.mxu0 %vm192_vm2, %v5564_v46 }
0x26f9   :  { %7768 = vmatprep.subr.mxu0 %v8190_v0 }
0x26fb   :  { %7752 = vmatmul.mubr.msk.f32.vlgmr.msra.gmra.mxu0 %vm192_vm2, %v5562_v31 }
0x26fc   :  { %7772 = vmatprep.mubr.msk.f32.mxu0 %vm8191_vm0, %v8190_v0 }
0x274b   :  { %v9261_v60 = vpop.f32.mrf.mxu0 }
0x274d   :  { %v7732_v1 = vpop.f32.mrf.mxu0 }
0x27b3   :  { %v9263_v2 = vpop.f32.mrf.mxu0 }
0x27b5   :  { %v7746_v3 = vpop.f32.mrf.mxu0 }
0x27bb   :  { %v5639_v4 = vpop.f32.mrf.mxu0 }
0x27bc   :  { %v5643_v6 = vsel %vm1543_vm5, %v5639_v4, -inf }
0x27bd   :  { %5644 = vmax.xlane.f32.xlu0 %v5643_v6  ;;  %v7753_v11 = vpop.f32.mrf.mxu0 }
0x27d3   :  { %5656 = vrot.lane.b32.xlu0 %v9193_v25, %s9627_s29 }
0x27d7   :  { %5737 = vrot.lane.b32.xlu0 %v9193_v25, %s9628_s30 }
0x27db   :  { %5733 = vrot.lane.b32.xlu0 %v9209_v30, %s9628_s30 }
0x2846   :  { %v5645_v24 = vpop.xlane.xlu0 %5644 }
0x2847   :  { %v5646_v63 = vsub.f32 %v5639_v4, %v5645_v24 }
0x2849   :  { %v5647_v51 = vmul.f32 1.442695, %v5646_v63 }
0x284a   :  { %v5657_v15 = vpop.permute.xlu0 %5656 }
0x284b   :  { %8036 = vpow2.f32 %v5647_v51  ;;  %7755 = vmatpush3.msra.mxu1 %v5657_v15 }
0x284c   :  { %7756 = vmatprep.subr.mxu1 %v8190_v0 }
0x284d   :  { %7757 = vmatpush3.msra.mxu1 %v5655_v22 }
0x284e   :  { %7761 = vmatprep.subr.mxu1 %v8190_v0  ;;  %v5738_v45 = vpop.permute.xlu0 %5737 }
0x2852   :  { %v5734_v20 = vpop.permute.xlu0 %5733 }
0x2858   :  { %v8037_v32 = vpop.eup %8036 }
0x2859   :  { %v5649_v21 = vsel %vm1543_vm5, %v8037_v32, 0.0 }
0x285a   :  { %5650 = vadd.xlane.f32.xlu1 %v5649_v21 }
0x286b   :  { %5735 = vrot.lane.b32.xlu1 %v9200_v13, %s9628_s30 }
0x28e3   :  { %v5651_v27 = vpop.xlane.xlu1 %5650 }
0x28e4   :  { %8038 = vrcp.f32 %v5651_v27 }
0x28e7   :  { %v5736_v33 = vpop.permute.xlu1 %5735 }
0x28f1   :  { %v8039_v16 = vpop.eup %8038 }
0x28f2   :  { %v5653_v29 = vmul.f32 %v8039_v16, %v8037_v32 }
0x28f4   :  { %7759 = vmatmul.mubr.msk.f32.vlgmr.msra.gmra.mxu1 %vm1543_vm5, %v5653_v29 }
0x28f5   :  { %7762 = vmatpush3.xpose.msk.msra.mxu1 %vm192_vm2, %v5738_v45  ;;  %7765 = vmatprep.mubr.msk.f32.mxu1 %vm8191_vm0, %v8190_v0 }
0x28f6   :  { %7763 = vmatprep.subr.mxu1 %v8190_v0 }
0x28f9   :  { %7764 = vmatpush3.xpose.msk.msra.mxu1 %vm192_vm2, %v5736_v33 }
0x28fa   :  { %7782 = vmatprep.subr.mxu1 %v8190_v0 }
0x28fc   :  { %7766 = vmatmul.mubr.msk.f32.vlgmr.msra.gmra.mxu1 %vm192_vm2, %v5734_v20 }
0x28fd   :  { %7786 = vmatprep.mubr.msk.f32.mxu1 %vm8191_vm0, %v8190_v0 }
0x29b4   :  { %v9287_v9 = vpop.f32.mrf.mxu1 }
0x29b6   :  { %v7760_v34 = vpop.f32.mrf.mxu1 }
0x29bc   :  { %v5811_v35 = vpop.f32.mrf.mxu1 }
0x29bd   :  { %v5815_v36 = vsel %vm1543_vm5, %v5811_v35, -inf }
0x29be   :  { %5816 = vmax.xlane.f32.xlu1 %v5815_v36  ;;  %v7767_v38 = vpop.f32.mrf.mxu1 }
0x29cf   :  { %5826 = vrot.lane.b32.xlu1 %v9200_v13, %s9614_s2 }
0x29d3   :  { %5909 = vrot.lane.b32.xlu1 %v9193_v25, %s9611_s6 }
0x29d7   :  { %5905 = vrot.lane.b32.xlu1 %v9209_v30, %s9611_s6 }
0x29db   :  { %5998 = vrot.lane.b32.xlu1 %v9200_v13, %s9615_s17 }
0x2a47   :  { %v5817_v39 = vpop.xlane.xlu1 %5816 }
0x2a48   :  { %v5818_v40 = vsub.f32 %v5811_v35, %v5817_v39 }
0x2a4a   :  { %v5819_v41 = vmul.f32 1.442695, %v5818_v40 }
0x2a4b   :  { %v5827_v48 = vpop.permute.xlu1 %5826 }
0x2a4c   :  { %8040 = vpow2.f32 %v5819_v41 }
0x2a4f   :  { %v5910_v52 = vpop.permute.xlu1 %5909 }
0x2a53   :  { %v5906_v54 = vpop.permute.xlu1 %5905 }
0x2a57   :  { %v5999_v59 = vpop.permute.xlu1 %5998 }
0x2a59   :  { %v8041_v43 = vpop.eup %8040 }
0x2a5a   :  { %v5821_v12 = vsel %vm1543_vm5, %v8041_v43, 0.0 }
0x2a5b   :  { %5822 = vadd.xlane.f32.xlu0 %v5821_v12 }
0x2a71   :  { %5828 = vrot.lane.b32.xlu0 %v9193_v25, %s9614_s2 }
0x2a75   :  { %5907 = vrot.lane.b32.xlu0 %v9200_v13, %s9611_s6 }
0x2ae4   :  { %v5823_v61 = vpop.xlane.xlu0 %5822 }
0x2ae5   :  { %8042 = vrcp.f32 %v5823_v61 }
0x2ae8   :  { %v5829_v47 = vpop.permute.xlu0 %5828 }
0x2ae9   :  { %7769 = vmatpush3.msra.mxu0 %v5829_v47 }
0x2aea   :  { %7770 = vmatprep.subr.mxu0 %v8190_v0 }
0x2aeb   :  { %7771 = vmatpush3.msra.mxu0 %v5827_v48 }
0x2aec   :  { %7775 = vmatprep.subr.mxu0 %v8190_v0  ;;  %v5908_v53 = vpop.permute.xlu0 %5907 }
0x2af2   :  { %v8043_v49 = vpop.eup %8042 }
0x2af3   :  { %v5825_v50 = vmul.f32 %v8043_v49, %v8041_v43 }
0x2af5   :  { %7773 = vmatmul.mubr.msk.f32.vlgmr.msra.gmra.mxu0 %vm1543_vm5, %v5825_v50 }
0x2af6   :  { %7776 = vmatpush3.xpose.msk.msra.mxu0 %vm192_vm2, %v5910_v52  ;;  %7779 = vmatprep.mubr.msk.f32.mxu0 %vm8191_vm0, %v8190_v0 }
0x2af7   :  { %7777 = vmatprep.subr.mxu0 %v8190_v0 }
0x2afa   :  { %7778 = vmatpush3.xpose.msk.msra.mxu0 %vm192_vm2, %v5908_v53 }
0x2afb   :  { %7796 = vmatprep.subr.mxu0 %v8190_v0 }
0x2afd   :  { %7780 = vmatmul.mubr.msk.f32.vlgmr.msra.gmra.mxu0 %vm192_vm2, %v5906_v54 }
0x2afe   :  { %7800 = vmatprep.mubr.msk.f32.mxu0 %vm8191_vm0, %v8190_v0 }
0x2bb5   :  { %v9315_v62 = vpop.f32.mrf.mxu0 }
0x2bb7   :  { %v7774_v55 = vpop.f32.mrf.mxu0 }
0x2bbd   :  { %v5983_v56 = vpop.f32.mrf.mxu0 }
0x2bbe   :  { %v5987_v18 = vsel %vm1543_vm5, %v5983_v56, -inf }
0x2bbf   :  { %5988 = vmax.xlane.f32.xlu0 %v5987_v18  ;;  %v7781_v57 = vpop.f32.mrf.mxu0 }
0x2bd5   :  { %6000 = vrot.lane.b32.xlu0 %v9193_v25, %s9615_s17 }
0x2bd9   :  { %6081 = vrot.lane.b32.xlu0 %v9193_v25, %s9612_s15 }
0x2bdd   :  { %6077 = vrot.lane.b32.xlu0 %v9209_v30, %s9612_s15 }
0x2c48   :  { %v5989_v44 = vpop.xlane.xlu0 %5988 }
0x2c49   :  { %v5990_v5 = vsub.f32 %v5983_v56, %v5989_v44 }
0x2c4b   :  { %v5991_v58 = vmul.f32 1.442695, %v5990_v5 }
0x2c4c   :  { %v6001_v28 = vpop.permute.xlu0 %6000 }
0x2c4d   :  { %8044 = vpow2.f32 %v5991_v58  ;;  %7783 = vmatpush3.msra.mxu1 %v6001_v28 }
0x2c4e   :  { %7784 = vmatprep.subr.mxu1 %v8190_v0 }
0x2c4f   :  { %7785 = vmatpush3.msra.mxu1 %v5999_v59 }
0x2c50   :  { %7789 = vmatprep.subr.mxu1 %v8190_v0  ;;  %v6082_v6 = vpop.permute.xlu0 %6081 }
0x2c54   :  { %v6078_v24 = vpop.permute.xlu0 %6077 }
0x2c5a   :  { %v8045_v46 = vpop.eup %8044 }
0x2c5b   :  { %v5993_v31 = vsel %vm1543_vm5, %v8045_v46, 0.0 }
0x2c5c   :  { %5994 = vadd.xlane.f32.xlu1 %v5993_v31 }
0x2c6d   :  { %6079 = vrot.lane.b32.xlu1 %v9200_v13, %s9612_s15 }
0x2ce5   :  { %v5995_v1 = vpop.xlane.xlu1 %5994 }
0x2ce6   :  { %8046 = vrcp.f32 %v5995_v1 }
0x2ce9   :  { %v6080_v11 = vpop.permute.xlu1 %6079 }
0x2cf3   :  { %v8047_v3 = vpop.eup %8046 }
0x2cf4   :  { %v5997_v4 = vmul.f32 %v8047_v3, %v8045_v46 }
0x2cf6   :  { %7787 = vmatmul.mubr.msk.f32.vlgmr.msra.gmra.mxu1 %vm1543_vm5, %v5997_v4 }
0x2cf7   :  { %7790 = vmatpush3.xpose.msk.msra.mxu1 %vm192_vm2, %v6082_v6  ;;  %7793 = vmatprep.mubr.msk.f32.mxu1 %vm8191_vm0, %v8190_v0 }
0x2cf8   :  { %7791 = vmatprep.subr.mxu1 %v8190_v0 }
0x2cfb   :  { %7792 = vmatpush3.xpose.msk.msra.mxu1 %vm192_vm2, %v6080_v11 }
0x2cfc   :  { %7810 = vmatprep.subr.mxu1 %v8190_v0 }
0x2cfe   :  { %7794 = vmatmul.mubr.msk.f32.vlgmr.msra.gmra.mxu1 %vm192_vm2, %v6078_v24 }
0x2cff   :  { %7814 = vmatprep.mubr.msk.f32.mxu1 %vm8191_vm0, %v8190_v0 }
0x2db6   :  { %v9339_v63 = vpop.f32.mrf.mxu1 }
0x2db8   :  { %v7788_v51 = vpop.f32.mrf.mxu1 }
0x2db9   :  { %v8073_v51 = vld [vmem:[#allocation5 + $0x8] sm:$0xff] }
0x2dbe   :  { %v6155_v15 = vpop.f32.mrf.mxu1 }
0x2dbf   :  { %v6159_v22 = vsel %vm1543_vm5, %v6155_v15, -inf }
0x2dc0   :  { %6160 = vmax.xlane.f32.xlu1 %v6159_v22  ;;  %v7795_v32 = vpop.f32.mrf.mxu1 }
0x2dd1   :  { %6170 = vrot.lane.b32.xlu1 %v9200_v13, %s9616_s14 }
0x2dd5   :  { %6253 = vrot.lane.b32.xlu1 %v9193_v25, %s9613_s12 }
0x2dd9   :  { %6249 = vrot.lane.b32.xlu1 %v9209_v30, %s9613_s12 }
0x2ddd   :  { %6342 = vrot.lane.b32.xlu1 %v9200_v13, %s9617_s0 }
0x2e49   :  { %v6161_v21 = vpop.xlane.xlu1 %6160 }
0x2e4a   :  { %v6162_v27 = vsub.f32 %v6155_v15, %v6161_v21  ;;  %v8074_v15 = vld [vmem:[#allocation5] sm:$0xff] }
0x2e4c   :  { %v6163_v16 = vmul.f32 1.442695, %v6162_v27 }
0x2e4d   :  { %v6171_v34 = vpop.permute.xlu1 %6170 }
0x2e4e   :  { %8048 = vpow2.f32 %v6163_v16 }
0x2e51   :  { %v6254_v38 = vpop.permute.xlu1 %6253 }
0x2e55   :  { %v6250_v40 = vpop.permute.xlu1 %6249 }
0x2e59   :  { %v6343_v53 = vpop.permute.xlu1 %6342 }
0x2e5b   :  { %v8049_v29 = vpop.eup %8048 }
0x2e5c   :  { %v6165_v45 = vsel %vm1543_vm5, %v8049_v29, 0.0 }
0x2e5d   :  { %6166 = vadd.xlane.f32.xlu0 %v6165_v45 }
0x2e73   :  { %6172 = vrot.lane.b32.xlu0 %v9193_v25, %s9616_s14 }
0x2e77   :  { %6251 = vrot.lane.b32.xlu0 %v9200_v13, %s9613_s12 }
0x2ee6   :  { %v6167_v33 = vpop.xlane.xlu0 %6166 }
0x2ee7   :  { %8050 = vrcp.f32 %v6167_v33 }
0x2eea   :  { %v6173_v20 = vpop.permute.xlu0 %6172 }
0x2eeb   :  { %7797 = vmatpush3.msra.mxu0 %v6173_v20 }
0x2eec   :  { %7798 = vmatprep.subr.mxu0 %v8190_v0 }
0x2eed   :  { %7799 = vmatpush3.msra.mxu0 %v6171_v34 }
0x2eee   :  { %7803 = vmatprep.subr.mxu0 %v8190_v0  ;;  %v6252_v39 = vpop.permute.xlu0 %6251 }
0x2ef4   :  { %v8051_v35 = vpop.eup %8050 }
0x2ef5   :  { %v6169_v36 = vmul.f32 %v8051_v35, %v8049_v29 }
0x2ef7   :  { %7801 = vmatmul.mubr.msk.f32.vlgmr.msra.gmra.mxu0 %vm1543_vm5, %v6169_v36 }
0x2ef8   :  { %7804 = vmatpush3.xpose.msk.msra.mxu0 %vm192_vm2, %v6254_v38  ;;  %7807 = vmatprep.mubr.msk.f32.mxu0 %vm8191_vm0, %v8190_v0 }
0x2ef9   :  { %7805 = vmatprep.subr.mxu0 %v8190_v0 }
0x2efc   :  { %7806 = vmatpush3.xpose.msk.msra.mxu0 %vm192_vm2, %v6252_v39 }
0x2efd   :  { %7824 = vmatprep.subr.mxu0 %v8190_v0 }
0x2eff   :  { %7808 = vmatmul.mubr.msk.f32.vlgmr.msra.gmra.mxu0 %vm192_vm2, %v6250_v40 }
0x2f00   :  { %7828 = vmatprep.mubr.msk.f32.mxu0 %vm8191_vm0, %v8190_v0 }
0x2fb7   :  { %v6245_v41 = vpop.f32.mrf.mxu0 }
0x2fb9   :  { %v7802_v43 = vpop.f32.mrf.mxu0 }
0x2fba   :  { %v8075_v43 = vld [vmem:[%s9547_s10] sm:$0xff] }
0x2fbf   :  { %v6327_v12 = vpop.f32.mrf.mxu0 }
0x2fc0   :  { %v6331_v61 = vsel %vm1543_vm5, %v6327_v12, -inf }
0x2fc1   :  { %6332 = vmax.xlane.f32.xlu0 %v6331_v61  ;;  %v7809_v47 = vpop.f32.mrf.mxu0 }
0x2fd7   :  { %6344 = vrot.lane.b32.xlu0 %v9193_v25, %s9617_s0 }
0x2fdb   :  { %6425 = vrot.lane.b32.xlu0 %v9193_v25, %s9600_s24 }
0x2fdf   :  { %6421 = vrot.lane.b32.xlu0 %v9209_v30, %s9600_s24 }
0x304a   :  { %v6333_v48 = vpop.xlane.xlu0 %6332 }
0x304b   :  { %v6334_v49 = vsub.f32 %v6327_v12, %v6333_v48 }
0x304d   :  { %v6335_v50 = vmul.f32 1.442695, %v6334_v49 }
0x304e   :  { %v6345_v52 = vpop.permute.xlu0 %6344 }
0x304f   :  { %8052 = vpow2.f32 %v6335_v50  ;;  %7811 = vmatpush3.msra.mxu1 %v6345_v52 }
0x3050   :  { %7812 = vmatprep.subr.mxu1 %v8190_v0 }
0x3051   :  { %7813 = vmatpush3.msra.mxu1 %v6343_v53 }
0x3052   :  { %7817 = vmatprep.subr.mxu1 %v8190_v0  ;;  %v6426_v57 = vpop.permute.xlu0 %6425 }
0x3056   :  { %v6422_v5 = vpop.permute.xlu0 %6421 }
0x305c   :  { %v8053_v54 = vpop.eup %8052 }
0x305d   :  { %v6337_v55 = vsel %vm1543_vm5, %v8053_v54, 0.0 }
0x305e   :  { %6338 = vadd.xlane.f32.xlu1 %v6337_v55 }
0x306f   :  { %6423 = vrot.lane.b32.xlu1 %v9200_v13, %s9600_s24 }
0x30e7   :  { %v6339_v30 = vpop.xlane.xlu1 %6338 }
0x30e8   :  { %8054 = vrcp.f32 %v6339_v30 }
0x30eb   :  { %v6424_v44 = vpop.permute.xlu1 %6423 }
0x30f5   :  { %v8055_v56 = vpop.eup %8054 }
0x30f6   :  { %v6341_v18 = vmul.f32 %v8055_v56, %v8053_v54 }
0x30f8   :  { %7815 = vmatmul.mubr.msk.f32.vlgmr.msra.gmra.mxu1 %vm1543_vm5, %v6341_v18 }
0x30f9   :  { %7818 = vmatpush3.xpose.msk.msra.mxu1 %vm192_vm2, %v6426_v57  ;;  %7821 = vmatprep.mubr.msk.f32.mxu1 %vm8191_vm0, %v8190_v0 }
0x30fa   :  { %7819 = vmatprep.subr.mxu1 %v8190_v0 }
0x30fd   :  { %7820 = vmatpush3.xpose.msk.msra.mxu1 %vm192_vm2, %v6424_v44  ;;  %v6720_v44 = vld [vmem:[#allocation7 + $0x18] sm:$0xff] }
0x30fe   :  { %7842 = vmatprep.subr.mxu1 %v8190_v0 }
0x3100   :  { %7822 = vmatmul.mubr.msk.f32.vlgmr.msra.gmra.mxu1 %vm192_vm2, %v6422_v5  ;;  %v6719_v5 = vld [vmem:[#allocation7 + $0x10] sm:$0xff] }
0x3101   :  { %7850 = vmatprep.mubr.msk.f32.mxu1 %vm8191_vm0, %v8190_v0  ;;  %7843 = vmatpush3.msra.mxu1 %v6720_v44 }
0x3102   :  { %7844 = vmatprep.subr.mxu1 %v8190_v0 }
0x3103   :  { %7845 = vmatpush3.msra.mxu1 %v6719_v5 }
0x3104   :  { %7846 = vmatprep.subr.mxu1 %v8190_v0 }
0x31b8   :  { %v6417_v58 = vpop.f32.mrf.mxu1 }
0x31ba   :  { %v7816_v28 = vpop.f32.mrf.mxu1 }
0x31bb   :  { %v6717_v28 = vld [vmem:[#allocation7] sm:$0xff] }
0x31c0   :  { %v6499_v59 = vpop.f32.mrf.mxu1 }
0x31c1   :  { %v6503_v46 = vsel %vm1543_vm5, %v6499_v59, -inf }
0x31c2   :  { %6504 = vmax.xlane.f32.xlu1 %v6503_v46  ;;  %v7823_v31 = vpop.f32.mrf.mxu1  ;;  %v6809_v46 = vld [vmem:[%s9545_s8 + $0x70] sm:$0xff] }
0x31c3   :  { %v6808_v31 = vld [vmem:[%s9545_s8 + $0x68] sm:$0xff] }
0x31d3   :  { %6514 = vrot.lane.b32.xlu1 %v9200_v13, %s9601_s25 }
0x31d7   :  { %6594 = vrot.lane.b32.xlu1 %v9263_v2, %s9602_s23 }
0x31db   :  { %6602 = vrot.lane.b32.xlu1 %v9315_v62, %s9603_s19 }
0x31df   :  { %6610 = vrot.lane.b32.xlu1 %v6245_v41, %s9604_s22 }
0x324b   :  { %v6505_v1 = vpop.xlane.xlu1 %6504 }
0x324c   :  { %v6506_v3 = vsub.f32 %v6499_v59, %v6505_v1  ;;  %v6810_v59 = vld [vmem:[%s9545_s8 + $0x78] sm:$0xff]  ;;  %v6807_v1 = vld [vmem:[%s9545_s8 + $0x60] sm:$0xff] }
0x324e   :  { %v6507_v4 = vmul.f32 1.442695, %v6506_v3  ;;  %v6806_v3 = vld [vmem:[%s9545_s8 + $0x58] sm:$0xff] }
0x324f   :  { %v6515_v62 = vpop.permute.xlu1 %6514 }
0x3250   :  { %8056 = vpow2.f32 %v6507_v4  ;;  %v6805_v4 = vld [vmem:[%s9545_s8 + $0x50] sm:$0xff] }
0x3253   :  { %v6595_v21 = vpop.permute.xlu1 %6594 }
0x3254   :  { %v6621_v29 = vsel %vm192_vm2, %v9261_v60, %v6595_v21  ;;  %v3433_v60 = vsub.s32 3, %v8331_v7 }
0x3256   :  { %v9430_v12 = vrot.slane %v8075_v43, %v3433_v60 }
0x3257   :  { %v6603_v16 = vpop.permute.xlu1 %6602 }
0x3258   :  { %v3502_v47 = vadd.f32 %v8982_v10, %v9430_v12 }
0x325a   :  { %v3505_v52 = vadd.f32 %v3502_v47, %v8921_v26 }
0x325b   :  { %v6611_v34 = vpop.permute.xlu1 %6610 }
0x325c   :  { %v3506_v7 = vsel %vm114_vm1, %v3505_v52, 0.0 }
0x325d   :  { %v8057_v6 = vpop.eup %8056 }
0x325e   :  { %v6509_v11 = vsel %vm1543_vm5, %v8057_v6, 0.0 }
0x325f   :  { %6510 = vadd.xlane.f32.xlu0 %v6509_v11  ;;  %v6803_v11 = vld [vmem:[%s9545_s8 + $0x40] sm:$0xff] }
0x3275   :  { %6516 = vrot.lane.b32.xlu0 %v9193_v25, %s9601_s25 }
0x3279   :  { %6598 = vrot.lane.b32.xlu0 %v9287_v9, %s9605_s18  ;;  %v8071_v9 = vld [vmem:[#allocation5 + $0x18] sm:$0xff] }
0x327d   :  { %6606 = vrot.lane.b32.xlu0 %v9339_v63, %s9606_s7  ;;  %v8072_v63 = vld [vmem:[#allocation5 + $0x10] sm:$0xff] }
0x3281   :  { %6614 = vrot.lane.b32.xlu0 %v6417_v58, %s9607_s9  ;;  %v6718_v58 = vld [vmem:[#allocation7 + $0x8] sm:$0xff] }
0x3282   :  { %7847 = vmatpush3.msra.mxu1 %v6718_v58 }
0x3283   :  { %7848 = vmatprep.subr.mxu1 %v8190_v0 }
0x3284   :  { %7849 = vmatpush3.msra.mxu1 %v6717_v28 }
0x32e8   :  { %v6511_v13 = vpop.xlane.xlu0 %6510 }
0x32e9   :  { %8058 = vrcp.f32 %v6511_v13  ;;  %v6802_v13 = vld [vmem:[%s9545_s8 + $0x38] sm:$0xff] }
0x32ec   :  { %v6517_v2 = vpop.permute.xlu0 %6516 }
0x32ed   :  { %7825 = vmatpush3.msra.mxu0 %v6517_v2  ;;  %v6801_v2 = vld [vmem:[%s9545_s8 + $0x30] sm:$0xff] }
0x32ee   :  { %7826 = vmatprep.subr.mxu0 %v8190_v0 }
0x32ef   :  { %7827 = vmatpush3.msra.mxu0 %v6515_v62  ;;  %v6800_v62 = vld [vmem:[%s9545_s8 + $0x28] sm:$0xff] }
0x32f0   :  { %7831 = vmatprep.subr.mxu0 %v8190_v0  ;;  %v6599_v27 = vpop.permute.xlu0 %6598 }
0x32f1   :  { %v6622_v33 = vsel %vm268_vm3, %v6621_v29, %v6599_v27  ;;  %v94_v27 = vld [vmem:[%s9547_s10 + $0x8] sm:$0x3] }
0x32f2   :  { %v6623_v20 = vsel %vm1541_vm4, %v6622_v33, %v6603_v16 }
0x32f4   :  { %v6607_v45 = vpop.permute.xlu0 %6606 }
0x32f5   :  { %v6624_v35 = vsel %vm1543_vm5, %v6623_v20, %v6607_v45  ;;  %v3522_v45 = vrot.slane %v94_v27, %v8334_v8  ;;  %v6796_v8 = vld [vmem:[%s9545_s8 + $0x8] sm:$0xff] }
0x32f6   :  { %v8059_v24 = vpop.eup %8058  ;;  %v6625_v38 = vsel %vm1545_vm6, %v6624_v35, %v6611_v34  ;;  %v3527_v35 = vrot.slane %v94_v27, %v8596_v19  ;;  %v6795_v19 = vld [vmem:[%s9545_s8] sm:$0xff] }
0x32f7   :  { %v6513_v25 = vmul.f32 %v8059_v24, %v8057_v6  ;;  %v6804_v6 = vld [vmem:[%s9545_s8 + $0x48] sm:$0xff]  ;;  %v6799_v24 = vld [vmem:[%s9545_s8 + $0x20] sm:$0xff] }
0x32f8   :  { %v6615_v36 = vpop.permute.xlu0 %6614 }
0x32f9   :  { %7829 = vmatmul.mubr.msk.f32.vlgmr.msra.gmra.mxu0 %vm1543_vm5, %v6513_v25  ;;  %v6626_v39 = vsel %vm1547_vm7, %v6625_v38, %v6615_v36  ;;  %v6798_v25 = vld [vmem:[%s9545_s8 + $0x18] sm:$0xff] }
0x32fa   :  { %7832 = vmatpush3.msra.mxu0 %v8071_v9  ;;  %7839 = vmatprep.mubr.msk.f32.mxu0 %vm8191_vm0, %v8190_v0 }
0x32fb   :  { %7833 = vmatprep.subr.mxu0 %v8190_v0 }
0x32fc   :  { %7834 = vmatpush3.msra.mxu0 %v8072_v63 }
0x32fd   :  { %7835 = vmatprep.subr.mxu0 %v8190_v0 }
0x32fe   :  { %7836 = vmatpush3.msra.mxu0 %v8073_v51 }
0x32ff   :  { %7837 = vmatprep.subr.mxu0 %v8190_v0 }
0x3300   :  { %7838 = vmatpush3.msra.mxu0 %v8074_v15 }
0x3301   :  { %7853 = vmatprep.subr.mxu0 %v8190_v0 }
0x33b9   :  { %v6589_v22 = vpop.f32.mrf.mxu0 }
0x33ba   :  { %6618 = vrot.lane.b32.xlu1 %v6589_v22, %s9608_s20 }
0x33bb   :  { %v7830_v32 = vpop.f32.mrf.mxu0 }
0x342c   :  { %v6619_v40 = vpop.permute.xlu1 %6618 }
0x342d   :  { %v6627_v41 = vsel %vm1549_vm8, %v6626_v39, %v6619_v40  ;;  %v6797_v39 = vld [vmem:[%s9545_s8 + $0x10] sm:$0xff]  ;;  %s8221_s8 = smov [#allocation10]  }
0x342e   :  { %7840 = vmatmul.mubr.msk.f32.vlgmr.msra.gmra.mxu0 %vm114_vm1, %v6627_v41  ;;  %s6904_s6 = sshll.u32 %s8221_s8, 4  ;;  %s6905_s6 = int_to_ptr.vmem [resolvable:$true] %s6904_s6 }
0x342f   :  { %7885 = vmatprep.mubr.msk.f32.mxu0 %vm8191_vm0, %v8190_v0  ;;  %7854 = vmatpush3.msra.mxu0 %v6810_v59  ;;  %s8156_s15 = scalar_lea.vmem %s6905_s6, 256  ;;  %p8161_p7 = scmp.lt.s32.totalorder %s6905_s6, %s6905_s6 }
0x3430   :  { %7855 = vmatprep.subr.mxu0 %v8190_v0  ;;  %p8157_p6 = scmp.ne.s32.totalorder %s6905_s6, %s8156_s15  ;;  %p8162_p8 = scmp.lt.s32.totalorder %s8156_s15, %s8156_s15 }
0x3431   :  { %7856 = vmatpush3.msra.mxu0 %v6809_v46 }
0x3432   :  { %7857 = vmatprep.subr.mxu0 %v8190_v0  ;;  %p8163_p9 = por %p8162_p8, %p8161_p7 }
0x3433   :  { %7858 = vmatpush3.msra.mxu0 %v6808_v31 }
0x3434   :  { %7859 = vmatprep.subr.mxu0 %v8190_v0  ;;  %p8164_p10 = pnand %p8163_p9, %p8157_p6 }
0x3435   :  { %7860 = vmatpush3.msra.mxu0 %v6807_v1 }
0x3436   :  { %7861 = vmatprep.subr.mxu0 %v8190_v0 }
0x3437   :  { %7862 = vmatpush3.msra.mxu0 %v6806_v3 }
0x3438   :  { %7863 = vmatprep.subr.mxu0 %v8190_v0 }
0x3439   :  { %7864 = vmatpush3.msra.mxu0 %v6805_v4 }
0x343a   :  { %7865 = vmatprep.subr.mxu0 %v8190_v0 }
0x343b   :  { %7866 = vmatpush3.msra.mxu0 %v6804_v6 }
0x343c   :  { %7867 = vmatprep.subr.mxu0 %v8190_v0 }
0x343d   :  { %7868 = vmatpush3.msra.mxu0 %v6803_v11 }
0x343e   :  { %7869 = vmatprep.subr.mxu0 %v8190_v0 }
0x343f   :  { %7870 = vmatpush3.msra.mxu0 %v6802_v13 }
0x3440   :  { %7871 = vmatprep.subr.mxu0 %v8190_v0 }
0x3441   :  { %7872 = vmatpush3.msra.mxu0 %v6801_v2 }
0x3442   :  { %7873 = vmatprep.subr.mxu0 %v8190_v0 }
0x3443   :  { %7874 = vmatpush3.msra.mxu0 %v6800_v62 }
0x3444   :  { %7875 = vmatprep.subr.mxu0 %v8190_v0 }
0x3445   :  { %7876 = vmatpush3.msra.mxu0 %v6799_v24 }
0x3446   :  { %7877 = vmatprep.subr.mxu0 %v8190_v0 }
0x3447   :  { %7878 = vmatpush3.msra.mxu0 %v6798_v25 }
0x3448   :  { %7879 = vmatprep.subr.mxu0 %v8190_v0 }
0x3449   :  { %7880 = vmatpush3.msra.mxu0 %v6797_v39 }
0x344a   :  { %7881 = vmatprep.subr.mxu0 %v8190_v0 }
0x344b   :  { %7882 = vmatpush3.msra.mxu0 %v6796_v8 }
0x344c   :  { %7883 = vmatprep.subr.mxu0 %v8190_v0 }
0x344d   :  { %7884 = vmatpush3.msra.mxu0 %v6795_v19 }
0x34ee   :  { %v6697_v61 = vpop.f32.mrf.mxu0 }
0x34ef   :  { %v6698_v48 = vadd.f32 %v6697_v61, %v8844_v42 }
0x34f0   :  { %v7841_v49 = vpop.f32.mrf.mxu0 }
0x34f1   :  { %v6701_v50 = vadd.f32 %v6698_v48, %v9186_v17 }
0x34f3   :  { %v6702_v53 = vsel %vm114_vm1, %v6701_v50, 0.0 }
0x34f4   :  { %6703 = vadd.xlane.f32.xlu0 %v6702_v53 }
0x34f8   :  { %3507 = vadd.xlane.f32.xlu0 %v3506_v7 }
0x357d   :  { %v6704_v54 = vpop.xlane.xlu0 %6703 }
0x357e   :  { %v6705_v55 = vmul.f32 0.03125, %v6704_v54 }
0x3580   :  { %v9439_v30 = vsub.f32 %v6701_v50, %v6705_v55 }
0x3581   :  { %v3508_v56 = vpop.xlane.xlu0 %3507 }
0x3582   :  { %v3509_v18 = vmul.f32 0.03125, %v3508_v56  ;;  %v6707_v42 = vmul.f32 %v9439_v30, %v9439_v30 }
0x3584   :  { %v9443_v10 = vsub.f32 %v3505_v52, %v3509_v18  ;;  %v6708_v17 = vsel %vm114_vm1, %v6707_v42, 0.0 }
0x3585   :  { %6709 = vadd.xlane.f32.xlu1 %v6708_v17 }
0x3586   :  { %v3511_v26 = vmul.f32 %v9443_v10, %v9443_v10 }
0x3588   :  { %v3512_v57 = vsel %vm114_vm1, %v3511_v26, 0.0 }
0x3589   :  { %3513 = vadd.xlane.f32.xlu0 %v3512_v57 }
0x360e   :  { %v6710_v9 = vpop.xlane.xlu1 %6709 }
0x360f   :  { %v6711_v63 = vmul.f32 0.03125, %v6710_v9 }
0x3611   :  { %v6712_v51 = vadd.f32 1e-05, %v6711_v63 }
0x3612   :  { %v3514_v15 = vpop.xlane.xlu0 %3513 }
0x3613   :  { %8060 = vrsqrt.f32 %v6712_v51  ;;  %v3515_v22 = vmul.f32 0.03125, %v3514_v15 }
0x3615   :  { %v3516_v32 = vadd.f32 1e-05, %v3515_v22 }
0x3617   :  { %8062 = vrsqrt.f32 %v3516_v32 }
0x3620   :  { %v8061_v21 = vpop.eup %8060 }
0x3621   :  { %v6714_v16 = vmul.f32 %v8061_v21, %v9439_v30 }
0x3623   :  { %v6715_v29 = vmul.f32 %v6714_v16, %v8913_v14 }
0x3624   :  { %v8063_v33 = vpop.eup %8062 }
0x3625   :  { %v6716_v20 = vadd.f32 %v6715_v29, %v8917_v23  ;;  %v3518_v34 = vmul.f32 %v8063_v33, %v9443_v10 }
0x3627   :  { %7851 = vmatmul.mubr.msk.f32.vlgmr.msra.gmra.mxu1 %vm114_vm1, %v6716_v20  ;;  %v3523_v36 = vmul.f32 %v3522_v45, %v3518_v34 }
0x3629   :  { %v3528_v38 = vadd.f32 %v3527_v35, %v3523_v36 }
0x362b   :  { %3529 = vst.msk [vmem:[#allocation10] sm:$0xff] %vm114_vm1, %v3528_v38 }
0x36e7   :  { %v6790_v14 = vpop.f32.mrf.mxu1 }
0x36e8   :  { %v6791_v23 = vadd.f32 %v6790_v14, %v8963_v37 }
0x36e9   :  { %v7852_v40 = vpop.f32.mrf.mxu1 }
0x36ea   :  { %v6794_v41 = vmax.f32 %v6791_v23, 0.0 }
0x36ec   :  { %7886 = vmatmul.mubr.f32.vlgmr.msra.gmra.mxu0 %v6794_v41 }
0x37ac   :  { %v6877_v60 = vpop.f32.mrf.mxu0 }
0x37ad   :  { %v6878_v43 = vadd.f32 %v6877_v60, %v9430_v12 }
0x37ae   :  { %v7887_v61 = vpop.f32.mrf.mxu0 }
0x37af   :  { %v6881_v47 = vadd.f32 %v6878_v43, %v6716_v20 }
0x37b1   :  { %v6882_v48 = vsel %vm114_vm1, %v6881_v47, 0.0 }
0x37b2   :  { %6883 = vadd.xlane.f32.xlu1 %v6882_v48 }
0x383b   :  { %v6884_v0 = vpop.xlane.xlu1 %6883 }
0x383c   :  { %v6885_v49 = vmul.f32 0.03125, %v6884_v0 }
0x383e   :  { %v6886_v50 = vsub.f32 %v6881_v47, %v6885_v49 }
0x3840   :  { %v6887_v52 = vmul.f32 %v6886_v50, %v6886_v50 }
0x3842   :  { %v6888_v53 = vsel %vm114_vm1, %v6887_v52, 0.0 }
0x3843   :  { %6889 = vadd.xlane.f32.xlu0 %v6888_v53 }
0x38cc   :  { %v6890_v7 = vpop.xlane.xlu0 %6889 }
0x38cd   :  { %v6891_v37 = vmul.f32 0.03125, %v6890_v7 }
0x38cf   :  { %v6892_v54 = vadd.f32 1e-05, %v6891_v37 }
0x38d1   :  { %8064 = vrsqrt.f32 %v6892_v54 }
0x38de   :  { %v8065_v55 = vpop.eup %8064 }
0x38df   :  { %v6894_v30 = vmul.f32 %v8065_v55, %v6886_v50 }
0x38e1   :  { %v6895_v12 = vmul.f32 %v6894_v30, %v3522_v45 }
0x38e3   :  { %v6896_v56 = vadd.f32 %v6895_v12, %v3527_v35 }
0x38e5   :  { %6898 = vst.msk [vmem:[#allocation10 + $0x8] sm:$0xff] %vm114_vm1, %v6896_v56 }
0x38e6   :  { %8167 = shalt.err (!%p8164_p10)
}
0x38e7   :  { %s9629_s12 = smov 128  }
0x38e8   :  { %6910 = dma.vmem_to_hbm [thread:$0]  %s6905_s6, 256, %s9548_s11, [#allocation4], %s9629_s12, %s9629_s12, %s9605_s18  }
0x38e9   :  { %8182 = dma.done.wait [#allocation4], 256  }
0x38ea   :  { %8183 = vsyncadd [#allocation4], 4294967040 }
0x38eb   :  { %6914 = vsyncpa [#allocation3], 1 }
0x38ec   :  { %6915 = vsyncpa [#allocation6], 1 }
0x38ed   :  { %6916 = vsyncpa [#allocation9], 1 }
0x38ee   :  { %6917 = vsyncpa [#allocation4], 1 }

</bundles_post_ra>
